<compile_context>
chip_gen: v6e
topology: v6e:2x2x1
jax: 0.10.0
libtpu: 0.0.40
codegen_flags: <defaults>
</compile_context>

<pallas_src>
import functools

import jax
import jax.numpy as jnp
from jax.experimental import pallas as pl
from jax.experimental.pallas import tpu as pltpu


def _round_up(x, m):
    return (x + m - 1) // m * m


# ---------------------------------------------------------------------------
# Pallas kernel 1: tiled  o = relu(x @ w + b)   (used for the three conv layers)
# ---------------------------------------------------------------------------
def _linear_kernel(x_ref, w_ref, b_ref, o_ref, *, relu):
    acc = jnp.dot(x_ref[...], w_ref[...], preferred_element_type=jnp.float32)
    acc = acc + b_ref[...]
    if relu:
        acc = jnp.maximum(acc, 0.0)
    o_ref[...] = acc.astype(o_ref.dtype)


def pallas_linear(x, w_t, b, *, relu=True, out_dtype=jnp.bfloat16,
                  n_row_splits=2):
    """x: (M, K) bf16, w_t: (K, N) bf16, b: (1, N) f32 -> (M, N)."""
    M, K = x.shape
    Kw, N = w_t.shape
    assert K == Kw
    # >=2 row tiles so both v7x TensorCores get work; tile chosen so padding is
    # minimal (conv1: 800 -> 2x400 exact; conv2/3 pad by <=14 rows).
    tm = max(8, _round_up(pl.cdiv(M, n_row_splits), 8))
    grid_m = pl.cdiv(M, tm)
    Mp = grid_m * tm
    if Mp != M:
        x = jnp.pad(x, ((0, Mp - M), (0, 0)))

    out = pl.pallas_call(
        functools.partial(_linear_kernel, relu=relu),
        out_shape=jax.ShapeDtypeStruct((Mp, N), out_dtype),
        grid_spec=pltpu.PrefetchScalarGridSpec(
            num_scalar_prefetch=0,
            grid=(grid_m,),
            in_specs=[
                pl.BlockSpec((tm, K), lambda i: (i, 0)),
                pl.BlockSpec((K, N), lambda i: (0, 0)),
                pl.BlockSpec((1, N), lambda i: (0, 0)),
            ],
            out_specs=pl.BlockSpec((tm, N), lambda i: (i, 0)),
        ),
        compiler_params=pltpu.CompilerParams(
            dimension_semantics=("parallel",)),
    )(x, w_t, b)
    return out[:M] if Mp != M else out


def conv2d_relu(x, w_t, b, kh, kw, stride, *, lhs_spec="NHWC"):
    """VALID conv + ReLU via patches + Pallas matmul. Returns NHWC bf16."""
    B = x.shape[0]
    patches = jax.lax.conv_general_dilated_patches(
        x, (kh, kw), (stride, stride), "VALID",
        dimension_numbers=(lhs_spec, "HWIO", "NHWC"))
    _, OH, OW, F = patches.shape                    # feature order = (c, i, j)
    xm = patches.reshape(B * OH * OW, F).astype(jnp.bfloat16)
    out = pallas_linear(xm, w_t, b, relu=True, out_dtype=jnp.bfloat16)
    return out.reshape(B, OH, OW, -1)               # NHWC


# ---------------------------------------------------------------------------
# Pallas kernel 2: fused FC tail (fc1 -> conv4 -> fc2 -> fc3), one launch
# ---------------------------------------------------------------------------
def _fc_tail_kernel(x_ref, p4_ref, w1_ref, b1_ref, w4_ref, b4_ref,
                    w2a_ref, w2b_ref, b2_ref, w3_ref, b3_ref, o_ref):
    # fc1
    h1 = jnp.dot(x_ref[...], w1_ref[...], preferred_element_type=jnp.float32)
    h1 = jnp.maximum(h1 + b1_ref[...], 0.0)                       # (B, 512)
    # conv4 as one block-diagonal matmul -> features already in (t, o) order
    a = jnp.dot(p4_ref[...], w4_ref[...], preferred_element_type=jnp.float32)
    a = jnp.maximum(a + b4_ref[...], 0.0)                         # (B, 16*T)
    # fc2 without the concat: x-part + a-part
    h2 = jnp.dot(h1.astype(jnp.bfloat16), w2a_ref[...],
                 preferred_element_type=jnp.float32)
    h2 = h2 + jnp.dot(a.astype(jnp.bfloat16), w2b_ref[...],
                      preferred_element_type=jnp.float32)
    h2 = jnp.maximum(h2 + b2_ref[...], 0.0)                       # (B, 300)
    # fc3 (N=1): VPU multiply + lane reduction (no 1-lane MXU matmul / launch)
    o_ref[...] = (jnp.sum(h2 * w3_ref[...], axis=-1, keepdims=True)
                  + b3_ref[...]).astype(o_ref.dtype)


def fc_tail(kp, x_feat, p4):
    B = x_feat.shape[0]
    vmem = pl.BlockSpec(memory_space=pltpu.MemorySpace.VMEM)
    return pl.pallas_call(
        _fc_tail_kernel,
        out_shape=jax.ShapeDtypeStruct((B, 1), jnp.float32),
        in_specs=[vmem] * 11,
        out_specs=vmem,
    )(x_feat, p4, kp["fc1_w"], kp["fc1_b"], kp["c4_wbd"], kp["c4_bt"],
      kp["fc2_wa"], kp["fc2_wb"], kp["fc2_b"], kp["fc3_w"], kp["fc3_b"])


# ---------------------------------------------------------------------------
# Critic forward
# ---------------------------------------------------------------------------
def critic_forward(kp, state, acts):
    B = state.shape[0]
    # conv stack, NHWC bf16 activations
    x = conv2d_relu(state, kp["c1_w"], kp["c1_b"], 8, 8, 4, lhs_spec="NCHW")
    x = conv2d_relu(x, kp["c2_w"], kp["c2_b"], 4, 4, 2)
    x = conv2d_relu(x, kp["c3_w"], kp["c3_b"], 3, 3, 1)
    x_feat = x.reshape(B, -1)                 # (B, 7*7*64), (h, w, c) order
    # conv4 patches: feature index = t*(n_agent*2) + c*2 + j
    n_agent, L = acts.shape[1], acts.shape[2]
    T = L - 1                                 # Conv1d kernel_size = 2
    p4 = jnp.stack([acts[:, :, t:t + 2] for t in range(T)], axis=1)
    p4 = p4.reshape(B, T * n_agent * 2).astype(jnp.bfloat16)
    return fc_tail(kp, x_feat, p4)


# ---------------------------------------------------------------------------
# Parameter init (PyTorch layout) and one-time kernel-layout preparation
# ---------------------------------------------------------------------------
def init_params(key, n_agent=4, in_channels=3, dim_action=9):
    def uinit(k, shape, fan_in):
        bound = float(fan_in) ** -0.5
        return jax.random.uniform(k, shape, jnp.float32, -bound, bound)

    ks = jax.random.split(key, 14)
    p = {}
    p["conv1_w"] = uinit(ks[0], (32, in_channels, 8, 8), in_channels * 64)
    p["conv1_b"] = uinit(ks[1], (32,), in_channels * 64)
    p["conv2_w"] = uinit(ks[2], (64, 32, 4, 4), 32 * 16)
    p["conv2_b"] = uinit(ks[3], (64,), 32 * 16)
    p["conv3_w"] = uinit(ks[4], (64, 64, 3, 3), 64 * 9)
    p["conv3_b"] = uinit(ks[5], (64,), 64 * 9)
    p["fc1_w"] = uinit(ks[6], (512, 7 * 7 * 64), 7 * 7 * 64)
    p["fc1_b"] = uinit(ks[7], (512,), 7 * 7 * 64)
    p["conv4_w"] = uinit(ks[8], (16, n_agent, 2), n_agent * 2)
    p["conv4_b"] = uinit(ks[9], (16,), n_agent * 2)
    fc2_in = 512 + 16 * (dim_action - 1)
    p["fc2_w"] = uinit(ks[10], (300, fc2_in), fc2_in)
    p["fc2_b"] = uinit(ks[11], (300,), fc2_in)
    p["fc3_w"] = uinit(ks[12], (1, 300), 300)
    p["fc3_b"] = uinit(ks[13], (1,), 300)
    return p


def prepare_params(p):
    """Permute / cast PyTorch-layout params into kernel-friendly layout (once)."""
    kp = {}
    # conv weights: (O, C, kh, kw) -> (C*kh*kw, O), matches patches order (c,i,j)
    for dst, src in (("c1", "conv1"), ("c2", "conv2"), ("c3", "conv3")):
        w = p[src + "_w"]
        o = w.shape[0]
        kp[dst + "_w"] = w.reshape(o, -1).T.astype(jnp.bfloat16)
        kp[dst + "_b"] = p[src + "_b"].reshape(1, o).astype(jnp.float32)
    # fc1: columns are (c, h, w) in torch; permute to (h, w, c) for NHWC flatten
    w1 = p["fc1_w"].reshape(512, 64, 7, 7).transpose(2, 3, 1, 0)
    kp["fc1_w"] = w1.reshape(7 * 7 * 64, 512).astype(jnp.bfloat16)
    kp["fc1_b"] = p["fc1_b"].reshape(1, -1).astype(jnp.float32)
    # conv4 -> block-diagonal matmul weight; fc2 split into x-part / a-part
    wc4 = p["conv4_w"]                                   # (16, n_agent, 2)
    n_agent = wc4.shape[1]
    fc2_w = p["fc2_w"]                                   # (300, 512 + 16*T)
    T = (fc2_w.shape[1] - 512) // 16
    blk = wc4.reshape(16, n_agent * 2).T                 # (n_agent*2, 16)
    kp["c4_wbd"] = jax.scipy.linalg.block_diag(*([blk] * T)).astype(jnp.bfloat16)
    kp["c4_bt"] = jnp.tile(p["conv4_b"], T).reshape(1, 16 * T).astype(jnp.float32)
    kp["fc2_wa"] = fc2_w[:, :512].T.astype(jnp.bfloat16)          # (512, 300)
    kp["fc2_wb"] = (fc2_w[:, 512:].reshape(300, 16, T)
                    .transpose(2, 1, 0).reshape(16 * T, 300)      # rows = (t, o)
                    .astype(jnp.bfloat16))
    kp["fc2_b"] = p["fc2_b"].reshape(1, -1).astype(jnp.float32)
    kp["fc3_w"] = p["fc3_w"].reshape(1, -1).astype(jnp.float32)
    kp["fc3_b"] = p["fc3_b"].reshape(1, 1).astype(jnp.float32)
    return kp


# ---------------------------------------------------------------------------
# Pure-JAX reference (for correctness check)
# ---------------------------------------------------------------------------
def reference_forward(params, state, acts):
    hp = jax.lax.Precision.HIGHEST

    def conv2d(x, w, b, s):
        y = jax.lax.conv_general_dilated(
            x, w, (s, s), "VALID",
            dimension_numbers=("NCHW", "OIHW", "NCHW"), precision=hp)
        return jax.nn.relu(y + b[None, :, None, None])

    x = conv2d(state, params["conv1_w"], params["conv1_b"], 4)
    x = conv2d(x, params["conv2_w"], params["conv2_b"], 2)
    x = conv2d(x, params["conv3_w"], params["conv3_b"], 1)
    B = x.shape[0]
    x = jax.nn.relu(jnp.matmul(x.reshape(B, -1), params["fc1_w"].T, precision=hp)
                    + params["fc1_b"])
    y = jax.lax.conv_general_dilated(
        acts[:, :, :, None], params["conv4_w"][:, :, :, None], (1, 1), "VALID",
        dimension_numbers=("NCHW", "OIHW", "NCHW"), precision=hp)[..., 0]
    a = jax.nn.relu(y + params["conv4_b"][None, :, None]).reshape(B, -1)
    c = jnp.concatenate([x, a], axis=1)
    h = jax.nn.relu(jnp.matmul(c, params["fc2_w"].T, precision=hp) + params["fc2_b"])
    return jnp.matmul(h, params["fc3_w"].T, precision=hp) + params["fc3_b"]


if __name__ == "__main__":
    B, IN_CH, HW = 2, 3, 84          # 84x84 so the conv stack yields 7x7 (fc1)
    N_AGENT, DIM_ACTION = 4, 9

    key = jax.random.PRNGKey(0)
    k_p, k_s, k_a = jax.random.split(key, 3)
    params = init_params(k_p, n_agent=N_AGENT, in_channels=IN_CH,
                         dim_action=DIM_ACTION)
    state = jax.random.normal(k_s, (B, IN_CH, HW, HW), jnp.float32)
    acts = jax.random.normal(k_a, (B, N_AGENT, DIM_ACTION), jnp.float32)

    kparams = prepare_params(params)           # one-time layout / bf16 prep
    out = jax.jit(critic_forward)(kparams, state, acts)
    out = jax.block_until_ready(out)
    assert out.shape == (B, 1), out.shape

    ref = jax.block_until_ready(reference_forward(params, state, acts))
    # bf16 matmul inputs with f32 accumulation -> tolerance sized for bf16.
    assert jnp.allclose(out, ref, atol=2e-2, rtol=2e-2), (out, ref)

    print("KERNEL_OK")
</pallas_src>

<mosaic_0001>
module attributes {stable_mosaic.version = 11 : i64} {
  func.func @_linear_kernel(%arg0: i32, %arg1: memref<400x192xbf16, #tpu.memory_space<vmem>>, %arg2: memref<192x32xbf16, #tpu.memory_space<vmem>>, %arg3: memref<1x32xf32, #tpu.memory_space<vmem>>, %arg4: memref<400x32xbf16, #tpu.memory_space<vmem>>) attributes {dimension_semantics = [#tpu.dimension_semantics<parallel>], iteration_bounds = array<i64: 2>, scalar_prefetch = 0 : i64, scratch_operands = 0 : i64, tpu.core_type = #tpu.core_type<tc>, window_params = [{transform_indices = @transform_0, window_bounds = array<i64: 400, 192>}, {pipeline_mode = #tpu.pipeline_mode<synchronous>, transform_indices = @transform_1, window_bounds = array<i64: 192, 32>}, {pipeline_mode = #tpu.pipeline_mode<synchronous>, transform_indices = @transform_2, window_bounds = array<i64: 1, 32>}, {transform_indices = @transform_3, window_bounds = array<i64: 400, 32>}]} {
    %c0 = arith.constant 0 : index
    %c0_0 = arith.constant 0 : index
    %0 = vector.load %arg1[%c0, %c0_0] : memref<400x192xbf16, #tpu.memory_space<vmem>>, vector<400x192xbf16>
    %c0_1 = arith.constant 0 : index
    %c0_2 = arith.constant 0 : index
    %1 = vector.load %arg2[%c0_1, %c0_2] : memref<192x32xbf16, #tpu.memory_space<vmem>>, vector<192x32xbf16>
    %cst = arith.constant dense<0.000000e+00> : vector<400x32xf32>
    %2 = tpu.matmul %0, %1, %cst {dimension_numbers = #tpu.dot_dimension_numbers<[1], [0], [0], [1], [0, 0, 1, 1], [], []>} : vector<400x192xbf16>, vector<192x32xbf16>, vector<400x32xf32> -> vector<400x32xf32>
    %c0_3 = arith.constant 0 : index
    %c0_4 = arith.constant 0 : index
    %3 = vector.load %arg3[%c0_3, %c0_4] : memref<1x32xf32, #tpu.memory_space<vmem>>, vector<1x32xf32>
    %4 = vector.broadcast %3 : vector<1x32xf32> to vector<400x32xf32>
    %5 = arith.addf %2, %4 : vector<400x32xf32>
    %cst_5 = arith.constant 0.000000e+00 : f32
    %6 = vector.broadcast %cst_5 : f32 to vector<400x32xf32>
    %7 = arith.maximumf %5, %6 : vector<400x32xf32>
    %8 = arith.truncf %7 : vector<400x32xf32> to vector<400x32xbf16>
    %c0_6 = arith.constant 0 : index
    %c0_7 = arith.constant 0 : index
    %9 = vector.load %arg4[%c0_6, %c0_7] : memref<400x32xbf16, #tpu.memory_space<vmem>>, vector<400x32xbf16>
    tpu.vector_store %arg4[%c0_6, %c0_7], %8 {strides = array<i32>} : memref<400x32xbf16, #tpu.memory_space<vmem>>, vector<400x32xbf16>,
    return
  }
  func.func @transform_0(%arg0: i32) -> (i32, i32) {
    %c0_i32 = arith.constant 0 : i32
    %c0_i32_0 = arith.constant 0 : i32
    return %arg0, %c0_i32 : i32, i32
  }
  func.func @transform_1(%arg0: i32) -> (i32, i32) {
    %c0_i32 = arith.constant 0 : i32
    %c0_i32_0 = arith.constant 0 : i32
    %c0_i32_1 = arith.constant 0 : i32
    return %c0_i32, %c0_i32_0 : i32, i32
  }
  func.func @transform_2(%arg0: i32) -> (i32, i32) {
    %c0_i32 = arith.constant 0 : i32
    %c0_i32_0 = arith.constant 0 : i32
    %c0_i32_1 = arith.constant 0 : i32
    return %c0_i32, %c0_i32_0 : i32, i32
  }
  func.func @transform_3(%arg0: i32) -> (i32, i32) {
    %c0_i32 = arith.constant 0 : i32
    %c0_i32_0 = arith.constant 0 : i32
    return %arg0, %c0_i32 : i32, i32
  }
}

module attributes {stable_mosaic.version = 11 : i64} {
  func.func @_linear_kernel(%arg0: i32, %arg1: memref<88x512xbf16, #tpu.memory_space<vmem>>, %arg2: memref<512x64xbf16, #tpu.memory_space<vmem>>, %arg3: memref<1x64xf32, #tpu.memory_space<vmem>>, %arg4: memref<88x64xbf16, #tpu.memory_space<vmem>>) attributes {dimension_semantics = [#tpu.dimension_semantics<parallel>], iteration_bounds = array<i64: 2>, scalar_prefetch = 0 : i64, scratch_operands = 0 : i64, tpu.core_type = #tpu.core_type<tc>, window_params = [{transform_indices = @transform_0, window_bounds = array<i64: 88, 512>}, {pipeline_mode = #tpu.pipeline_mode<synchronous>, transform_indices = @transform_1, window_bounds = array<i64: 512, 64>}, {pipeline_mode = #tpu.pipeline_mode<synchronous>, transform_indices = @transform_2, window_bounds = array<i64: 1, 64>}, {transform_indices = @transform_3, window_bounds = array<i64: 88, 64>}]} {
    %c0 = arith.constant 0 : index
    %c0_0 = arith.constant 0 : index
    %0 = vector.load %arg1[%c0, %c0_0] : memref<88x512xbf16, #tpu.memory_space<vmem>>, vector<88x512xbf16>
    %c0_1 = arith.constant 0 : index
    %c0_2 = arith.constant 0 : index
    %1 = vector.load %arg2[%c0_1, %c0_2] : memref<512x64xbf16, #tpu.memory_space<vmem>>, vector<512x64xbf16>
    %cst = arith.constant dense<0.000000e+00> : vector<88x64xf32>
    %2 = tpu.matmul %0, %1, %cst {dimension_numbers = #tpu.dot_dimension_numbers<[1], [0], [0], [1], [0, 0, 1, 1], [], []>} : vector<88x512xbf16>, vector<512x64xbf16>, vector<88x64xf32> -> vector<88x64xf32>
    %c0_3 = arith.constant 0 : index
    %c0_4 = arith.constant 0 : index
    %3 = vector.load %arg3[%c0_3, %c0_4] : memref<1x64xf32, #tpu.memory_space<vmem>>, vector<1x64xf32>
    %4 = vector.broadcast %3 : vector<1x64xf32> to vector<88x64xf32>
    %5 = arith.addf %2, %4 : vector<88x64xf32>
    %cst_5 = arith.constant 0.000000e+00 : f32
    %6 = vector.broadcast %cst_5 : f32 to vector<88x64xf32>
    %7 = arith.maximumf %5, %6 : vector<88x64xf32>
    %8 = arith.truncf %7 : vector<88x64xf32> to vector<88x64xbf16>
    %c0_6 = arith.constant 0 : index
    %c0_7 = arith.constant 0 : index
    %9 = vector.load %arg4[%c0_6, %c0_7] : memref<88x64xbf16, #tpu.memory_space<vmem>>, vector<88x64xbf16>
    tpu.vector_store %arg4[%c0_6, %c0_7], %8 {strides = array<i32>} : memref<88x64xbf16, #tpu.memory_space<vmem>>, vector<88x64xbf16>,
    return
  }
  func.func @transform_0(%arg0: i32) -> (i32, i32) {
    %c0_i32 = arith.constant 0 : i32
    %c0_i32_0 = arith.constant 0 : i32
    return %arg0, %c0_i32 : i32, i32
  }
  func.func @transform_1(%arg0: i32) -> (i32, i32) {
    %c0_i32 = arith.constant 0 : i32
    %c0_i32_0 = arith.constant 0 : i32
    %c0_i32_1 = arith.constant 0 : i32
    return %c0_i32, %c0_i32_0 : i32, i32
  }
  func.func @transform_2(%arg0: i32) -> (i32, i32) {
    %c0_i32 = arith.constant 0 : i32
    %c0_i32_0 = arith.constant 0 : i32
    %c0_i32_1 = arith.constant 0 : i32
    return %c0_i32, %c0_i32_0 : i32, i32
  }
  func.func @transform_3(%arg0: i32) -> (i32, i32) {
    %c0_i32 = arith.constant 0 : i32
    %c0_i32_0 = arith.constant 0 : i32
    return %arg0, %c0_i32 : i32, i32
  }
}

module attributes {stable_mosaic.version = 11 : i64} {
  func.func @_linear_kernel(%arg0: i32, %arg1: memref<56x576xbf16, #tpu.memory_space<vmem>>, %arg2: memref<576x64xbf16, #tpu.memory_space<vmem>>, %arg3: memref<1x64xf32, #tpu.memory_space<vmem>>, %arg4: memref<56x64xbf16, #tpu.memory_space<vmem>>) attributes {dimension_semantics = [#tpu.dimension_semantics<parallel>], iteration_bounds = array<i64: 2>, scalar_prefetch = 0 : i64, scratch_operands = 0 : i64, tpu.core_type = #tpu.core_type<tc>, window_params = [{transform_indices = @transform_0, window_bounds = array<i64: 56, 576>}, {pipeline_mode = #tpu.pipeline_mode<synchronous>, transform_indices = @transform_1, window_bounds = array<i64: 576, 64>}, {pipeline_mode = #tpu.pipeline_mode<synchronous>, transform_indices = @transform_2, window_bounds = array<i64: 1, 64>}, {transform_indices = @transform_3, window_bounds = array<i64: 56, 64>}]} {
    %c0 = arith.constant 0 : index
    %c0_0 = arith.constant 0 : index
    %0 = vector.load %arg1[%c0, %c0_0] : memref<56x576xbf16, #tpu.memory_space<vmem>>, vector<56x576xbf16>
    %c0_1 = arith.constant 0 : index
    %c0_2 = arith.constant 0 : index
    %1 = vector.load %arg2[%c0_1, %c0_2] : memref<576x64xbf16, #tpu.memory_space<vmem>>, vector<576x64xbf16>
    %cst = arith.constant dense<0.000000e+00> : vector<56x64xf32>
    %2 = tpu.matmul %0, %1, %cst {dimension_numbers = #tpu.dot_dimension_numbers<[1], [0], [0], [1], [0, 0, 1, 1], [], []>} : vector<56x576xbf16>, vector<576x64xbf16>, vector<56x64xf32> -> vector<56x64xf32>
    %c0_3 = arith.constant 0 : index
    %c0_4 = arith.constant 0 : index
    %3 = vector.load %arg3[%c0_3, %c0_4] : memref<1x64xf32, #tpu.memory_space<vmem>>, vector<1x64xf32>
    %4 = vector.broadcast %3 : vector<1x64xf32> to vector<56x64xf32>
    %5 = arith.addf %2, %4 : vector<56x64xf32>
    %cst_5 = arith.constant 0.000000e+00 : f32
    %6 = vector.broadcast %cst_5 : f32 to vector<56x64xf32>
    %7 = arith.maximumf %5, %6 : vector<56x64xf32>
    %8 = arith.truncf %7 : vector<56x64xf32> to vector<56x64xbf16>
    %c0_6 = arith.constant 0 : index
    %c0_7 = arith.constant 0 : index
    %9 = vector.load %arg4[%c0_6, %c0_7] : memref<56x64xbf16, #tpu.memory_space<vmem>>, vector<56x64xbf16>
    tpu.vector_store %arg4[%c0_6, %c0_7], %8 {strides = array<i32>} : memref<56x64xbf16, #tpu.memory_space<vmem>>, vector<56x64xbf16>,
    return
  }
  func.func @transform_0(%arg0: i32) -> (i32, i32) {
    %c0_i32 = arith.constant 0 : i32
    %c0_i32_0 = arith.constant 0 : i32
    return %arg0, %c0_i32 : i32, i32
  }
  func.func @transform_1(%arg0: i32) -> (i32, i32) {
    %c0_i32 = arith.constant 0 : i32
    %c0_i32_0 = arith.constant 0 : i32
    %c0_i32_1 = arith.constant 0 : i32
    return %c0_i32, %c0_i32_0 : i32, i32
  }
  func.func @transform_2(%arg0: i32) -> (i32, i32) {
    %c0_i32 = arith.constant 0 : i32
    %c0_i32_0 = arith.constant 0 : i32
    %c0_i32_1 = arith.constant 0 : i32
    return %c0_i32, %c0_i32_0 : i32, i32
  }
  func.func @transform_3(%arg0: i32) -> (i32, i32) {
    %c0_i32 = arith.constant 0 : i32
    %c0_i32_0 = arith.constant 0 : i32
    return %arg0, %c0_i32 : i32, i32
  }
}

module attributes {stable_mosaic.version = 11 : i64} {
  func.func @_fc_tail_kernel(%arg0: memref<2x3136xbf16, #tpu.memory_space<vmem>>, %arg1: memref<2x64xbf16, #tpu.memory_space<vmem>>, %arg2: memref<3136x512xbf16, #tpu.memory_space<vmem>>, %arg3: memref<1x512xf32, #tpu.memory_space<vmem>>, %arg4: memref<64x128xbf16, #tpu.memory_space<vmem>>, %arg5: memref<1x128xf32, #tpu.memory_space<vmem>>, %arg6: memref<512x300xbf16, #tpu.memory_space<vmem>>, %arg7: memref<128x300xbf16, #tpu.memory_space<vmem>>, %arg8: memref<1x300xf32, #tpu.memory_space<vmem>>, %arg9: memref<1x300xf32, #tpu.memory_space<vmem>>, %arg10: memref<1x1xf32, #tpu.memory_space<vmem>>, %arg11: memref<2x1xf32, #tpu.memory_space<vmem>>) attributes {dimension_semantics = [], scalar_prefetch = 0 : i64, scratch_operands = 0 : i64, tpu.core_type = #tpu.core_type<tc>} {
    %c0 = arith.constant 0 : index
    %c0_0 = arith.constant 0 : index
    %0 = vector.load %arg0[%c0, %c0_0] : memref<2x3136xbf16, #tpu.memory_space<vmem>>, vector<2x3136xbf16>
    %c0_1 = arith.constant 0 : index
    %c0_2 = arith.constant 0 : index
    %1 = vector.load %arg2[%c0_1, %c0_2] : memref<3136x512xbf16, #tpu.memory_space<vmem>>, vector<3136x512xbf16>
    %cst = arith.constant dense<0.000000e+00> : vector<2x512xf32>
    %2 = tpu.matmul %0, %1, %cst {dimension_numbers = #tpu.dot_dimension_numbers<[1], [0], [0], [1], [0, 0, 1, 1], [], []>} : vector<2x3136xbf16>, vector<3136x512xbf16>, vector<2x512xf32> -> vector<2x512xf32>
    %c0_3 = arith.constant 0 : index
    %c0_4 = arith.constant 0 : index
    %3 = vector.load %arg3[%c0_3, %c0_4] : memref<1x512xf32, #tpu.memory_space<vmem>>, vector<1x512xf32>
    %4 = vector.broadcast %3 : vector<1x512xf32> to vector<2x512xf32>
    %5 = arith.addf %2, %4 : vector<2x512xf32>
    %cst_5 = arith.constant 0.000000e+00 : f32
    %6 = vector.broadcast %cst_5 : f32 to vector<2x512xf32>
    %7 = arith.maximumf %5, %6 : vector<2x512xf32>
    %c0_6 = arith.constant 0 : index
    %c0_7 = arith.constant 0 : index
    %8 = vector.load %arg1[%c0_6, %c0_7] : memref<2x64xbf16, #tpu.memory_space<vmem>>, vector<2x64xbf16>
    %c0_8 = arith.constant 0 : index
    %c0_9 = arith.constant 0 : index
    %9 = vector.load %arg4[%c0_8, %c0_9] : memref<64x128xbf16, #tpu.memory_space<vmem>>, vector<64x128xbf16>
    %cst_10 = arith.constant dense<0.000000e+00> : vector<2x128xf32>
    %10 = tpu.matmul %8, %9, %cst_10 {dimension_numbers = #tpu.dot_dimension_numbers<[1], [0], [0], [1], [0, 0, 1, 1], [], []>} : vector<2x64xbf16>, vector<64x128xbf16>, vector<2x128xf32> -> vector<2x128xf32>
    %c0_11 = arith.constant 0 : index
    %c0_12 = arith.constant 0 : index
    %11 = vector.load %arg5[%c0_11, %c0_12] : memref<1x128xf32, #tpu.memory_space<vmem>>, vector<1x128xf32>
    %12 = vector.broadcast %11 : vector<1x128xf32> to vector<2x128xf32>
    %13 = arith.addf %10, %12 : vector<2x128xf32>
    %cst_13 = arith.constant 0.000000e+00 : f32
    %14 = vector.broadcast %cst_13 : f32 to vector<2x128xf32>
    %15 = arith.maximumf %13, %14 : vector<2x128xf32>
    %16 = arith.truncf %7 : vector<2x512xf32> to vector<2x512xbf16>
    %c0_14 = arith.constant 0 : index
    %c0_15 = arith.constant 0 : index
    %17 = vector.load %arg6[%c0_14, %c0_15] : memref<512x300xbf16, #tpu.memory_space<vmem>>, vector<512x300xbf16>
    %cst_16 = arith.constant dense<0.000000e+00> : vector<2x300xf32>
    %18 = tpu.matmul %16, %17, %cst_16 {dimension_numbers = #tpu.dot_dimension_numbers<[1], [0], [0], [1], [0, 0, 1, 1], [], []>} : vector<2x512xbf16>, vector<512x300xbf16>, vector<2x300xf32> -> vector<2x300xf32>
    %19 = arith.truncf %15 : vector<2x128xf32> to vector<2x128xbf16>
    %c0_17 = arith.constant 0 : index
    %c0_18 = arith.constant 0 : index
    %20 = vector.load %arg7[%c0_17, %c0_18] : memref<128x300xbf16, #tpu.memory_space<vmem>>, vector<128x300xbf16>
    %cst_19 = arith.constant dense<0.000000e+00> : vector<2x300xf32>
    %21 = tpu.matmul %19, %20, %cst_19 {dimension_numbers = #tpu.dot_dimension_numbers<[1], [0], [0], [1], [0, 0, 1, 1], [], []>} : vector<2x128xbf16>, vector<128x300xbf16>, vector<2x300xf32> -> vector<2x300xf32>
    %22 = arith.addf %18, %21 : vector<2x300xf32>
    %c0_20 = arith.constant 0 : index
    %c0_21 = arith.constant 0 : index
    %23 = vector.load %arg8[%c0_20, %c0_21] : memref<1x300xf32, #tpu.memory_space<vmem>>, vector<1x300xf32>
    %24 = vector.broadcast %23 : vector<1x300xf32> to vector<2x300xf32>
    %25 = arith.addf %22, %24 : vector<2x300xf32>
    %cst_22 = arith.constant 0.000000e+00 : f32
    %26 = vector.broadcast %cst_22 : f32 to vector<2x300xf32>
    %27 = arith.maximumf %25, %26 : vector<2x300xf32>
    %c0_23 = arith.constant 0 : index
    %c0_24 = arith.constant 0 : index
    %28 = vector.load %arg9[%c0_23, %c0_24] : memref<1x300xf32, #tpu.memory_space<vmem>>, vector<1x300xf32>
    %29 = vector.broadcast %28 : vector<1x300xf32> to vector<2x300xf32>
    %30 = arith.mulf %27, %29 : vector<2x300xf32>
    %cst_25 = arith.constant dense<0.000000e+00> : vector<2xf32>
    %31 = vector.multi_reduction <add>, %30, %cst_25 [1] : vector<2x300xf32> to vector<2xf32>
    %32 = vector.shape_cast %31 : vector<2xf32> to vector<2x1xf32>
    %c0_26 = arith.constant 0 : index
    %c0_27 = arith.constant 0 : index
    %33 = vector.load %arg10[%c0_26, %c0_27] : memref<1x1xf32, #tpu.memory_space<vmem>>, vector<1x1xf32>
    %34 = vector.broadcast %33 : vector<1x1xf32> to vector<2x1xf32>
    %35 = arith.addf %32, %34 : vector<2x1xf32>
    %c0_28 = arith.constant 0 : index
    %c0_29 = arith.constant 0 : index
    %36 = vector.load %arg11[%c0_28, %c0_29] : memref<2x1xf32, #tpu.memory_space<vmem>>, vector<2x1xf32>
    tpu.vector_store %arg11[%c0_28, %c0_29], %35 {strides = array<i32>} : memref<2x1xf32, #tpu.memory_space<vmem>>, vector<2x1xf32>,
    return
  }
}

</mosaic_0001>

<bundles_post_ra>
// kernel: critic_forward.4
= control target key start
LH: loop header
LB: loop body
LE: loop exit
PB: predicated region body
PF: predicated region fallthrough
CT: control target
= control target key end

     0   :  { %s1570_s12 = smov 0   ;;  %s1885_s0 = inlined_call_operand.vmem [shape: bf16[800,192], index: 0, kind: input, shape index: {}]   ;;  %s1886_s1 = inlined_call_operand.vmem [shape: bf16[192,32], index: 1, kind: input, shape index: {}]   ;;  %s1887_s2 = inlined_call_operand.vmem [shape: f32[1,32], index: 2, kind: input, shape index: {}]   ;;  %s1888_s3 = inlined_call_operand.vmem [shape: bf16[800,32], index: 3, kind: output, shape index: {}]  }
   0x1 LB: > { %s1222_s13 = sadd.s32 4294967295, %s1547_s12   ;;  %p1226_p0 = scmp.ge.s32.totalorder %s1547_s12, 1  ;;  %s1547_s12 = sphi %s1570_s12, %s13_s12  }
   0x2   : > { %p139_p1 = scmp.lt.s32.totalorder %s1547_s12, 3 }
   0x4   : > { %p140_p2 = pnand %p1226_p0, %p139_p1 }
   0x5   : > { %s164_s16 = smul.u32 (!%p140_p2), 50, %s1222_s13 }
   0x6   : > { %143 = sbr.rel (%p140_p2) target bundleno = 360 (0x168), region = 32 }
   0x7   : > { %p165_p3 = scmp.lt.s32.totalorder (!%p140_p2), %s164_s16, 99 }
   0xb   : > { %v1454_v0 = vld [vmem:[%s1886_s1 + $0x38] sm:$0xff]   ;;  %v1549_v1 = vmov 0   ;;  %v1455_v2 = vld [vmem:[%s1886_s1 + $0x30] sm:$0xff]   ;;  %s1890_s16 = smov (!%p165_p3, %s164_s16), 99  ;;  %v1456_v3 = vld [vmem:[%s1886_s1 + $0x28] sm:$0xff]   ;;  %vm556_vm0 = vcmask 523264  }
   0xc   : > { %632 = vmatprep.subr.bf16.mxu0 %v1549_v1  ;;  %1421 = vmatprep.subr.bf16.mxu1 %v1549_v1  ;;  %s1370_s21 = sshll.u32 %s1890_s16, 3  ;;  %v1457_v4 = vld [vmem:[%s1886_s1 + $0x20] sm:$0xff]   ;;  %v1458_v6 = vld [vmem:[%s1886_s1 + $0x18] sm:$0xff]   ;;  %v1459_v8 = vld [vmem:[%s1886_s1 + $0x10] sm:$0xff]   ;;  %s1229_s20 = sshll.u32 %s1890_s16, 2  ;;  %vm1115_vm1 = vcmask 257024  }
   0xd   : > { %633 = vmatpush1.bf16.msra.mxu0 %v1454_v0  ;;  %1433 = vmatpush1.bf16.msra.mxu1 %v1454_v0  ;;  %s1602_s26 = scalar_lea.vmem %s1885_s0, %s1370_s21  ;;  %v1460_v9 = vld [vmem:[%s1886_s1 + $0x8] sm:$0xff]   ;;  %v1461_v10 = vld [vmem:[%s1886_s1] sm:$0xff]   ;;  %v1462_v11 = vld [vmem:[%s1886_s1 + $0x58] sm:$0xff]   ;;  %s1732_s23 = scalar_lea.vmem %s1888_s3, %s1229_s20 }
   0xe   : > { %634 = vmatprep.subr.bf16.mxu0 %v1549_v1  ;;  %1422 = vmatprep.subr.bf16.mxu1 %v1549_v1  ;;  %v1468_v5 = vld [vmem:[%s1602_s26 + $0x4] ss:$8 sps:$4 sm:$0xff]   ;;  %v1471_v7 = vld [vmem:[%s1602_s26 + $0xd4] ss:$8 sps:$4 sm:$0xff]   ;;  %v1466_v15 = vld [vmem:[%s1602_s26] ss:$8 sps:$4 sm:$0xff]  }
   0xf   : > { %1293 = vmatprep.mubr.msk.bf16.mxu0 %vm556_vm0, %v1468_v5  ;;  %1306 = vmatprep.mubr.msk.bf16.mxu1 %vm556_vm0, %v1471_v7  ;;  %v1463_v12 = vld [vmem:[%s1886_s1 + $0x50] sm:$0xff]   ;;  %v1464_v13 = vld [vmem:[%s1886_s1 + $0x48] sm:$0xff]   ;;  %v1465_v14 = vld [vmem:[%s1886_s1 + $0x40] sm:$0xff]  }
  0x10   : > { %v1469_v16 = vld [vmem:[%s1602_s26 + $0xd0] ss:$8 sps:$4 sm:$0xff]   ;;  %v1472_v17 = vld [vmem:[%s1602_s26 + $0x14] ss:$8 sps:$4 sm:$0xff]   ;;  %v1475_v18 = vld [vmem:[%s1602_s26 + $0xe4] ss:$8 sps:$4 sm:$0xff]  }
  0x11   : > { %635 = vmatpush1.bf16.msra.mxu0 %v1455_v2  ;;  %1434 = vmatpush1.bf16.msra.mxu1 %v1455_v2  ;;  %v1474_v19 = vld [vmem:[%s1602_s26 + $0x10] ss:$8 sps:$4 sm:$0xff]   ;;  %v1477_v20 = vld [vmem:[%s1602_s26 + $0xe0] ss:$8 sps:$4 sm:$0xff]   ;;  %v1478_v21 = vld [vmem:[%s1602_s26 + $0x24] ss:$8 sps:$4 sm:$0xff]  }
  0x12   : > { %636 = vmatprep.subr.bf16.mxu0 %v1549_v1  ;;  %1423 = vmatprep.subr.bf16.mxu1 %v1549_v1  ;;  %v1481_v22 = vld [vmem:[%s1602_s26 + $0xf4] ss:$8 sps:$4 sm:$0xff]   ;;  %v1480_v23 = vld [vmem:[%s1602_s26 + $0x20] ss:$8 sps:$4 sm:$0xff]   ;;  %v1483_v24 = vld [vmem:[%s1602_s26 + $0xf0] ss:$8 sps:$4 sm:$0xff]  }
  0x13   : > { %v1484_v25 = vld [vmem:[%s1602_s26 + $0x34] ss:$8 sps:$4 sm:$0xff]   ;;  %v1487_v26 = vld [vmem:[%s1602_s26 + $0x104] ss:$8 sps:$4 sm:$0xff]   ;;  %v1486_v27 = vld [vmem:[%s1602_s26 + $0x30] ss:$8 sps:$4 sm:$0xff]  }
  0x14   : > { %v1489_v28 = vld [vmem:[%s1602_s26 + $0x100] ss:$8 sps:$4 sm:$0xff]   ;;  %v1490_v29 = vld [vmem:[%s1602_s26 + $0x44] ss:$8 sps:$4 sm:$0xff]   ;;  %v1493_v30 = vld [vmem:[%s1602_s26 + $0x114] ss:$8 sps:$4 sm:$0xff]  }
  0x15   : > { %637 = vmatpush1.bf16.msra.mxu0 %v1456_v3  ;;  %1435 = vmatpush1.bf16.msra.mxu1 %v1456_v3  ;;  %v1492_v31 = vld [vmem:[%s1602_s26 + $0x40] ss:$8 sps:$4 sm:$0xff]   ;;  %v1495_v32 = vld [vmem:[%s1602_s26 + $0x110] ss:$8 sps:$4 sm:$0xff]   ;;  %v1496_v33 = vld [vmem:[%s1602_s26 + $0x54] ss:$8 sps:$4 sm:$0xff]  }
  0x16   : > { %638 = vmatprep.subr.bf16.mxu0 %v1549_v1  ;;  %1424 = vmatprep.subr.bf16.mxu1 %v1549_v1  ;;  %v1499_v34 = vld [vmem:[%s1602_s26 + $0x124] ss:$8 sps:$4 sm:$0xff]   ;;  %v1498_v35 = vld [vmem:[%s1602_s26 + $0x50] ss:$8 sps:$4 sm:$0xff]   ;;  %v1501_v36 = vld [vmem:[%s1602_s26 + $0x120] ss:$8 sps:$4 sm:$0xff]  }
  0x17   : > { %v1502_v37 = vld [vmem:[%s1602_s26 + $0x64] ss:$8 sps:$4 sm:$0xff]   ;;  %v1505_v38 = vld [vmem:[%s1602_s26 + $0x134] ss:$8 sps:$4 sm:$0xff]   ;;  %v1504_v39 = vld [vmem:[%s1602_s26 + $0x60] ss:$8 sps:$4 sm:$0xff]  }
  0x18   : > { %v1507_v40 = vld [vmem:[%s1602_s26 + $0x130] ss:$8 sps:$4 sm:$0xff]   ;;  %v1508_v41 = vld [vmem:[%s1602_s26 + $0x74] ss:$8 sps:$4 sm:$0xff]   ;;  %v1511_v42 = vld [vmem:[%s1602_s26 + $0x144] ss:$8 sps:$4 sm:$0xff]  }
  0x19   : > { %639 = vmatpush1.bf16.msra.mxu0 %v1457_v4  ;;  %1436 = vmatpush1.bf16.msra.mxu1 %v1457_v4  ;;  %v1510_v43 = vld [vmem:[%s1602_s26 + $0x70] ss:$8 sps:$4 sm:$0xff]   ;;  %v1513_v44 = vld [vmem:[%s1602_s26 + $0x140] ss:$8 sps:$4 sm:$0xff]   ;;  %v1514_v45 = vld [vmem:[%s1602_s26 + $0x84] ss:$8 sps:$4 sm:$0xff]  }
  0x1a   : > { %640 = vmatprep.subr.bf16.mxu0 %v1549_v1  ;;  %1425 = vmatprep.subr.bf16.mxu1 %v1549_v1  ;;  %v1517_v46 = vld [vmem:[%s1602_s26 + $0x154] ss:$8 sps:$4 sm:$0xff]   ;;  %v1516_v47 = vld [vmem:[%s1602_s26 + $0x80] ss:$8 sps:$4 sm:$0xff]   ;;  %v1519_v48 = vld [vmem:[%s1602_s26 + $0x150] ss:$8 sps:$4 sm:$0xff]  }
  0x1b   : > { %v1520_v49 = vld [vmem:[%s1602_s26 + $0x94] ss:$8 sps:$4 sm:$0xff]   ;;  %v1523_v50 = vld [vmem:[%s1602_s26 + $0x164] ss:$8 sps:$4 sm:$0xff]   ;;  %v1522_v51 = vld [vmem:[%s1602_s26 + $0x90] ss:$8 sps:$4 sm:$0xff]  }
  0x1c   : > { %v1525_v52 = vld [vmem:[%s1602_s26 + $0x160] ss:$8 sps:$4 sm:$0xff]   ;;  %v1526_v53 = vld [vmem:[%s1602_s26 + $0xa4] ss:$8 sps:$4 sm:$0xff]   ;;  %v1529_v54 = vld [vmem:[%s1602_s26 + $0x174] ss:$8 sps:$4 sm:$0xff]  }
  0x1d   : > { %641 = vmatpush1.bf16.msra.mxu0 %v1458_v6  ;;  %1437 = vmatpush1.bf16.msra.mxu1 %v1458_v6  ;;  %v1528_v55 = vld [vmem:[%s1602_s26 + $0xa0] ss:$8 sps:$4 sm:$0xff]   ;;  %v1531_v56 = vld [vmem:[%s1602_s26 + $0x170] ss:$8 sps:$4 sm:$0xff]   ;;  %v1532_v57 = vld [vmem:[%s1602_s26 + $0xb4] ss:$8 sps:$4 sm:$0xff]  }
  0x1e   : > { %642 = vmatprep.subr.bf16.mxu0 %v1549_v1  ;;  %1426 = vmatprep.subr.bf16.mxu1 %v1549_v1  ;;  %v1535_v58 = vld [vmem:[%s1602_s26 + $0x184] ss:$8 sps:$4 sm:$0xff]   ;;  %v1534_v59 = vld [vmem:[%s1602_s26 + $0xb0] ss:$8 sps:$4 sm:$0xff]   ;;  %v1537_v60 = vld [vmem:[%s1602_s26 + $0x180] ss:$8 sps:$4 sm:$0xff]  }
  0x1f   : > { %v1538_v61 = vld [vmem:[%s1602_s26 + $0xc4] ss:$8 sps:$4 sm:$0xff]   ;;  %v1540_v62 = vld [vmem:[%s1602_s26 + $0xc0] ss:$8 sps:$4 sm:$0xff]  }
  0x20   : > { %v1724_v63 = vld [vmem:[%s1887_s2] ss:$0 sm:$0xff] }
  0x21   : > { %643 = vmatpush1.bf16.msra.mxu0 %v1459_v8  ;;  %1438 = vmatpush1.bf16.msra.mxu1 %v1459_v8 }
  0x22   : > { %644 = vmatprep.subr.bf16.mxu0 %v1549_v1  ;;  %1427 = vmatprep.subr.bf16.mxu1 %v1549_v1 }
  0x25   : > { %645 = vmatpush1.bf16.msra.mxu0 %v1460_v9  ;;  %1439 = vmatpush1.bf16.msra.mxu1 %v1460_v9 }
  0x26   : > { %646 = vmatprep.subr.bf16.mxu0 %v1549_v1  ;;  %1428 = vmatprep.subr.bf16.mxu1 %v1549_v1 }
  0x29   : > { %647 = vmatpush1.bf16.msra.mxu0 %v1461_v10  ;;  %1440 = vmatpush1.bf16.msra.mxu1 %v1461_v10 }
  0x2a   : > { %656 = vmatprep.subr.bf16.mxu0 %v1549_v1  ;;  %1429 = vmatprep.subr.bf16.mxu1 %v1549_v1 }
  0x2d   : > { %657 = vmatpush2.bf16.msra.mxu0 %v1462_v11  ;;  %1441 = vmatpush2.bf16.msra.mxu1 %v1462_v11 }
  0x2e   : > { %658 = vmatprep.subr.bf16.mxu0 %v1549_v1  ;;  %1430 = vmatprep.subr.bf16.mxu1 %v1549_v1 }
  0x31   : > { %659 = vmatpush2.bf16.msra.mxu0 %v1463_v12  ;;  %1442 = vmatpush2.bf16.msra.mxu1 %v1463_v12 }
  0x32   : > { %660 = vmatprep.subr.bf16.mxu0 %v1549_v1  ;;  %1431 = vmatprep.subr.bf16.mxu1 %v1549_v1 }
  0x35   : > { %661 = vmatpush2.bf16.msra.mxu0 %v1464_v13  ;;  %1443 = vmatpush2.bf16.msra.mxu1 %v1464_v13 }
  0x36   : > { %662 = vmatprep.subr.bf16.mxu0 %v1549_v1  ;;  %1432 = vmatprep.subr.bf16.mxu1 %v1549_v1 }
  0x39   : > { %663 = vmatpush2.bf16.msra.mxu0 %v1465_v14  ;;  %1444 = vmatpush2.bf16.msra.mxu1 %v1465_v14 }
  0x3c   : > { %665 = vmatmul.mubr.bf16.vlgmr.msra.gmra.mxu0 %v1466_v15  ;;  %769 = vmatmul.mubr.bf16.vlgmr.msra.gmra.mxu1 %v1469_v16 }
  0x3d   : > { %1294 = vmatprep.mubr.msk.bf16.mxu0 %vm556_vm0, %v1472_v17  ;;  %1307 = vmatprep.mubr.msk.bf16.mxu1 %vm556_vm0, %v1475_v18 }
  0x44   : > { %673 = vmatmul.mubr.bf16.gmra.mxu0 %v1474_v19  ;;  %777 = vmatmul.mubr.bf16.gmra.mxu1 %v1477_v20 }
  0x45   : > { %1295 = vmatprep.mubr.msk.bf16.mxu0 %vm556_vm0, %v1478_v21  ;;  %1308 = vmatprep.mubr.msk.bf16.mxu1 %vm556_vm0, %v1481_v22 }
  0x4c   : > { %681 = vmatmul.mubr.bf16.gmra.mxu0 %v1480_v23  ;;  %785 = vmatmul.mubr.bf16.gmra.mxu1 %v1483_v24 }
  0x4d   : > { %1296 = vmatprep.mubr.msk.bf16.mxu0 %vm556_vm0, %v1484_v25  ;;  %1309 = vmatprep.mubr.msk.bf16.mxu1 %vm556_vm0, %v1487_v26 }
  0x54   : > { %689 = vmatmul.mubr.bf16.gmra.mxu0 %v1486_v27  ;;  %793 = vmatmul.mubr.bf16.gmra.mxu1 %v1489_v28 }
  0x55   : > { %1297 = vmatprep.mubr.msk.bf16.mxu0 %vm556_vm0, %v1490_v29  ;;  %1310 = vmatprep.mubr.msk.bf16.mxu1 %vm556_vm0, %v1493_v30 }
  0x5c   : > { %697 = vmatmul.mubr.bf16.gmra.mxu0 %v1492_v31  ;;  %801 = vmatmul.mubr.bf16.gmra.mxu1 %v1495_v32 }
  0x5d   : > { %1298 = vmatprep.mubr.msk.bf16.mxu0 %vm556_vm0, %v1496_v33  ;;  %1311 = vmatprep.mubr.msk.bf16.mxu1 %vm556_vm0, %v1499_v34 }
  0x64   : > { %705 = vmatmul.mubr.bf16.gmra.mxu0 %v1498_v35  ;;  %809 = vmatmul.mubr.bf16.gmra.mxu1 %v1501_v36 }
  0x65   : > { %1299 = vmatprep.mubr.msk.bf16.mxu0 %vm556_vm0, %v1502_v37  ;;  %1312 = vmatprep.mubr.msk.bf16.mxu1 %vm556_vm0, %v1505_v38 }
  0x6c   : > { %713 = vmatmul.mubr.bf16.gmra.mxu0 %v1504_v39  ;;  %817 = vmatmul.mubr.bf16.gmra.mxu1 %v1507_v40 }
  0x6d   : > { %1300 = vmatprep.mubr.msk.bf16.mxu0 %vm556_vm0, %v1508_v41  ;;  %1313 = vmatprep.mubr.msk.bf16.mxu1 %vm556_vm0, %v1511_v42 }
  0x74   : > { %721 = vmatmul.mubr.bf16.gmra.mxu0 %v1510_v43  ;;  %825 = vmatmul.mubr.bf16.gmra.mxu1 %v1513_v44 }
  0x75   : > { %1301 = vmatprep.mubr.msk.bf16.mxu0 %vm556_vm0, %v1514_v45  ;;  %1314 = vmatprep.mubr.msk.bf16.mxu1 %vm556_vm0, %v1517_v46 }
  0x7c   : > { %729 = vmatmul.mubr.bf16.gmra.mxu0 %v1516_v47  ;;  %833 = vmatmul.mubr.bf16.gmra.mxu1 %v1519_v48 }
  0x7d   : > { %1302 = vmatprep.mubr.msk.bf16.mxu0 %vm556_vm0, %v1520_v49  ;;  %1315 = vmatprep.mubr.msk.bf16.mxu1 %vm556_vm0, %v1523_v50 }
  0x84   : > { %737 = vmatmul.mubr.bf16.gmra.mxu0 %v1522_v51  ;;  %841 = vmatmul.mubr.bf16.gmra.mxu1 %v1525_v52 }
  0x85   : > { %1303 = vmatprep.mubr.msk.bf16.mxu0 %vm556_vm0, %v1526_v53  ;;  %1316 = vmatprep.mubr.msk.bf16.mxu1 %vm556_vm0, %v1529_v54 }
  0x8c   : > { %745 = vmatmul.mubr.bf16.gmra.mxu0 %v1528_v55  ;;  %849 = vmatmul.mubr.bf16.gmra.mxu1 %v1531_v56 }
  0x8d   : > { %1304 = vmatprep.mubr.msk.bf16.mxu0 %vm556_vm0, %v1532_v57  ;;  %1317 = vmatprep.mubr.msk.bf16.mxu1 %vm556_vm0, %v1535_v58 }
  0x94   : > { %753 = vmatmul.mubr.bf16.gmra.mxu0 %v1534_v59  ;;  %857 = vmatmul.mubr.bf16.gmra.mxu1 %v1537_v60 }
  0x95   : > { %1305 = vmatprep.mubr.msk.bf16.mxu0 %vm556_vm0, %v1538_v61 }
  0x9c   : > { %761 = vmatmul.mubr.bf16.gmra.mxu0 %v1540_v62 }
  0xfc   : > { %v666_v0 = vpop.f32.mrf.mxu0  ;;  %v770_v1 = vpop.f32.mrf.mxu1 }
  0xfd   : > { %v667_v2 = vadd.f32 %v1724_v63, %v666_v0  ;;  %v771_v3 = vadd.f32 %v1724_v63, %v770_v1 }
  0xfe   : > { %v668_v4 = vpop.f32.mrf.mxu0  ;;  %v772_v5 = vpop.f32.mrf.mxu1 }
  0xff   : > { %v865_v6 = vmax.f32 %v667_v2, 0.0  ;;  %v891_v7 = vmax.f32 %v771_v3, 0.0 }
 0x100   : > { %v669_v8 = vpop.f32.mrf.mxu0  ;;  %v773_v9 = vpop.f32.mrf.mxu1 }
 0x101   : > { %v1371_v10 = vpack.c.bf16 %v865_v6, %v865_v6  ;;  %v1397_v11 = vpack.c.bf16 %v891_v7, %v891_v7  ;;  %v670_v12 = vadd.f32 %v1724_v63, %v669_v8  ;;  %v774_v13 = vadd.f32 %v1724_v63, %v773_v9 }
 0x102   : > { %v671_v14 = vpop.f32.mrf.mxu0  ;;  %v775_v15 = vpop.f32.mrf.mxu1 }
 0x103   : > { %1116 = vst.msk [vmem:[%s1732_s23] sm:$0xf] %vm1115_vm1, %v1371_v10  ;;  %1142 = vst.msk [vmem:[%s1732_s23 + $0x68] sm:$0xf] %vm1115_vm1, %v1397_v11  ;;  %v866_v16 = vmax.f32 %v670_v12, 0.0  ;;  %v892_v17 = vmax.f32 %v774_v13, 0.0 }
 0x104   : > { %v674_v18 = vpop.f32.mrf.mxu0  ;;  %v778_v19 = vpop.f32.mrf.mxu1 }
 0x105   : > { %v1372_v20 = vpack.c.bf16 %v866_v16, %v866_v16  ;;  %v1398_v21 = vpack.c.bf16 %v892_v17, %v892_v17  ;;  %v675_v22 = vadd.f32 %v1724_v63, %v674_v18  ;;  %v779_v23 = vadd.f32 %v1724_v63, %v778_v19 }
 0x106   : > { %v676_v24 = vpop.f32.mrf.mxu0  ;;  %v780_v25 = vpop.f32.mrf.mxu1 }
 0x107   : > { %1117 = vst.msk [vmem:[%s1732_s23 + $0x4] sm:$0xf] %vm1115_vm1, %v1372_v20  ;;  %1143 = vst.msk [vmem:[%s1732_s23 + $0x6c] sm:$0xf] %vm1115_vm1, %v1398_v21  ;;  %v867_v26 = vmax.f32 %v675_v22, 0.0  ;;  %v893_v27 = vmax.f32 %v779_v23, 0.0 }
 0x108   : > { %v677_v28 = vpop.f32.mrf.mxu0  ;;  %v781_v29 = vpop.f32.mrf.mxu1 }
 0x109   : > { %v1373_v30 = vpack.c.bf16 %v867_v26, %v867_v26  ;;  %v1399_v31 = vpack.c.bf16 %v893_v27, %v893_v27  ;;  %v678_v32 = vadd.f32 %v1724_v63, %v677_v28  ;;  %v782_v33 = vadd.f32 %v1724_v63, %v781_v29 }
 0x10a   : > { %v679_v34 = vpop.f32.mrf.mxu0  ;;  %v783_v35 = vpop.f32.mrf.mxu1 }
 0x10b   : > { %1118 = vst.msk [vmem:[%s1732_s23 + $0x8] sm:$0xf] %vm1115_vm1, %v1373_v30  ;;  %1144 = vst.msk [vmem:[%s1732_s23 + $0x70] sm:$0xf] %vm1115_vm1, %v1399_v31  ;;  %v868_v36 = vmax.f32 %v678_v32, 0.0  ;;  %v894_v37 = vmax.f32 %v782_v33, 0.0 }
 0x10c   : > { %v682_v38 = vpop.f32.mrf.mxu0  ;;  %v786_v39 = vpop.f32.mrf.mxu1 }
 0x10d   : > { %v1374_v40 = vpack.c.bf16 %v868_v36, %v868_v36  ;;  %v1400_v41 = vpack.c.bf16 %v894_v37, %v894_v37  ;;  %v683_v42 = vadd.f32 %v1724_v63, %v682_v38  ;;  %v787_v43 = vadd.f32 %v1724_v63, %v786_v39 }
 0x10e   : > { %v684_v44 = vpop.f32.mrf.mxu0  ;;  %v788_v45 = vpop.f32.mrf.mxu1 }
 0x10f   : > { %1119 = vst.msk [vmem:[%s1732_s23 + $0xc] sm:$0xf] %vm1115_vm1, %v1374_v40  ;;  %1145 = vst.msk [vmem:[%s1732_s23 + $0x74] sm:$0xf] %vm1115_vm1, %v1400_v41  ;;  %v869_v46 = vmax.f32 %v683_v42, 0.0  ;;  %v895_v47 = vmax.f32 %v787_v43, 0.0 }
 0x110   : > { %v685_v48 = vpop.f32.mrf.mxu0  ;;  %v789_v49 = vpop.f32.mrf.mxu1 }
 0x111   : > { %v1375_v50 = vpack.c.bf16 %v869_v46, %v869_v46  ;;  %v1401_v51 = vpack.c.bf16 %v895_v47, %v895_v47  ;;  %v686_v52 = vadd.f32 %v1724_v63, %v685_v48  ;;  %v790_v53 = vadd.f32 %v1724_v63, %v789_v49 }
 0x112   : > { %v687_v54 = vpop.f32.mrf.mxu0  ;;  %v791_v55 = vpop.f32.mrf.mxu1 }
 0x113   : > { %1120 = vst.msk [vmem:[%s1732_s23 + $0x10] sm:$0xf] %vm1115_vm1, %v1375_v50  ;;  %1146 = vst.msk [vmem:[%s1732_s23 + $0x78] sm:$0xf] %vm1115_vm1, %v1401_v51  ;;  %v870_v56 = vmax.f32 %v686_v52, 0.0  ;;  %v896_v57 = vmax.f32 %v790_v53, 0.0 }
 0x114   : > { %v690_v58 = vpop.f32.mrf.mxu0  ;;  %v794_v59 = vpop.f32.mrf.mxu1 }
 0x115   : > { %v1376_v60 = vpack.c.bf16 %v870_v56, %v870_v56  ;;  %v1402_v61 = vpack.c.bf16 %v896_v57, %v896_v57  ;;  %v691_v62 = vadd.f32 %v1724_v63, %v690_v58  ;;  %v795_v0 = vadd.f32 %v1724_v63, %v794_v59 }
 0x116   : > { %v692_v1 = vpop.f32.mrf.mxu0  ;;  %v796_v2 = vpop.f32.mrf.mxu1 }
 0x117   : > { %1121 = vst.msk [vmem:[%s1732_s23 + $0x14] sm:$0xf] %vm1115_vm1, %v1376_v60  ;;  %1147 = vst.msk [vmem:[%s1732_s23 + $0x7c] sm:$0xf] %vm1115_vm1, %v1402_v61  ;;  %v871_v3 = vmax.f32 %v691_v62, 0.0  ;;  %v897_v4 = vmax.f32 %v795_v0, 0.0 }
 0x118   : > { %v693_v5 = vpop.f32.mrf.mxu0  ;;  %v797_v6 = vpop.f32.mrf.mxu1 }
 0x119   : > { %v1377_v7 = vpack.c.bf16 %v871_v3, %v871_v3  ;;  %v1403_v8 = vpack.c.bf16 %v897_v4, %v897_v4  ;;  %v694_v9 = vadd.f32 %v1724_v63, %v693_v5  ;;  %v798_v10 = vadd.f32 %v1724_v63, %v797_v6 }
 0x11a   : > { %v695_v11 = vpop.f32.mrf.mxu0  ;;  %v799_v12 = vpop.f32.mrf.mxu1 }
 0x11b   : > { %1122 = vst.msk [vmem:[%s1732_s23 + $0x18] sm:$0xf] %vm1115_vm1, %v1377_v7  ;;  %1148 = vst.msk [vmem:[%s1732_s23 + $0x80] sm:$0xf] %vm1115_vm1, %v1403_v8  ;;  %v872_v13 = vmax.f32 %v694_v9, 0.0  ;;  %v898_v14 = vmax.f32 %v798_v10, 0.0 }
 0x11c   : > { %v698_v15 = vpop.f32.mrf.mxu0  ;;  %v802_v16 = vpop.f32.mrf.mxu1 }
 0x11d   : > { %v1378_v17 = vpack.c.bf16 %v872_v13, %v872_v13  ;;  %v1404_v18 = vpack.c.bf16 %v898_v14, %v898_v14  ;;  %v699_v19 = vadd.f32 %v1724_v63, %v698_v15  ;;  %v803_v20 = vadd.f32 %v1724_v63, %v802_v16 }
 0x11e   : > { %v700_v21 = vpop.f32.mrf.mxu0  ;;  %v804_v22 = vpop.f32.mrf.mxu1 }
 0x11f   : > { %1123 = vst.msk [vmem:[%s1732_s23 + $0x1c] sm:$0xf] %vm1115_vm1, %v1378_v17  ;;  %1149 = vst.msk [vmem:[%s1732_s23 + $0x84] sm:$0xf] %vm1115_vm1, %v1404_v18  ;;  %v873_v23 = vmax.f32 %v699_v19, 0.0  ;;  %v899_v24 = vmax.f32 %v803_v20, 0.0 }
 0x120   : > { %v701_v25 = vpop.f32.mrf.mxu0  ;;  %v805_v26 = vpop.f32.mrf.mxu1 }
 0x121   : > { %v1379_v27 = vpack.c.bf16 %v873_v23, %v873_v23  ;;  %v1405_v28 = vpack.c.bf16 %v899_v24, %v899_v24  ;;  %v702_v29 = vadd.f32 %v1724_v63, %v701_v25  ;;  %v806_v30 = vadd.f32 %v1724_v63, %v805_v26 }
 0x122   : > { %v703_v31 = vpop.f32.mrf.mxu0  ;;  %v807_v32 = vpop.f32.mrf.mxu1 }
 0x123   : > { %1124 = vst.msk [vmem:[%s1732_s23 + $0x20] sm:$0xf] %vm1115_vm1, %v1379_v27  ;;  %1150 = vst.msk [vmem:[%s1732_s23 + $0x88] sm:$0xf] %vm1115_vm1, %v1405_v28  ;;  %v874_v33 = vmax.f32 %v702_v29, 0.0  ;;  %v900_v34 = vmax.f32 %v806_v30, 0.0 }
 0x124   : > { %v706_v35 = vpop.f32.mrf.mxu0  ;;  %v810_v36 = vpop.f32.mrf.mxu1 }
 0x125   : > { %v1380_v37 = vpack.c.bf16 %v874_v33, %v874_v33  ;;  %v1406_v38 = vpack.c.bf16 %v900_v34, %v900_v34  ;;  %v707_v39 = vadd.f32 %v1724_v63, %v706_v35  ;;  %v811_v40 = vadd.f32 %v1724_v63, %v810_v36 }
 0x126   : > { %v708_v41 = vpop.f32.mrf.mxu0  ;;  %v812_v42 = vpop.f32.mrf.mxu1 }
 0x127   : > { %1125 = vst.msk [vmem:[%s1732_s23 + $0x24] sm:$0xf] %vm1115_vm1, %v1380_v37  ;;  %1151 = vst.msk [vmem:[%s1732_s23 + $0x8c] sm:$0xf] %vm1115_vm1, %v1406_v38  ;;  %v875_v43 = vmax.f32 %v707_v39, 0.0  ;;  %v901_v44 = vmax.f32 %v811_v40, 0.0 }
 0x128   : > { %v709_v45 = vpop.f32.mrf.mxu0  ;;  %v813_v46 = vpop.f32.mrf.mxu1 }
 0x129   : > { %v1381_v47 = vpack.c.bf16 %v875_v43, %v875_v43  ;;  %v1407_v48 = vpack.c.bf16 %v901_v44, %v901_v44  ;;  %v710_v49 = vadd.f32 %v1724_v63, %v709_v45  ;;  %v814_v50 = vadd.f32 %v1724_v63, %v813_v46 }
 0x12a   : > { %v711_v51 = vpop.f32.mrf.mxu0  ;;  %v815_v52 = vpop.f32.mrf.mxu1 }
 0x12b   : > { %1126 = vst.msk [vmem:[%s1732_s23 + $0x28] sm:$0xf] %vm1115_vm1, %v1381_v47  ;;  %1152 = vst.msk [vmem:[%s1732_s23 + $0x90] sm:$0xf] %vm1115_vm1, %v1407_v48  ;;  %v876_v53 = vmax.f32 %v710_v49, 0.0  ;;  %v902_v54 = vmax.f32 %v814_v50, 0.0 }
 0x12c   : > { %v714_v55 = vpop.f32.mrf.mxu0  ;;  %v818_v56 = vpop.f32.mrf.mxu1 }
 0x12d   : > { %v1382_v57 = vpack.c.bf16 %v876_v53, %v876_v53  ;;  %v1408_v58 = vpack.c.bf16 %v902_v54, %v902_v54  ;;  %v715_v59 = vadd.f32 %v1724_v63, %v714_v55  ;;  %v819_v60 = vadd.f32 %v1724_v63, %v818_v56 }
 0x12e   : > { %v716_v61 = vpop.f32.mrf.mxu0  ;;  %v820_v62 = vpop.f32.mrf.mxu1 }
 0x12f   : > { %1127 = vst.msk [vmem:[%s1732_s23 + $0x2c] sm:$0xf] %vm1115_vm1, %v1382_v57  ;;  %1153 = vst.msk [vmem:[%s1732_s23 + $0x94] sm:$0xf] %vm1115_vm1, %v1408_v58  ;;  %v877_v0 = vmax.f32 %v715_v59, 0.0  ;;  %v903_v1 = vmax.f32 %v819_v60, 0.0 }
 0x130   : > { %v717_v2 = vpop.f32.mrf.mxu0  ;;  %v821_v3 = vpop.f32.mrf.mxu1 }
 0x131   : > { %v1383_v4 = vpack.c.bf16 %v877_v0, %v877_v0  ;;  %v1409_v5 = vpack.c.bf16 %v903_v1, %v903_v1  ;;  %v718_v6 = vadd.f32 %v1724_v63, %v717_v2  ;;  %v822_v7 = vadd.f32 %v1724_v63, %v821_v3 }
 0x132   : > { %v719_v8 = vpop.f32.mrf.mxu0  ;;  %v823_v9 = vpop.f32.mrf.mxu1 }
 0x133   : > { %1128 = vst.msk [vmem:[%s1732_s23 + $0x30] sm:$0xf] %vm1115_vm1, %v1383_v4  ;;  %1154 = vst.msk [vmem:[%s1732_s23 + $0x98] sm:$0xf] %vm1115_vm1, %v1409_v5  ;;  %v878_v10 = vmax.f32 %v718_v6, 0.0  ;;  %v904_v11 = vmax.f32 %v822_v7, 0.0 }
 0x134   : > { %v722_v12 = vpop.f32.mrf.mxu0  ;;  %v826_v13 = vpop.f32.mrf.mxu1 }
 0x135   : > { %v1384_v14 = vpack.c.bf16 %v878_v10, %v878_v10  ;;  %v1410_v15 = vpack.c.bf16 %v904_v11, %v904_v11  ;;  %v723_v16 = vadd.f32 %v1724_v63, %v722_v12  ;;  %v827_v17 = vadd.f32 %v1724_v63, %v826_v13 }
 0x136   : > { %v724_v18 = vpop.f32.mrf.mxu0  ;;  %v828_v19 = vpop.f32.mrf.mxu1 }
 0x137   : > { %1129 = vst.msk [vmem:[%s1732_s23 + $0x34] sm:$0xf] %vm1115_vm1, %v1384_v14  ;;  %1155 = vst.msk [vmem:[%s1732_s23 + $0x9c] sm:$0xf] %vm1115_vm1, %v1410_v15  ;;  %v879_v20 = vmax.f32 %v723_v16, 0.0  ;;  %v905_v21 = vmax.f32 %v827_v17, 0.0 }
 0x138   : > { %v725_v22 = vpop.f32.mrf.mxu0  ;;  %v829_v23 = vpop.f32.mrf.mxu1 }
 0x139   : > { %v1385_v24 = vpack.c.bf16 %v879_v20, %v879_v20  ;;  %v1411_v25 = vpack.c.bf16 %v905_v21, %v905_v21  ;;  %v726_v26 = vadd.f32 %v1724_v63, %v725_v22  ;;  %v830_v27 = vadd.f32 %v1724_v63, %v829_v23 }
 0x13a   : > { %v727_v28 = vpop.f32.mrf.mxu0  ;;  %v831_v29 = vpop.f32.mrf.mxu1 }
 0x13b   : > { %1130 = vst.msk [vmem:[%s1732_s23 + $0x38] sm:$0xf] %vm1115_vm1, %v1385_v24  ;;  %1156 = vst.msk [vmem:[%s1732_s23 + $0xa0] sm:$0xf] %vm1115_vm1, %v1411_v25  ;;  %v880_v30 = vmax.f32 %v726_v26, 0.0  ;;  %v906_v31 = vmax.f32 %v830_v27, 0.0 }
 0x13c   : > { %v730_v32 = vpop.f32.mrf.mxu0  ;;  %v834_v33 = vpop.f32.mrf.mxu1 }
 0x13d   : > { %v1386_v34 = vpack.c.bf16 %v880_v30, %v880_v30  ;;  %v1412_v35 = vpack.c.bf16 %v906_v31, %v906_v31  ;;  %v731_v36 = vadd.f32 %v1724_v63, %v730_v32  ;;  %v835_v37 = vadd.f32 %v1724_v63, %v834_v33 }
 0x13e   : > { %v732_v38 = vpop.f32.mrf.mxu0  ;;  %v836_v39 = vpop.f32.mrf.mxu1 }
 0x13f   : > { %1131 = vst.msk [vmem:[%s1732_s23 + $0x3c] sm:$0xf] %vm1115_vm1, %v1386_v34  ;;  %1157 = vst.msk [vmem:[%s1732_s23 + $0xa4] sm:$0xf] %vm1115_vm1, %v1412_v35  ;;  %v881_v40 = vmax.f32 %v731_v36, 0.0  ;;  %v907_v41 = vmax.f32 %v835_v37, 0.0 }
 0x140   : > { %v733_v42 = vpop.f32.mrf.mxu0  ;;  %v837_v43 = vpop.f32.mrf.mxu1 }
 0x141   : > { %v1387_v44 = vpack.c.bf16 %v881_v40, %v881_v40  ;;  %v1413_v45 = vpack.c.bf16 %v907_v41, %v907_v41  ;;  %v734_v46 = vadd.f32 %v1724_v63, %v733_v42  ;;  %v838_v47 = vadd.f32 %v1724_v63, %v837_v43 }
 0x142   : > { %v735_v48 = vpop.f32.mrf.mxu0  ;;  %v839_v49 = vpop.f32.mrf.mxu1 }
 0x143   : > { %1132 = vst.msk [vmem:[%s1732_s23 + $0x40] sm:$0xf] %vm1115_vm1, %v1387_v44  ;;  %1158 = vst.msk [vmem:[%s1732_s23 + $0xa8] sm:$0xf] %vm1115_vm1, %v1413_v45  ;;  %v882_v50 = vmax.f32 %v734_v46, 0.0  ;;  %v908_v51 = vmax.f32 %v838_v47, 0.0 }
 0x144   : > { %v738_v52 = vpop.f32.mrf.mxu0  ;;  %v842_v53 = vpop.f32.mrf.mxu1 }
 0x145   : > { %v1388_v54 = vpack.c.bf16 %v882_v50, %v882_v50  ;;  %v1414_v55 = vpack.c.bf16 %v908_v51, %v908_v51  ;;  %v739_v56 = vadd.f32 %v1724_v63, %v738_v52  ;;  %v843_v57 = vadd.f32 %v1724_v63, %v842_v53 }
 0x146   : > { %v740_v58 = vpop.f32.mrf.mxu0  ;;  %v844_v59 = vpop.f32.mrf.mxu1 }
 0x147   : > { %1133 = vst.msk [vmem:[%s1732_s23 + $0x44] sm:$0xf] %vm1115_vm1, %v1388_v54  ;;  %1159 = vst.msk [vmem:[%s1732_s23 + $0xac] sm:$0xf] %vm1115_vm1, %v1414_v55  ;;  %v883_v60 = vmax.f32 %v739_v56, 0.0  ;;  %v909_v61 = vmax.f32 %v843_v57, 0.0 }
 0x148   : > { %v741_v62 = vpop.f32.mrf.mxu0  ;;  %v845_v0 = vpop.f32.mrf.mxu1 }
 0x149   : > { %v1389_v1 = vpack.c.bf16 %v883_v60, %v883_v60  ;;  %v1415_v2 = vpack.c.bf16 %v909_v61, %v909_v61  ;;  %v742_v3 = vadd.f32 %v1724_v63, %v741_v62  ;;  %v846_v4 = vadd.f32 %v1724_v63, %v845_v0 }
 0x14a   : > { %v743_v5 = vpop.f32.mrf.mxu0  ;;  %v847_v6 = vpop.f32.mrf.mxu1 }
 0x14b   : > { %1134 = vst.msk [vmem:[%s1732_s23 + $0x48] sm:$0xf] %vm1115_vm1, %v1389_v1  ;;  %1160 = vst.msk [vmem:[%s1732_s23 + $0xb0] sm:$0xf] %vm1115_vm1, %v1415_v2  ;;  %v884_v7 = vmax.f32 %v742_v3, 0.0  ;;  %v910_v8 = vmax.f32 %v846_v4, 0.0 }
 0x14c   : > { %v746_v9 = vpop.f32.mrf.mxu0  ;;  %v850_v10 = vpop.f32.mrf.mxu1 }
 0x14d   : > { %v1390_v11 = vpack.c.bf16 %v884_v7, %v884_v7  ;;  %v1416_v12 = vpack.c.bf16 %v910_v8, %v910_v8  ;;  %v747_v13 = vadd.f32 %v1724_v63, %v746_v9  ;;  %v851_v14 = vadd.f32 %v1724_v63, %v850_v10 }
 0x14e   : > { %v748_v15 = vpop.f32.mrf.mxu0  ;;  %v852_v16 = vpop.f32.mrf.mxu1 }
 0x14f   : > { %1135 = vst.msk [vmem:[%s1732_s23 + $0x4c] sm:$0xf] %vm1115_vm1, %v1390_v11  ;;  %1161 = vst.msk [vmem:[%s1732_s23 + $0xb4] sm:$0xf] %vm1115_vm1, %v1416_v12  ;;  %v885_v17 = vmax.f32 %v747_v13, 0.0  ;;  %v911_v18 = vmax.f32 %v851_v14, 0.0 }
 0x150   : > { %v749_v19 = vpop.f32.mrf.mxu0  ;;  %v853_v20 = vpop.f32.mrf.mxu1 }
 0x151   : > { %v1391_v21 = vpack.c.bf16 %v885_v17, %v885_v17  ;;  %v1417_v22 = vpack.c.bf16 %v911_v18, %v911_v18  ;;  %v750_v23 = vadd.f32 %v1724_v63, %v749_v19  ;;  %v854_v24 = vadd.f32 %v1724_v63, %v853_v20 }
 0x152   : > { %v751_v25 = vpop.f32.mrf.mxu0  ;;  %v855_v26 = vpop.f32.mrf.mxu1 }
 0x153   : > { %1136 = vst.msk [vmem:[%s1732_s23 + $0x50] sm:$0xf] %vm1115_vm1, %v1391_v21  ;;  %1162 = vst.msk [vmem:[%s1732_s23 + $0xb8] sm:$0xf] %vm1115_vm1, %v1417_v22  ;;  %v886_v27 = vmax.f32 %v750_v23, 0.0  ;;  %v912_v28 = vmax.f32 %v854_v24, 0.0 }
 0x154   : > { %v754_v29 = vpop.f32.mrf.mxu0  ;;  %v858_v30 = vpop.f32.mrf.mxu1 }
 0x155   : > { %v1392_v31 = vpack.c.bf16 %v886_v27, %v886_v27  ;;  %v1418_v32 = vpack.c.bf16 %v912_v28, %v912_v28  ;;  %v755_v33 = vadd.f32 %v1724_v63, %v754_v29  ;;  %v859_v34 = vadd.f32 %v1724_v63, %v858_v30 }
 0x156   : > { %v756_v35 = vpop.f32.mrf.mxu0  ;;  %v860_v36 = vpop.f32.mrf.mxu1 }
 0x157   : > { %1137 = vst.msk [vmem:[%s1732_s23 + $0x54] sm:$0xf] %vm1115_vm1, %v1392_v31  ;;  %1163 = vst.msk [vmem:[%s1732_s23 + $0xbc] sm:$0xf] %vm1115_vm1, %v1418_v32  ;;  %v887_v37 = vmax.f32 %v755_v33, 0.0  ;;  %v913_v38 = vmax.f32 %v859_v34, 0.0 }
 0x158   : > { %v757_v39 = vpop.f32.mrf.mxu0  ;;  %v861_v40 = vpop.f32.mrf.mxu1 }
 0x159   : > { %v1393_v41 = vpack.c.bf16 %v887_v37, %v887_v37  ;;  %v1419_v42 = vpack.c.bf16 %v913_v38, %v913_v38  ;;  %v758_v43 = vadd.f32 %v1724_v63, %v757_v39  ;;  %v862_v44 = vadd.f32 %v1724_v63, %v861_v40 }
 0x15a   : > { %v759_v45 = vpop.f32.mrf.mxu0  ;;  %v863_v46 = vpop.f32.mrf.mxu1 }
 0x15b   : > { %1138 = vst.msk [vmem:[%s1732_s23 + $0x58] sm:$0xf] %vm1115_vm1, %v1393_v41  ;;  %1164 = vst.msk [vmem:[%s1732_s23 + $0xc0] sm:$0xf] %vm1115_vm1, %v1419_v42  ;;  %v888_v47 = vmax.f32 %v758_v43, 0.0  ;;  %v914_v48 = vmax.f32 %v862_v44, 0.0 }
 0x15c   : > { %v762_v49 = vpop.f32.mrf.mxu0 }
 0x15d   : > { %v1394_v50 = vpack.c.bf16 %v888_v47, %v888_v47  ;;  %v1420_v51 = vpack.c.bf16 %v914_v48, %v914_v48  ;;  %v763_v52 = vadd.f32 %v1724_v63, %v762_v49 }
 0x15e   : > { %v764_v53 = vpop.f32.mrf.mxu0 }
 0x15f   : > { %1139 = vst.msk [vmem:[%s1732_s23 + $0x5c] sm:$0xf] %vm1115_vm1, %v1394_v50  ;;  %1165 = vst.msk [vmem:[%s1732_s23 + $0xc4] sm:$0xf] %vm1115_vm1, %v1420_v51  ;;  %v889_v54 = vmax.f32 %v763_v52, 0.0 }
 0x160   : > { %v765_v55 = vpop.f32.mrf.mxu0 }
 0x161   : > { %v1395_v56 = vpack.c.bf16 %v889_v54, %v889_v54  ;;  %v766_v57 = vadd.f32 %v1724_v63, %v765_v55 }
 0x162   : > { %v767_v58 = vpop.f32.mrf.mxu0 }
 0x163   : > { %1140 = vst.msk [vmem:[%s1732_s23 + $0x60] sm:$0xf] %vm1115_vm1, %v1395_v56  ;;  %v890_v59 = vmax.f32 %v766_v57, 0.0 }
 0x165   : > { %v1396_v60 = vpack.c.bf16 %v890_v59, %v890_v59 }
 0x167   : > { %1141 = vst.msk [vmem:[%s1732_s23 + $0x64] sm:$0xf] %vm1115_vm1, %v1396_v60 }
 0x168 PF: > { %s13_s12 = sadd.s32 1, %s1547_s12  }
 0x169   : > { %p10_p4 = scmp.ge.s32.totalorder %s13_s12, 4  }
 0x16b   :  { %12 = sbr.rel (!%p10_p4) target bundleno = 1 (0x1), region = 62 }

// kernel: critic_forward.5
= control target key start
LH: loop header
LB: loop body
LE: loop exit
PB: predicated region body
PF: predicated region fallthrough
CT: control target
= control target key end

     0   :  { %s1157_s12 = smov 0   ;;  %s1340_s0 = inlined_call_operand.vmem [shape: bf16[176,512], index: 0, kind: input, shape index: {}]   ;;  %s1341_s1 = inlined_call_operand.vmem [shape: bf16[512,64], index: 1, kind: input, shape index: {}]   ;;  %s1342_s2 = inlined_call_operand.vmem [shape: f32[1,64], index: 2, kind: input, shape index: {}]   ;;  %s1343_s3 = inlined_call_operand.vmem [shape: bf16[176,64], index: 3, kind: output, shape index: {}]  }
   0x1 LB: > { %s861_s13 = sadd.s32 4294967295, %s1135_s12   ;;  %p865_p0 = scmp.ge.s32.totalorder %s1135_s12, 1  ;;  %s1135_s12 = sphi %s1157_s12, %s13_s12  }
   0x2   : > { %p139_p1 = scmp.lt.s32.totalorder %s1135_s12, 3 }
   0x4   : > { %p140_p2 = pnand %p865_p0, %p139_p1 }
   0x5   : > { %s164_s19 = smul.u32 (!%p140_p2), 11, %s861_s13 }
   0x6   : > { %143 = sbr.rel (%p140_p2) target bundleno = 291 (0x123), region = 32 }
   0x7   : > { %p165_p3 = scmp.lt.s32.totalorder (!%p140_p2), %s164_s19, 21 }
   0xb   : > { %v1063_v0 = vld [vmem:[%s1341_s1 + $0x78] sm:$0xff]   ;;  %v1067_v4 = vld [vmem:[%s1341_s1 + $0x70] sm:$0xff]   ;;  %v1071_v8 = vld [vmem:[%s1341_s1 + $0x68] sm:$0xff]   ;;  %s1345_s19 = smov (!%p165_p3, %s164_s19), 21  ;;  %vm793_vm0 = vcmask 519168  }
   0xc   : > { %v1064_v1 = vld [vmem:[%s1341_s1 + $0xf8] sm:$0xff]   ;;  %951 = vmatprep.subr.bf16.mxu0 %v1063_v0  ;;  %v1068_v5 = vld [vmem:[%s1341_s1 + $0xf0] sm:$0xff]   ;;  %v1072_v9 = vld [vmem:[%s1341_s1 + $0xe8] sm:$0xff]   ;;  %s939_s18 = sshll.u32 %s1345_s19, 4  ;;  %s868_s7 = sshll.u32 %s1345_s19, 2 }
   0xd   : > { %v1065_v2 = vld [vmem:[%s1341_s1 + $0x38] sm:$0xff]   ;;  %1003 = vmatprep.subr.bf16.mxu1 %v1064_v1  ;;  %v1069_v6 = vld [vmem:[%s1341_s1 + $0x30] sm:$0xff]   ;;  %v1073_v10 = vld [vmem:[%s1341_s1 + $0x28] sm:$0xff]   ;;  %s1263_s13 = scalar_lea.vmem %s1340_s0, %s939_s18  ;;  %s1304_s10 = scalar_lea.vmem %s1343_s3, %s868_s7 }
   0xe   : > { %v1066_v3 = vld [vmem:[%s1341_s1 + $0xb8] sm:$0xff]   ;;  %952 = vmatpush3.bf16.msra.mxu0 %v1065_v2  ;;  %v1070_v7 = vld [vmem:[%s1341_s1 + $0xb0] sm:$0xff]   ;;  %v1074_v11 = vld [vmem:[%s1341_s1 + $0xa8] sm:$0xff]  }
   0xf   : > { %1004 = vmatpush3.bf16.msra.mxu1 %v1066_v3  ;;  %953 = vmatprep.subr.bf16.mxu0 %v1067_v4  ;;  %v1075_v12 = vld [vmem:[%s1341_s1 + $0x60] sm:$0xff]   ;;  %v1079_v16 = vld [vmem:[%s1341_s1 + $0x58] sm:$0xff]   ;;  %v1083_v20 = vld [vmem:[%s1341_s1 + $0x50] sm:$0xff]  }
  0x10   : > { %1005 = vmatprep.subr.bf16.mxu1 %v1068_v5  ;;  %v1076_v13 = vld [vmem:[%s1341_s1 + $0xe0] sm:$0xff]   ;;  %v1080_v17 = vld [vmem:[%s1341_s1 + $0xd8] sm:$0xff]   ;;  %v1084_v21 = vld [vmem:[%s1341_s1 + $0xd0] sm:$0xff]  }
  0x11   : > { %v1077_v14 = vld [vmem:[%s1341_s1 + $0x20] sm:$0xff]   ;;  %v1081_v18 = vld [vmem:[%s1341_s1 + $0x18] sm:$0xff]   ;;  %v1085_v22 = vld [vmem:[%s1341_s1 + $0x10] sm:$0xff]  }
  0x12   : > { %954 = vmatpush3.bf16.msra.mxu0 %v1069_v6  ;;  %v1078_v15 = vld [vmem:[%s1341_s1 + $0xa0] sm:$0xff]   ;;  %v1082_v19 = vld [vmem:[%s1341_s1 + $0x98] sm:$0xff]   ;;  %v1086_v23 = vld [vmem:[%s1341_s1 + $0x90] sm:$0xff]  }
  0x13   : > { %1006 = vmatpush3.bf16.msra.mxu1 %v1070_v7  ;;  %955 = vmatprep.subr.bf16.mxu0 %v1071_v8  ;;  %v1087_v24 = vld [vmem:[%s1341_s1 + $0x48] sm:$0xff]   ;;  %v1091_v28 = vld [vmem:[%s1341_s1 + $0x40] sm:$0xff]  }
  0x14   : > { %1007 = vmatprep.subr.bf16.mxu1 %v1072_v9  ;;  %v1088_v25 = vld [vmem:[%s1341_s1 + $0xc8] sm:$0xff]   ;;  %v1092_v29 = vld [vmem:[%s1341_s1 + $0xc0] sm:$0xff]  }
  0x15   : > { %v1089_v26 = vld [vmem:[%s1341_s1 + $0x8] sm:$0xff]   ;;  %v1093_v30 = vld [vmem:[%s1341_s1] sm:$0xff]  }
  0x16   : > { %956 = vmatpush3.bf16.msra.mxu0 %v1073_v10  ;;  %v1090_v27 = vld [vmem:[%s1341_s1 + $0x88] sm:$0xff]   ;;  %v1094_v31 = vld [vmem:[%s1341_s1 + $0x80] sm:$0xff]  }
  0x17   : > { %1008 = vmatpush3.bf16.msra.mxu1 %v1074_v11  ;;  %957 = vmatprep.subr.bf16.mxu0 %v1075_v12  ;;  %v1095_v32 = vld [vmem:[%s1263_s13] ss:$16 sps:$4 sm:$0xff]   ;;  %v1097_v33 = vld [vmem:[%s1263_s13 + $0x4] ss:$16 sps:$4 sm:$0xff]   ;;  %v1098_v34 = vld [vmem:[%s1263_s13 + $0x8] ss:$16 sps:$4 sm:$0xff]  }
  0x18   : > { %1009 = vmatprep.subr.bf16.mxu1 %v1076_v13  ;;  %v1100_v35 = vld [vmem:[%s1263_s13 + $0xc] ss:$16 sps:$4 sm:$0xff]   ;;  %609 = vmatprep.mubr.bf16.mxu0 %v1097_v33  ;;  %v1101_v36 = vld [vmem:[%s1263_s13 + $0x24] ss:$16 sps:$4 sm:$0xff]   ;;  %v1105_v38 = vld [vmem:[%s1263_s13 + $0x20] ss:$16 sps:$4 sm:$0xff]  }
  0x19   : > { %689 = vmatprep.mubr.bf16.mxu1 %v1100_v35  ;;  %v1103_v37 = vld [vmem:[%s1263_s13 + $0x2c] ss:$16 sps:$4 sm:$0xff]   ;;  %v1106_v39 = vld [vmem:[%s1263_s13 + $0x28] ss:$16 sps:$4 sm:$0xff]   ;;  %v1107_v40 = vld [vmem:[%s1263_s13 + $0x44] ss:$16 sps:$4 sm:$0xff]  }
  0x1a   : > { %958 = vmatpush3.bf16.msra.mxu0 %v1077_v14  ;;  %v1109_v41 = vld [vmem:[%s1263_s13 + $0x4c] ss:$16 sps:$4 sm:$0xff]   ;;  %v1111_v42 = vld [vmem:[%s1263_s13 + $0x40] ss:$16 sps:$4 sm:$0xff]   ;;  %v1112_v43 = vld [vmem:[%s1263_s13 + $0x48] ss:$16 sps:$4 sm:$0xff]  }
  0x1b   : > { %1010 = vmatpush3.bf16.msra.mxu1 %v1078_v15  ;;  %959 = vmatprep.subr.bf16.mxu0 %v1079_v16  ;;  %v1113_v44 = vld [vmem:[%s1263_s13 + $0x64] ss:$16 sps:$4 sm:$0xff]   ;;  %v1115_v45 = vld [vmem:[%s1263_s13 + $0x6c] ss:$16 sps:$4 sm:$0xff]   ;;  %v1117_v46 = vld [vmem:[%s1263_s13 + $0x60] ss:$16 sps:$4 sm:$0xff]  }
  0x1c   : > { %1011 = vmatprep.subr.bf16.mxu1 %v1080_v17  ;;  %v1118_v47 = vld [vmem:[%s1263_s13 + $0x68] ss:$16 sps:$4 sm:$0xff]   ;;  %v1119_v48 = vld [vmem:[%s1263_s13 + $0x84] ss:$16 sps:$4 sm:$0xff]   ;;  %v1121_v49 = vld [vmem:[%s1263_s13 + $0x8c] ss:$16 sps:$4 sm:$0xff]  }
  0x1d   : > { %v198_v50 = vld [vmem:[%s1263_s13 + $0xa0] sm:$0xff]  ;;  %v199_v51 = vld [vmem:[%s1263_s13 + $0xa8] sm:$0xff] }
  0x1e   : > { %960 = vmatpush3.bf16.msra.mxu0 %v1081_v18  ;;  %v1123_v52 = vld [vmem:[%s1263_s13 + $0x80] ss:$16 sps:$4 sm:$0xff]   ;;  %v1124_v53 = vld [vmem:[%s1263_s13 + $0x88] ss:$16 sps:$4 sm:$0xff]   ;;  %v891_v54 = vcombine.high %v198_v50, %v198_v50  ;;  %v893_v55 = vcombine.high %v199_v51, %v199_v51  ;;  %v890_v56 = vcombine.low %v198_v50, %v198_v50  ;;  %v892_v57 = vcombine.low %v199_v51, %v199_v51 }
  0x1f   : > { %1012 = vmatpush3.bf16.msra.mxu1 %v1082_v19  ;;  %961 = vmatprep.subr.bf16.mxu0 %v1083_v20  ;;  %v1296_v60 = vld [vmem:[%s1342_s2] ss:$0 sm:$0xff] }
  0x20   : > { %1013 = vmatprep.subr.bf16.mxu1 %v1084_v21 }
  0x22   : > { %962 = vmatpush3.bf16.msra.mxu0 %v1085_v22 }
  0x23   : > { %1014 = vmatpush3.bf16.msra.mxu1 %v1086_v23  ;;  %963 = vmatprep.subr.bf16.mxu0 %v1087_v24 }
  0x24   : > { %1015 = vmatprep.subr.bf16.mxu1 %v1088_v25 }
  0x26   : > { %964 = vmatpush3.bf16.msra.mxu0 %v1089_v26 }
  0x27   : > { %1016 = vmatpush3.bf16.msra.mxu1 %v1090_v27  ;;  %965 = vmatprep.subr.bf16.mxu0 %v1091_v28 }
  0x28   : > { %1017 = vmatprep.subr.bf16.mxu1 %v1092_v29 }
  0x2a   : > { %966 = vmatpush3.bf16.msra.mxu0 %v1093_v30 }
  0x2b   : > { %1018 = vmatpush3.bf16.msra.mxu1 %v1094_v31 }
  0x2d   : > { %610 = vmatmul.mubr.bf16.vlgmr.msra.gmra.mxu0 %v1095_v32 }
  0x2e   : > { %690 = vmatmul.mubr.bf16.vlgmr.msra.gmra.mxu1 %v1098_v34  ;;  %617 = vmatprep.mubr.bf16.mxu0 %v1101_v36 }
  0x2f   : > { %697 = vmatprep.mubr.bf16.mxu1 %v1103_v37 }
  0x35   : > { %618 = vmatmul.mubr.bf16.gmra.mxu0 %v1105_v38 }
  0x36   : > { %698 = vmatmul.mubr.bf16.gmra.mxu1 %v1106_v39  ;;  %625 = vmatprep.mubr.bf16.mxu0 %v1107_v40 }
  0x37   : > { %705 = vmatprep.mubr.bf16.mxu1 %v1109_v41 }
  0x3d   : > { %626 = vmatmul.mubr.bf16.gmra.mxu0 %v1111_v42 }
  0x3e   : > { %706 = vmatmul.mubr.bf16.gmra.mxu1 %v1112_v43  ;;  %633 = vmatprep.mubr.bf16.mxu0 %v1113_v44 }
  0x3f   : > { %713 = vmatprep.mubr.bf16.mxu1 %v1115_v45 }
  0x45   : > { %634 = vmatmul.mubr.bf16.gmra.mxu0 %v1117_v46 }
  0x46   : > { %714 = vmatmul.mubr.bf16.gmra.mxu1 %v1118_v47  ;;  %641 = vmatprep.mubr.bf16.mxu0 %v1119_v48 }
  0x47   : > { %721 = vmatprep.mubr.bf16.mxu1 %v1121_v49 }
  0x4d   : > { %642 = vmatmul.mubr.bf16.gmra.mxu0 %v1123_v52 }
  0x4e   : > { %722 = vmatmul.mubr.bf16.gmra.mxu1 %v1124_v53  ;;  %649 = vmatprep.mubr.bf16.mxu0 %v891_v54 }
  0x4f   : > { %729 = vmatprep.mubr.bf16.mxu1 %v893_v55 }
  0x55   : > { %650 = vmatmul.mubr.bf16.gmra.mxu0 %v890_v56 }
  0x56   : > { %730 = vmatmul.mubr.bf16.gmra.mxu1 %v892_v57 }
  0xed   : > { %v967_v58 = vpop.f32.mrf.mxu0 }
  0xee   : > { %v1019_v59 = vpop.f32.mrf.mxu1 }
  0xef   : > { %v968_v61 = vpop.f32.mrf.mxu0 }
  0xf0   : > { %v969_v62 = vadd.f32 %v968_v61, %v967_v58  ;;  %v1020_v63 = vpop.f32.mrf.mxu1 }
  0xf1   : > { %v970_v0 = vpop.f32.mrf.mxu0  ;;  %v1021_v2 = vadd.f32 %v1020_v63, %v1019_v59 }
  0xf2   : > { %v612_v1 = vadd.f32 %v969_v62, %v1296_v60  ;;  %v1022_v3 = vpop.f32.mrf.mxu1 }
  0xf3   : > { %v971_v4 = vpop.f32.mrf.mxu0 }
  0xf4   : > { %v692_v5 = vadd.f32 %v1021_v2, %v612_v1  ;;  %v972_v6 = vadd.f32 %v971_v4, %v970_v0  ;;  %v1023_v7 = vpop.f32.mrf.mxu1 }
  0xf5   : > { %v973_v8 = vpop.f32.mrf.mxu0  ;;  %v1024_v11 = vadd.f32 %v1023_v7, %v1022_v3 }
  0xf6   : > { %v737_v9 = vmax.f32 %v692_v5, 0.0  ;;  %v615_v10 = vadd.f32 %v972_v6, %v1296_v60  ;;  %v1025_v12 = vpop.f32.mrf.mxu1 }
  0xf7   : > { %v974_v13 = vpop.f32.mrf.mxu0 }
  0xf8   : > { %v940_v14 = vpack.c.bf16 %v737_v9, %v737_v9  ;;  %v695_v15 = vadd.f32 %v1024_v11, %v615_v10  ;;  %v975_v16 = vadd.f32 %v974_v13, %v973_v8  ;;  %v1026_v17 = vpop.f32.mrf.mxu1 }
  0xf9   : > { %v976_v18 = vpop.f32.mrf.mxu0  ;;  %v1027_v21 = vadd.f32 %v1026_v17, %v1025_v12 }
  0xfa   : > { %794 = vst.msk [vmem:[%s1304_s10] sm:$0xf] %vm793_vm0, %v940_v14  ;;  %v738_v19 = vmax.f32 %v695_v15, 0.0  ;;  %v620_v20 = vadd.f32 %v975_v16, %v1296_v60  ;;  %v1028_v22 = vpop.f32.mrf.mxu1 }
  0xfb   : > { %v977_v23 = vpop.f32.mrf.mxu0 }
  0xfc   : > { %v941_v24 = vpack.c.bf16 %v738_v19, %v738_v19  ;;  %v700_v25 = vadd.f32 %v1027_v21, %v620_v20  ;;  %v978_v26 = vadd.f32 %v977_v23, %v976_v18  ;;  %v1029_v27 = vpop.f32.mrf.mxu1 }
  0xfd   : > { %v979_v28 = vpop.f32.mrf.mxu0  ;;  %v1030_v31 = vadd.f32 %v1029_v27, %v1028_v22 }
  0xfe   : > { %795 = vst.msk [vmem:[%s1304_s10 + $0x4] sm:$0xf] %vm793_vm0, %v941_v24  ;;  %v739_v29 = vmax.f32 %v700_v25, 0.0  ;;  %v623_v30 = vadd.f32 %v978_v26, %v1296_v60  ;;  %v1031_v32 = vpop.f32.mrf.mxu1 }
  0xff   : > { %v980_v33 = vpop.f32.mrf.mxu0 }
 0x100   : > { %v942_v34 = vpack.c.bf16 %v739_v29, %v739_v29  ;;  %v703_v35 = vadd.f32 %v1030_v31, %v623_v30  ;;  %v981_v36 = vadd.f32 %v980_v33, %v979_v28  ;;  %v1032_v37 = vpop.f32.mrf.mxu1 }
 0x101   : > { %v982_v38 = vpop.f32.mrf.mxu0  ;;  %v1033_v41 = vadd.f32 %v1032_v37, %v1031_v32 }
 0x102   : > { %796 = vst.msk [vmem:[%s1304_s10 + $0x8] sm:$0xf] %vm793_vm0, %v942_v34  ;;  %v740_v39 = vmax.f32 %v703_v35, 0.0  ;;  %v628_v40 = vadd.f32 %v981_v36, %v1296_v60  ;;  %v1034_v42 = vpop.f32.mrf.mxu1 }
 0x103   : > { %v983_v43 = vpop.f32.mrf.mxu0 }
 0x104   : > { %v943_v44 = vpack.c.bf16 %v740_v39, %v740_v39  ;;  %v708_v45 = vadd.f32 %v1033_v41, %v628_v40  ;;  %v984_v46 = vadd.f32 %v983_v43, %v982_v38  ;;  %v1035_v47 = vpop.f32.mrf.mxu1 }
 0x105   : > { %v985_v48 = vpop.f32.mrf.mxu0  ;;  %v1036_v51 = vadd.f32 %v1035_v47, %v1034_v42 }
 0x106   : > { %797 = vst.msk [vmem:[%s1304_s10 + $0xc] sm:$0xf] %vm793_vm0, %v943_v44  ;;  %v741_v49 = vmax.f32 %v708_v45, 0.0  ;;  %v631_v50 = vadd.f32 %v984_v46, %v1296_v60  ;;  %v1037_v52 = vpop.f32.mrf.mxu1 }
 0x107   : > { %v986_v53 = vpop.f32.mrf.mxu0 }
 0x108   : > { %v944_v54 = vpack.c.bf16 %v741_v49, %v741_v49  ;;  %v711_v55 = vadd.f32 %v1036_v51, %v631_v50  ;;  %v987_v56 = vadd.f32 %v986_v53, %v985_v48  ;;  %v1038_v57 = vpop.f32.mrf.mxu1 }
 0x109   : > { %v988_v58 = vpop.f32.mrf.mxu0  ;;  %v1039_v62 = vadd.f32 %v1038_v57, %v1037_v52 }
 0x10a   : > { %798 = vst.msk [vmem:[%s1304_s10 + $0x10] sm:$0xf] %vm793_vm0, %v944_v54  ;;  %v742_v59 = vmax.f32 %v711_v55, 0.0  ;;  %v636_v61 = vadd.f32 %v987_v56, %v1296_v60  ;;  %v1040_v63 = vpop.f32.mrf.mxu1 }
 0x10b   : > { %v989_v0 = vpop.f32.mrf.mxu0 }
 0x10c   : > { %v945_v1 = vpack.c.bf16 %v742_v59, %v742_v59  ;;  %v716_v2 = vadd.f32 %v1039_v62, %v636_v61  ;;  %v990_v3 = vadd.f32 %v989_v0, %v988_v58  ;;  %v1041_v4 = vpop.f32.mrf.mxu1 }
 0x10d   : > { %v991_v5 = vpop.f32.mrf.mxu0  ;;  %v1042_v8 = vadd.f32 %v1041_v4, %v1040_v63 }
 0x10e   : > { %799 = vst.msk [vmem:[%s1304_s10 + $0x14] sm:$0xf] %vm793_vm0, %v945_v1  ;;  %v743_v6 = vmax.f32 %v716_v2, 0.0  ;;  %v639_v7 = vadd.f32 %v990_v3, %v1296_v60  ;;  %v1043_v9 = vpop.f32.mrf.mxu1 }
 0x10f   : > { %v992_v10 = vpop.f32.mrf.mxu0 }
 0x110   : > { %v946_v11 = vpack.c.bf16 %v743_v6, %v743_v6  ;;  %v719_v12 = vadd.f32 %v1042_v8, %v639_v7  ;;  %v993_v13 = vadd.f32 %v992_v10, %v991_v5  ;;  %v1044_v14 = vpop.f32.mrf.mxu1 }
 0x111   : > { %v994_v15 = vpop.f32.mrf.mxu0  ;;  %v1045_v18 = vadd.f32 %v1044_v14, %v1043_v9 }
 0x112   : > { %800 = vst.msk [vmem:[%s1304_s10 + $0x18] sm:$0xf] %vm793_vm0, %v946_v11  ;;  %v744_v16 = vmax.f32 %v719_v12, 0.0  ;;  %v644_v17 = vadd.f32 %v993_v13, %v1296_v60  ;;  %v1046_v19 = vpop.f32.mrf.mxu1 }
 0x113   : > { %v995_v20 = vpop.f32.mrf.mxu0 }
 0x114   : > { %v947_v21 = vpack.c.bf16 %v744_v16, %v744_v16  ;;  %v724_v22 = vadd.f32 %v1045_v18, %v644_v17  ;;  %v996_v23 = vadd.f32 %v995_v20, %v994_v15  ;;  %v1047_v24 = vpop.f32.mrf.mxu1 }
 0x115   : > { %v997_v25 = vpop.f32.mrf.mxu0  ;;  %v1048_v28 = vadd.f32 %v1047_v24, %v1046_v19 }
 0x116   : > { %801 = vst.msk [vmem:[%s1304_s10 + $0x1c] sm:$0xf] %vm793_vm0, %v947_v21  ;;  %v745_v26 = vmax.f32 %v724_v22, 0.0  ;;  %v647_v27 = vadd.f32 %v996_v23, %v1296_v60  ;;  %v1049_v29 = vpop.f32.mrf.mxu1 }
 0x117   : > { %v998_v30 = vpop.f32.mrf.mxu0 }
 0x118   : > { %v948_v31 = vpack.c.bf16 %v745_v26, %v745_v26  ;;  %v727_v32 = vadd.f32 %v1048_v28, %v647_v27  ;;  %v999_v33 = vadd.f32 %v998_v30, %v997_v25  ;;  %v1050_v34 = vpop.f32.mrf.mxu1 }
 0x119   : > { %v1000_v35 = vpop.f32.mrf.mxu0  ;;  %v1051_v38 = vadd.f32 %v1050_v34, %v1049_v29 }
 0x11a   : > { %802 = vst.msk [vmem:[%s1304_s10 + $0x20] sm:$0xf] %vm793_vm0, %v948_v31  ;;  %v746_v36 = vmax.f32 %v727_v32, 0.0  ;;  %v652_v37 = vadd.f32 %v999_v33, %v1296_v60  ;;  %v1052_v39 = vpop.f32.mrf.mxu1 }
 0x11b   : > { %v1001_v40 = vpop.f32.mrf.mxu0 }
 0x11c   : > { %v949_v41 = vpack.c.bf16 %v746_v36, %v746_v36  ;;  %v732_v42 = vadd.f32 %v1051_v38, %v652_v37  ;;  %v1053_v43 = vpop.f32.mrf.mxu1 }
 0x11e   : > { %803 = vst.msk [vmem:[%s1304_s10 + $0x24] sm:$0xf] %vm793_vm0, %v949_v41  ;;  %v747_v44 = vmax.f32 %v732_v42, 0.0 }
 0x120   : > { %v950_v45 = vpack.c.bf16 %v747_v44, %v747_v44 }
 0x122   : > { %804 = vst.msk [vmem:[%s1304_s10 + $0x28] sm:$0xf] %vm793_vm0, %v950_v45 }
 0x123 PF: > { %s13_s12 = sadd.s32 1, %s1135_s12  }
 0x124   : > { %p10_p4 = scmp.ge.s32.totalorder %s13_s12, 4  }
 0x126   :  { %12 = sbr.rel (!%p10_p4) target bundleno = 1 (0x1), region = 62 }

// kernel: critic_forward.6
= control target key start
LH: loop header
LB: loop body
LE: loop exit
PB: predicated region body
PF: predicated region fallthrough
CT: control target
= control target key end

     0   :  { %s1186_s12 = smov 0   ;;  %s1356_s0 = inlined_call_operand.vmem [shape: bf16[112,576], index: 0, kind: input, shape index: {}]   ;;  %s1357_s1 = inlined_call_operand.vmem [shape: bf16[576,64], index: 1, kind: input, shape index: {}]   ;;  %s1358_s2 = inlined_call_operand.vmem [shape: f32[1,64], index: 2, kind: input, shape index: {}]   ;;  %s1359_s3 = inlined_call_operand.vmem [shape: bf16[112,64], index: 3, kind: output, shape index: {}]  }
   0x1 LB: > { %s891_s13 = sadd.s32 4294967295, %s1164_s12   ;;  %p895_p0 = scmp.ge.s32.totalorder %s1164_s12, 1  ;;  %s1164_s12 = sphi %s1186_s12, %s13_s12  }
   0x2   : > { %p139_p1 = scmp.lt.s32.totalorder %s1164_s12, 3 }
   0x4   : > { %p140_p2 = pnand %p895_p0, %p139_p1 }
   0x5   : > { %s164_s17 = smul.u32 (!%p140_p2), 7, %s891_s13 }
   0x6   : > { %143 = sbr.rel (%p140_p2) target bundleno = 284 (0x11c), region = 32 }
   0x7   : > { %p165_p3 = scmp.lt.s32.totalorder (!%p140_p2), %s164_s17, 13 }
   0xb   : > { %v1096_v0 = vld [vmem:[%s1357_s1 + $0x78] sm:$0xff]   ;;  %v1100_v4 = vld [vmem:[%s1357_s1 + $0x70] sm:$0xff]   ;;  %v1104_v8 = vld [vmem:[%s1357_s1 + $0x68] sm:$0xff]   ;;  %s1361_s17 = smov (!%p165_p3, %s164_s17), 13  ;;  %vm586_vm0 = vcmask 523264   ;;  %vm827_vm1 = vcmask 519168  }
   0xc   : > { %v1097_v1 = vld [vmem:[%s1357_s1 + $0xf8] sm:$0xff]   ;;  %975 = vmatprep.subr.bf16.mxu0 %v1096_v0  ;;  %v1101_v5 = vld [vmem:[%s1357_s1 + $0xf0] sm:$0xff]   ;;  %v1105_v9 = vld [vmem:[%s1357_s1 + $0xe8] sm:$0xff]   ;;  %s1087_s16 = smul.u32 20, %s1361_s17  ;;  %s897_s18 = sshll.u32 %s1361_s17, 2 }
   0xd   : > { %v1098_v2 = vld [vmem:[%s1357_s1 + $0x38] sm:$0xff]   ;;  %1015 = vmatprep.subr.bf16.mxu1 %v1097_v1  ;;  %v1102_v6 = vld [vmem:[%s1357_s1 + $0x30] sm:$0xff]   ;;  %v1106_v10 = vld [vmem:[%s1357_s1 + $0x28] sm:$0xff]   ;;  %s1337_s21 = scalar_lea.vmem %s1359_s3, %s897_s18 }
   0xe   : > { %v1099_v3 = vld [vmem:[%s1357_s1 + $0xb8] sm:$0xff]   ;;  %976 = vmatpush3.bf16.msra.mxu0 %v1098_v2  ;;  %v1103_v7 = vld [vmem:[%s1357_s1 + $0xb0] sm:$0xff]   ;;  %v1107_v11 = vld [vmem:[%s1357_s1 + $0xa8] sm:$0xff]   ;;  %s1292_s27 = scalar_lea.vmem %s1356_s0, %s1087_s16 }
   0xf   : > { %1016 = vmatpush3.bf16.msra.mxu1 %v1099_v3  ;;  %977 = vmatprep.subr.bf16.mxu0 %v1100_v4  ;;  %v1108_v12 = vld [vmem:[%s1357_s1 + $0x60] sm:$0xff]   ;;  %v1112_v16 = vld [vmem:[%s1357_s1 + $0x58] sm:$0xff]   ;;  %v1116_v20 = vld [vmem:[%s1357_s1 + $0x50] sm:$0xff]  }
  0x10   : > { %1017 = vmatprep.subr.bf16.mxu1 %v1101_v5  ;;  %v1109_v13 = vld [vmem:[%s1357_s1 + $0xe0] sm:$0xff]   ;;  %v1113_v17 = vld [vmem:[%s1357_s1 + $0xd8] sm:$0xff]   ;;  %v1117_v21 = vld [vmem:[%s1357_s1 + $0xd0] sm:$0xff]  }
  0x11   : > { %v1110_v14 = vld [vmem:[%s1357_s1 + $0x20] sm:$0xff]   ;;  %v1114_v18 = vld [vmem:[%s1357_s1 + $0x18] sm:$0xff]   ;;  %v1118_v22 = vld [vmem:[%s1357_s1 + $0x10] sm:$0xff]  }
  0x12   : > { %978 = vmatpush3.bf16.msra.mxu0 %v1102_v6  ;;  %v1111_v15 = vld [vmem:[%s1357_s1 + $0xa0] sm:$0xff]   ;;  %v1115_v19 = vld [vmem:[%s1357_s1 + $0x98] sm:$0xff]   ;;  %v1119_v23 = vld [vmem:[%s1357_s1 + $0x90] sm:$0xff]  }
  0x13   : > { %1018 = vmatpush3.bf16.msra.mxu1 %v1103_v7  ;;  %979 = vmatprep.subr.bf16.mxu0 %v1104_v8  ;;  %v1120_v24 = vld [vmem:[%s1357_s1 + $0x48] sm:$0xff]   ;;  %v1124_v28 = vld [vmem:[%s1357_s1 + $0x40] sm:$0xff]   ;;  %v1134_v36 = vld [vmem:[%s1357_s1 + $0x118] sm:$0xff]  }
  0x14   : > { %1019 = vmatprep.subr.bf16.mxu1 %v1105_v9  ;;  %v1121_v25 = vld [vmem:[%s1357_s1 + $0xc8] sm:$0xff]   ;;  %v1125_v29 = vld [vmem:[%s1357_s1 + $0xc0] sm:$0xff]   ;;  %v1141_v39 = vld [vmem:[%s1357_s1 + $0x110] sm:$0xff]  }
  0x15   : > { %v1122_v26 = vld [vmem:[%s1357_s1 + $0x8] sm:$0xff]   ;;  %v1126_v30 = vld [vmem:[%s1357_s1] sm:$0xff]   ;;  %v1144_v43 = vld [vmem:[%s1292_s27 + $0x5c] ss:$20 sps:$4 sm:$0xff]  }
  0x16   : > { %980 = vmatpush3.bf16.msra.mxu0 %v1106_v10  ;;  %v1123_v27 = vld [vmem:[%s1357_s1 + $0x88] sm:$0xff]   ;;  %v1127_v31 = vld [vmem:[%s1357_s1 + $0x80] sm:$0xff]   ;;  %v196_v46 = vld [vmem:[%s1292_s27 + $0x78] sm:$0xff] }
  0x17   : > { %1020 = vmatpush3.bf16.msra.mxu1 %v1107_v11  ;;  %981 = vmatprep.subr.bf16.mxu0 %v1108_v12  ;;  %v1128_v32 = vld [vmem:[%s1292_s27] ss:$20 sps:$4 sm:$0xff]   ;;  %v1130_v33 = vld [vmem:[%s1292_s27 + $0x4] ss:$20 sps:$4 sm:$0xff]   ;;  %v1131_v34 = vld [vmem:[%s1292_s27 + $0x8] ss:$20 sps:$4 sm:$0xff]   ;;  %v915_v50 = vcombine.high %v196_v46, %v196_v46  ;;  %v914_v52 = vcombine.low %v196_v46, %v196_v46 }
  0x18   : > { %1021 = vmatprep.subr.bf16.mxu1 %v1109_v13  ;;  %v1133_v35 = vld [vmem:[%s1292_s27 + $0xc] ss:$20 sps:$4 sm:$0xff]   ;;  %631 = vmatprep.mubr.bf16.mxu0 %v1130_v33  ;;  %v1137_v38 = vld [vmem:[%s1292_s27 + $0x34] ss:$20 sps:$4 sm:$0xff]   ;;  %v1140_v41 = vld [vmem:[%s1292_s27 + $0x30] ss:$20 sps:$4 sm:$0xff]  }
  0x19   : > { %695 = vmatprep.mubr.bf16.mxu1 %v1133_v35  ;;  %v1135_v37 = vld [vmem:[%s1292_s27 + $0x2c] ss:$20 sps:$4 sm:$0xff]   ;;  %v1139_v40 = vld [vmem:[%s1292_s27 + $0x28] ss:$20 sps:$4 sm:$0xff]   ;;  %v1146_v48 = vld [vmem:[%s1292_s27 + $0x50] ss:$20 sps:$4 sm:$0xff]  }
  0x1a   : > { %982 = vmatpush3.bf16.msra.mxu0 %v1110_v14  ;;  %v1142_v42 = vld [vmem:[%s1292_s27 + $0x54] ss:$20 sps:$4 sm:$0xff]   ;;  %v1153_v45 = vld [vmem:[%s1357_s1 + $0x100] sm:$0xff]   ;;  %v1147_v49 = vld [vmem:[%s1292_s27 + $0x58] ss:$20 sps:$4 sm:$0xff]  }
  0x1b   : > { %1022 = vmatpush3.bf16.msra.mxu1 %v1111_v15  ;;  %983 = vmatprep.subr.bf16.mxu0 %v1112_v16  ;;  %v1148_v44 = vld [vmem:[%s1357_s1 + $0x108] sm:$0xff]   ;;  %v197_v47 = vld [vmem:[%s1292_s27 + $0x80] sm:$0xff] }
  0x1c   : > { %1023 = vmatprep.subr.bf16.mxu1 %v1113_v17  ;;  %v917_v51 = vcombine.high %v197_v47, %v197_v47  ;;  %v916_v53 = vcombine.low %v197_v47, %v197_v47  ;;  %v1154_v54 = vld [vmem:[%s1292_s27 + $0x10] ss:$20 sps:$4 sm:$0xff]   ;;  %v1155_v55 = vld [vmem:[%s1292_s27 + $0x60] ss:$20 sps:$4 sm:$0xff]   ;;  %v1156_v56 = vld [vmem:[%s1292_s27 + $0x38] ss:$20 sps:$4 sm:$0xff]  }
  0x1d   : > { %v1157_v57 = vld [vmem:[%s1292_s27 + $0x88] ss:$0 sps:$4 sm:$0xff]  }
  0x1e   : > { %984 = vmatpush3.bf16.msra.mxu0 %v1114_v18 }
  0x1f   : > { %1024 = vmatpush3.bf16.msra.mxu1 %v1115_v19  ;;  %985 = vmatprep.subr.bf16.mxu0 %v1116_v20 }
  0x20   : > { %1025 = vmatprep.subr.bf16.mxu1 %v1117_v21  ;;  %v898_v21 = vld [vmem:[%s1358_s2] ss:$0 sm:$0xff] }
  0x22   : > { %986 = vmatpush3.bf16.msra.mxu0 %v1118_v22 }
  0x23   : > { %1026 = vmatpush3.bf16.msra.mxu1 %v1119_v23  ;;  %987 = vmatprep.subr.bf16.mxu0 %v1120_v24 }
  0x24   : > { %1027 = vmatprep.subr.bf16.mxu1 %v1121_v25 }
  0x26   : > { %988 = vmatpush3.bf16.msra.mxu0 %v1122_v26 }
  0x27   : > { %1028 = vmatpush3.bf16.msra.mxu1 %v1123_v27  ;;  %989 = vmatprep.subr.bf16.mxu0 %v1124_v28 }
  0x28   : > { %1029 = vmatprep.subr.bf16.mxu1 %v1125_v29 }
  0x2a   : > { %990 = vmatpush3.bf16.msra.mxu0 %v1126_v30 }
  0x2b   : > { %1030 = vmatpush3.bf16.msra.mxu1 %v1127_v31  ;;  %1063 = vmatprep.subr.bf16.mxu0 %v1134_v36 }
  0x2c   : > { %1079 = vmatprep.subr.bf16.mxu1 %v1134_v36 }
  0x2d   : > { %632 = vmatmul.mubr.bf16.vlgmr.msra.gmra.mxu0 %v1128_v32 }
  0x2e   : > { %696 = vmatmul.mubr.bf16.vlgmr.msra.gmra.mxu1 %v1131_v34  ;;  %1064 = vmatpush3.bf16.msra.mxu0 %v1134_v36 }
  0x2f   : > { %1083 = vmatpush3.bf16.msra.mxu1 %v1134_v36  ;;  %639 = vmatprep.mubr.bf16.mxu0 %v1135_v37 }
  0x30   : > { %703 = vmatprep.mubr.bf16.mxu1 %v1137_v38  ;;  %1065 = vmatprep.subr.bf16.mxu0 %v1141_v39 }
  0x31   : > { %1080 = vmatprep.subr.bf16.mxu1 %v1141_v39 }
  0x32   : > { %1066 = vmatpush3.bf16.msra.mxu0 %v1141_v39 }
  0x33   : > { %1084 = vmatpush3.bf16.msra.mxu1 %v1141_v39  ;;  %1067 = vmatprep.subr.bf16.mxu0 %v1148_v44 }
  0x34   : > { %1081 = vmatprep.subr.bf16.mxu1 %v1148_v44 }
  0x35   : > { %640 = vmatmul.mubr.bf16.gmra.mxu0 %v1139_v40 }
  0x36   : > { %704 = vmatmul.mubr.bf16.gmra.mxu1 %v1140_v41  ;;  %647 = vmatprep.mubr.bf16.mxu0 %v1142_v42 }
  0x37   : > { %711 = vmatprep.mubr.bf16.mxu1 %v1144_v43  ;;  %1068 = vmatpush3.bf16.msra.mxu0 %v1148_v44 }
  0x38   : > { %1085 = vmatpush3.bf16.msra.mxu1 %v1148_v44  ;;  %1069 = vmatprep.subr.bf16.mxu0 %v1153_v45 }
  0x39   : > { %1082 = vmatprep.subr.bf16.mxu1 %v1153_v45 }
  0x3b   : > { %1070 = vmatpush3.bf16.msra.mxu0 %v1153_v45 }
  0x3c   : > { %1086 = vmatpush3.bf16.msra.mxu1 %v1153_v45 }
  0x3d   : > { %648 = vmatmul.mubr.bf16.gmra.mxu0 %v1146_v48 }
  0x3e   : > { %712 = vmatmul.mubr.bf16.gmra.mxu1 %v1147_v49  ;;  %655 = vmatprep.mubr.bf16.mxu0 %v915_v50 }
  0x3f   : > { %719 = vmatprep.mubr.bf16.mxu1 %v917_v51 }
  0x45   : > { %656 = vmatmul.mubr.bf16.gmra.mxu0 %v914_v52 }
  0x46   : > { %720 = vmatmul.mubr.bf16.gmra.mxu1 %v916_v53  ;;  %1071 = vmatprep.mubr.msk.bf16.mxu0 %vm586_vm0, %v1154_v54 }
  0x47   : > { %1075 = vmatprep.mubr.msk.bf16.mxu1 %vm586_vm0, %v1155_v55 }
  0x4d   : > { %1072 = vmatmul.mubr.msk.bf16.vlgmr.msra.gmra.mxu0 %vm586_vm0, %v1156_v56 }
  0x4e   : > { %1076 = vmatmul.mubr.msk.bf16.vlgmr.msra.gmra.mxu1 %vm586_vm0, %v1157_v57 }
  0xed   : > { %v991_v58 = vpop.f32.mrf.mxu0 }
  0xee   : > { %v1031_v59 = vpop.f32.mrf.mxu1 }
  0xef   : > { %v992_v60 = vpop.f32.mrf.mxu0 }
  0xf0   : > { %v1032_v61 = vpop.f32.mrf.mxu1  ;;  %v993_v19 = vadd.f32 %v992_v60, %v991_v58 }
  0xf1   : > { %v994_v62 = vpop.f32.mrf.mxu0  ;;  %v1033_v39 = vadd.f32 %v1032_v61, %v1031_v59 }
  0xf2   : > { %v1034_v63 = vpop.f32.mrf.mxu1  ;;  %v634_v29 = vadd.f32 %v993_v19, %v898_v21 }
  0xf3   : > { %v995_v0 = vpop.f32.mrf.mxu0 }
  0xf4   : > { %v1035_v1 = vpop.f32.mrf.mxu1  ;;  %v996_v31 = vadd.f32 %v995_v0, %v994_v62  ;;  %v698_v50 = vadd.f32 %v1033_v39, %v634_v29 }
  0xf5   : > { %v997_v2 = vpop.f32.mrf.mxu0  ;;  %v1036_v55 = vadd.f32 %v1035_v1, %v1034_v63 }
  0xf6   : > { %v1037_v3 = vpop.f32.mrf.mxu1  ;;  %v637_v46 = vadd.f32 %v996_v31, %v898_v21 }
  0xf7   : > { %v998_v4 = vpop.f32.mrf.mxu0 }
  0xf8   : > { %v1038_v5 = vpop.f32.mrf.mxu1  ;;  %v999_v17 = vadd.f32 %v998_v4, %v997_v2  ;;  %v701_v4 = vadd.f32 %v1036_v55, %v637_v46 }
  0xf9   : > { %v1000_v6 = vpop.f32.mrf.mxu0  ;;  %v1039_v32 = vadd.f32 %v1038_v5, %v1037_v3 }
  0xfa   : > { %v1040_v7 = vpop.f32.mrf.mxu1  ;;  %v642_v25 = vadd.f32 %v999_v17, %v898_v21 }
  0xfb   : > { %v1001_v8 = vpop.f32.mrf.mxu0 }
  0xfc   : > { %v1041_v9 = vpop.f32.mrf.mxu1  ;;  %v1002_v26 = vadd.f32 %v1001_v8, %v1000_v6  ;;  %v706_v42 = vadd.f32 %v1039_v32, %v642_v25 }
  0xfd   : > { %v1003_v10 = vpop.f32.mrf.mxu0  ;;  %v1042_v47 = vadd.f32 %v1041_v9, %v1040_v7 }
  0xfe   : > { %v1043_v11 = vpop.f32.mrf.mxu1  ;;  %v645_v40 = vadd.f32 %v1002_v26, %v898_v21 }
  0xff   : > { %v1004_v12 = vpop.f32.mrf.mxu0 }
 0x100   : > { %v1044_v13 = vpop.f32.mrf.mxu1  ;;  %v1005_v23 = vadd.f32 %v1004_v12, %v1003_v10  ;;  %v709_v59 = vadd.f32 %v1042_v47, %v645_v40 }
 0x101   : > { %v1006_v14 = vpop.f32.mrf.mxu0  ;;  %v1045_v44 = vadd.f32 %v1044_v13, %v1043_v11 }
 0x102   : > { %v1046_v15 = vpop.f32.mrf.mxu1  ;;  %v650_v36 = vadd.f32 %v1005_v23, %v898_v21 }
 0x103   : > { %v1007_v16 = vpop.f32.mrf.mxu0 }
 0x104   : > { %v1047_v18 = vpop.f32.mrf.mxu1  ;;  %v1008_v37 = vadd.f32 %v1007_v16, %v1006_v14  ;;  %v714_v54 = vadd.f32 %v1045_v44, %v650_v36 }
 0x105   : > { %v1009_v20 = vpop.f32.mrf.mxu0  ;;  %v1048_v60 = vadd.f32 %v1047_v18, %v1046_v15 }
 0x106   : > { %v1049_v22 = vpop.f32.mrf.mxu1  ;;  %v653_v51 = vadd.f32 %v1008_v37, %v898_v21 }
 0x107   : > { %v1010_v24 = vpop.f32.mrf.mxu0 }
 0x108   : > { %v1011_v27 = vadd.f32 %v1010_v24, %v1009_v20  ;;  %v1050_v28 = vpop.f32.mrf.mxu1  ;;  %v717_v8 = vadd.f32 %v1048_v60, %v653_v51 }
 0x109   : > { %v1012_v30 = vpop.f32.mrf.mxu0  ;;  %v1051_v34 = vadd.f32 %v1050_v28, %v1049_v22 }
 0x10a   : > { %v658_v33 = vadd.f32 %v1011_v27, %v898_v21  ;;  %v1052_v35 = vpop.f32.mrf.mxu1 }
 0x10b   : > { %v1013_v38 = vpop.f32.mrf.mxu0 }
 0x10c   : > { %v1053_v41 = vpop.f32.mrf.mxu1  ;;  %v722_v43 = vadd.f32 %v1051_v34, %v658_v33 }
 0x10d   : > { %v1073_v45 = vpop.f32.mrf.mxu0 }
 0x10e   : > { %v770_v48 = vadd.f32 %v1073_v45, %v706_v42  ;;  %v1077_v49 = vpop.f32.mrf.mxu1 }
 0x10f   : > { %v786_v52 = vadd.f32 %v1077_v49, %v722_v43  ;;  %v761_v53 = vpop.f32.mrf.mxu0 }
 0x110   : > { %v793_v56 = vmax.f32 %v770_v48, 0.0  ;;  %v762_v57 = vadd.f32 %v761_v53, %v698_v50  ;;  %v777_v58 = vpop.f32.mrf.mxu1 }
 0x111   : > { %v797_v61 = vmax.f32 %v786_v52, 0.0  ;;  %v778_v62 = vadd.f32 %v777_v58, %v714_v54  ;;  %v1074_v0 = vpop.f32.mrf.mxu0 }
 0x112   : > { %v970_v2 = vpack.c.bf16 %v793_v56, %v793_v56  ;;  %v791_v3 = vmax.f32 %v762_v57, 0.0  ;;  %v773_v63 = vadd.f32 %v1074_v0, %v709_v59  ;;  %v1078_v1 = vpop.f32.mrf.mxu1 }
 0x113   : > { %v974_v5 = vpack.c.bf16 %v797_v61, %v797_v61  ;;  %v795_v6 = vmax.f32 %v778_v62, 0.0  ;;  %v764_v7 = vpop.f32.mrf.mxu0 }
 0x114   : > { %830 = vst.msk [vmem:[%s1337_s21 + $0x8] sm:$0xf] %vm827_vm1, %v970_v2  ;;  %v968_v9 = vpack.c.bf16 %v791_v3, %v791_v3  ;;  %v794_v10 = vmax.f32 %v773_v63, 0.0  ;;  %v765_v11 = vadd.f32 %v764_v7, %v701_v4  ;;  %v780_v12 = vpop.f32.mrf.mxu1 }
 0x115   : > { %834 = vst.msk [vmem:[%s1337_s21 + $0x18] sm:$0xf] %vm827_vm1, %v974_v5  ;;  %v972_v13 = vpack.c.bf16 %v795_v6, %v795_v6  ;;  %v781_v14 = vadd.f32 %v780_v12, %v717_v8 }
 0x116   : > { %828 = vst.msk [vmem:[%s1337_s21] sm:$0xf] %vm827_vm1, %v968_v9  ;;  %v971_v15 = vpack.c.bf16 %v794_v10, %v794_v10  ;;  %v792_v16 = vmax.f32 %v765_v11, 0.0 }
 0x117   : > { %832 = vst.msk [vmem:[%s1337_s21 + $0x10] sm:$0xf] %vm827_vm1, %v972_v13  ;;  %v796_v17 = vmax.f32 %v781_v14, 0.0 }
 0x118   : > { %831 = vst.msk [vmem:[%s1337_s21 + $0xc] sm:$0xf] %vm827_vm1, %v971_v15  ;;  %v969_v18 = vpack.c.bf16 %v792_v16, %v792_v16 }
 0x119   : > { %v973_v19 = vpack.c.bf16 %v796_v17, %v796_v17 }
 0x11a   : > { %829 = vst.msk [vmem:[%s1337_s21 + $0x4] sm:$0xf] %vm827_vm1, %v969_v18 }
 0x11b   : > { %833 = vst.msk [vmem:[%s1337_s21 + $0x14] sm:$0xf] %vm827_vm1, %v973_v19 }
 0x11c PF: > { %s13_s12 = sadd.s32 1, %s1164_s12  }
 0x11d   : > { %p10_p4 = scmp.ge.s32.totalorder %s13_s12, 4  }
 0x11f   :  { %12 = sbr.rel (!%p10_p4) target bundleno = 1 (0x1), region = 62 }

// kernel: critic_forward.7
= control target key start
LH: loop header
LB: loop body
LE: loop exit
PB: predicated region body
PF: predicated region fallthrough
CT: control target
= control target key end

     0   :  { %v831_v36 = vlaneseq  ;;  %v9584_v37 = vmov 1966171168   ;;  %vm4960_vm0 = vcmask 523264   ;;  %vm9587_vm1 = vmmov 0   ;;  %s12699_s2 = inlined_call_operand.vmem [shape: bf16[3136,512], index: 2, kind: input, shape index: {}]   ;;  %s12700_s0 = inlined_call_operand.vmem [shape: bf16[2,3136], index: 0, kind: input, shape index: {}]   ;;  %s12701_s3 = inlined_call_operand.vmem [shape: f32[1,512], index: 3, kind: input, shape index: {}]   ;;  %s12702_s4 = inlined_call_operand.vmem [shape: bf16[64,128], index: 4, kind: input, shape index: {}]   ;;  %s12703_s1 = inlined_call_operand.vmem [shape: bf16[2,64], index: 1, kind: input, shape index: {}]   ;;  %s12704_s7 = inlined_call_operand.vmem [shape: bf16[128,300], index: 7, kind: input, shape index: {}]   ;;  %s12705_s6 = inlined_call_operand.vmem [shape: bf16[512,300], index: 6, kind: input, shape index: {}]   ;;  %s12706_s5 = inlined_call_operand.vmem [shape: f32[1,128], index: 5, kind: input, shape index: {}]   ;;  %s12707_s10 = inlined_call_operand.<no memory space> [shape: f32[1,1], index: 10, kind: input, shape index: {}]   ;;  %s12708_s8 = inlined_call_operand.vmem [shape: f32[1,300], index: 8, kind: input, shape index: {}]   ;;  %s12709_s9 = inlined_call_operand.vmem [shape: f32[1,300], index: 9, kind: input, shape index: {}]   ;;  %s12710_s11 = inlined_call_operand.vmem [shape: f32[2,1], index: 11, kind: output, shape index: {}]  }
   0x1   :  { %v8240_v0 = vld [vmem:[%s12699_s2 + $0xe4] ss:$16 sps:$4 sm:$0xff]   ;;  %v8244_v2 = vld [vmem:[%s12699_s2 + $0xe0] ss:$16 sps:$4 sm:$0xff]   ;;  %v857_v38 = vunpack.c.l.s4 %v9584_v37  ;;  %vm7209_vm2 = vcmask 1041408   ;;  %vm7213_vm3 = vcmask 353280  }
   0x2   :  { %v8242_v1 = vld [vmem:[%s12699_s2 + $0x2e4] ss:$16 sps:$4 sm:$0xff]   ;;  %4964 = vmatprep.subr.bf16.mxu0 %v8240_v0  ;;  %v8245_v3 = vld [vmem:[%s12699_s2 + $0x2e0] ss:$16 sps:$4 sm:$0xff]   ;;  %v9765_v42 = vshrl.u32 %v831_v36, 7  ;;  %vm7226_vm4 = vcmask 1024  }
   0x3   :  { %5005 = vmatprep.subr.bf16.mxu1 %v8242_v1  ;;  %v8246_v4 = vld [vmem:[%s12699_s2 + $0xc4] ss:$16 sps:$4 sm:$0xff]   ;;  %4965 = vmatpush1.bf16.msra.mxu0 %v8244_v2  ;;  %v8250_v6 = vld [vmem:[%s12699_s2 + $0xc0] ss:$16 sps:$4 sm:$0xff]   ;;  %v858_v43 = vunpack.c.0.s8 %v857_v38 }
   0x4   :  { %5006 = vmatpush1.bf16.msra.mxu1 %v8245_v3  ;;  %v8248_v5 = vld [vmem:[%s12699_s2 + $0x2c4] ss:$16 sps:$4 sm:$0xff]   ;;  %4966 = vmatprep.subr.bf16.mxu0 %v8246_v4  ;;  %v8251_v7 = vld [vmem:[%s12699_s2 + $0x2c0] ss:$16 sps:$4 sm:$0xff]  }
   0x5   :  { %5007 = vmatprep.subr.bf16.mxu1 %v8248_v5  ;;  %v8252_v8 = vld [vmem:[%s12699_s2 + $0xa4] ss:$16 sps:$4 sm:$0xff]   ;;  %v8256_v10 = vld [vmem:[%s12699_s2 + $0xa0] ss:$16 sps:$4 sm:$0xff]   ;;  %v9783_v49 = vsub.s32 %v858_v43, %v9765_v42 }
   0x6   :  { %v8254_v9 = vld [vmem:[%s12699_s2 + $0x2a4] ss:$16 sps:$4 sm:$0xff]   ;;  %v8257_v11 = vld [vmem:[%s12699_s2 + $0x2a0] ss:$16 sps:$4 sm:$0xff]  }
   0x7   :  { %4967 = vmatpush1.bf16.msra.mxu0 %v8250_v6  ;;  %v8258_v12 = vld [vmem:[%s12699_s2 + $0x84] ss:$16 sps:$4 sm:$0xff]   ;;  %v8262_v14 = vld [vmem:[%s12699_s2 + $0x80] ss:$16 sps:$4 sm:$0xff]  }
   0x8   :  { %5008 = vmatpush1.bf16.msra.mxu1 %v8251_v7  ;;  %4968 = vmatprep.subr.bf16.mxu0 %v8252_v8  ;;  %v8260_v13 = vld [vmem:[%s12699_s2 + $0x284] ss:$16 sps:$4 sm:$0xff]   ;;  %v8263_v15 = vld [vmem:[%s12699_s2 + $0x280] ss:$16 sps:$4 sm:$0xff]  }
   0x9   :  { %5009 = vmatprep.subr.bf16.mxu1 %v8254_v9  ;;  %v8264_v16 = vld [vmem:[%s12699_s2 + $0x64] ss:$16 sps:$4 sm:$0xff]   ;;  %v8268_v18 = vld [vmem:[%s12699_s2 + $0x60] ss:$16 sps:$4 sm:$0xff]  }
   0xa   :  { %v8266_v17 = vld [vmem:[%s12699_s2 + $0x264] ss:$16 sps:$4 sm:$0xff]   ;;  %v8269_v19 = vld [vmem:[%s12699_s2 + $0x260] ss:$16 sps:$4 sm:$0xff]  }
   0xb   :  { %4969 = vmatpush1.bf16.msra.mxu0 %v8256_v10  ;;  %v8270_v20 = vld [vmem:[%s12699_s2 + $0x44] ss:$16 sps:$4 sm:$0xff]   ;;  %v8274_v22 = vld [vmem:[%s12699_s2 + $0x40] ss:$16 sps:$4 sm:$0xff]  }
   0xc   :  { %5010 = vmatpush1.bf16.msra.mxu1 %v8257_v11  ;;  %4970 = vmatprep.subr.bf16.mxu0 %v8258_v12  ;;  %v8272_v21 = vld [vmem:[%s12699_s2 + $0x244] ss:$16 sps:$4 sm:$0xff]   ;;  %v8275_v23 = vld [vmem:[%s12699_s2 + $0x240] ss:$16 sps:$4 sm:$0xff]  }
   0xd   :  { %5011 = vmatprep.subr.bf16.mxu1 %v8260_v13  ;;  %v8276_v24 = vld [vmem:[%s12699_s2 + $0x24] ss:$16 sps:$4 sm:$0xff]   ;;  %v8280_v26 = vld [vmem:[%s12699_s2 + $0x20] ss:$16 sps:$4 sm:$0xff]  }
   0xe   :  { %v8278_v25 = vld [vmem:[%s12699_s2 + $0x224] ss:$16 sps:$4 sm:$0xff]   ;;  %v8281_v27 = vld [vmem:[%s12699_s2 + $0x220] ss:$16 sps:$4 sm:$0xff]  }
   0xf   :  { %4971 = vmatpush1.bf16.msra.mxu0 %v8262_v14  ;;  %v8282_v28 = vld [vmem:[%s12699_s2 + $0x4] ss:$16 sps:$4 sm:$0xff]   ;;  %v8286_v30 = vld [vmem:[%s12699_s2] ss:$16 sps:$4 sm:$0xff]  }
  0x10   :  { %5012 = vmatpush1.bf16.msra.mxu1 %v8263_v15  ;;  %4972 = vmatprep.subr.bf16.mxu0 %v8264_v16  ;;  %v8284_v29 = vld [vmem:[%s12699_s2 + $0x204] ss:$16 sps:$4 sm:$0xff]   ;;  %v8287_v31 = vld [vmem:[%s12699_s2 + $0x200] ss:$16 sps:$4 sm:$0xff]  }
  0x11   :  { %5013 = vmatprep.subr.bf16.mxu1 %v8266_v17  ;;  %v8288_v32 = vld [vmem:[%s12699_s2 + $0x1e4] ss:$16 sps:$4 sm:$0xff]   ;;  %v8292_v34 = vld [vmem:[%s12699_s2 + $0x1e0] ss:$16 sps:$4 sm:$0xff]  }
  0x12   :  { %v8290_v33 = vld [vmem:[%s12699_s2 + $0x3e4] ss:$16 sps:$4 sm:$0xff]   ;;  %v8293_v35 = vld [vmem:[%s12699_s2 + $0x3e0] ss:$16 sps:$4 sm:$0xff]  }
  0x13   :  { %4973 = vmatpush1.bf16.msra.mxu0 %v8268_v18  ;;  %v8294_v39 = vld [vmem:[%s12699_s2 + $0x1c4] ss:$16 sps:$4 sm:$0xff]   ;;  %v8298_v41 = vld [vmem:[%s12699_s2 + $0x1c0] ss:$16 sps:$4 sm:$0xff]  }
  0x14   :  { %5014 = vmatpush1.bf16.msra.mxu1 %v8269_v19  ;;  %4974 = vmatprep.subr.bf16.mxu0 %v8270_v20  ;;  %v8296_v40 = vld [vmem:[%s12699_s2 + $0x3c4] ss:$16 sps:$4 sm:$0xff]   ;;  %v8299_v44 = vld [vmem:[%s12699_s2 + $0x3c0] ss:$16 sps:$4 sm:$0xff]  }
  0x15   :  { %5015 = vmatprep.subr.bf16.mxu1 %v8272_v21  ;;  %v8300_v45 = vld [vmem:[%s12699_s2 + $0x1a4] ss:$16 sps:$4 sm:$0xff]   ;;  %v8304_v47 = vld [vmem:[%s12699_s2 + $0x1a0] ss:$16 sps:$4 sm:$0xff]  }
  0x16   :  { %v8302_v46 = vld [vmem:[%s12699_s2 + $0x3a4] ss:$16 sps:$4 sm:$0xff]   ;;  %v8305_v48 = vld [vmem:[%s12699_s2 + $0x3a0] ss:$16 sps:$4 sm:$0xff]  }
  0x17   :  { %4975 = vmatpush1.bf16.msra.mxu0 %v8274_v22  ;;  %v8306_v50 = vld [vmem:[%s12699_s2 + $0x184] ss:$16 sps:$4 sm:$0xff]   ;;  %v8310_v53 = vld [vmem:[%s12699_s2 + $0x180] ss:$16 sps:$4 sm:$0xff]  }
  0x18   :  { %5016 = vmatpush1.bf16.msra.mxu1 %v8275_v23  ;;  %4976 = vmatprep.subr.bf16.mxu0 %v8276_v24  ;;  %v8308_v51 = vld [vmem:[%s12699_s2 + $0x384] ss:$16 sps:$4 sm:$0xff]   ;;  %v8311_v55 = vld [vmem:[%s12699_s2 + $0x380] ss:$16 sps:$4 sm:$0xff]  }
  0x19   :  { %5017 = vmatprep.subr.bf16.mxu1 %v8278_v25  ;;  %v41_v52 = vld [vmem:[%s12700_s0] sm:$0xff] }
  0x1a   :  { %v862_v54 = vrot.slane %v41_v52, %v9783_v49  ;;  %v8312_v56 = vld [vmem:[%s12699_s2 + $0x164] ss:$16 sps:$4 sm:$0xff]   ;;  %v8316_v59 = vld [vmem:[%s12699_s2 + $0x160] ss:$16 sps:$4 sm:$0xff]   ;;  %v855_v1 = vcombine.high %v41_v52, %v41_v52 }
  0x1b   :  { %4977 = vmatpush1.bf16.msra.mxu0 %v8280_v26  ;;  %v8314_v57 = vld [vmem:[%s12699_s2 + $0x364] ss:$16 sps:$4 sm:$0xff]   ;;  %v8317_v61 = vld [vmem:[%s12699_s2 + $0x360] ss:$16 sps:$4 sm:$0xff]  }
  0x1c   :  { %5018 = vmatpush1.bf16.msra.mxu1 %v8281_v27  ;;  %4978 = vmatprep.subr.bf16.mxu0 %v8282_v28  ;;  %v870_v58 = vcombine.high %v862_v54, %v862_v54  ;;  %v8318_v62 = vld [vmem:[%s12699_s2 + $0x144] ss:$16 sps:$4 sm:$0xff]   ;;  %v8322_v2 = vld [vmem:[%s12699_s2 + $0x140] ss:$16 sps:$4 sm:$0xff]   ;;  %v9841_v6 = vrot.slane %v855_v1, %v9783_v49  ;;  %v9861_v13 = vrot.slane %v862_v54, %v9783_v49 }
  0x1d   :  { %5019 = vmatprep.subr.bf16.mxu1 %v8284_v29  ;;  %v8320_v63 = vld [vmem:[%s12699_s2 + $0x344] ss:$16 sps:$4 sm:$0xff]   ;;  %v8323_v3 = vld [vmem:[%s12699_s2 + $0x340] ss:$16 sps:$4 sm:$0xff]  }
  0x1e   :  { %v9811_v60 = vrot.slane %v870_v58, %v9783_v49  ;;  %v8324_v4 = vld [vmem:[%s12699_s2 + $0x124] ss:$16 sps:$4 sm:$0xff]   ;;  %v8328_v7 = vld [vmem:[%s12699_s2 + $0x120] ss:$16 sps:$4 sm:$0xff]   ;;  %v871_v11 = vcombine.high %v9841_v6, %v9841_v6  ;;  %v9880_v19 = vcombine.high %v9861_v13, %v9861_v13 }
  0x1f   :  { %4979 = vmatpush1.bf16.msra.mxu0 %v8286_v30  ;;  %v8326_v5 = vld [vmem:[%s12699_s2 + $0x324] ss:$16 sps:$4 sm:$0xff]   ;;  %v8329_v8 = vld [vmem:[%s12699_s2 + $0x320] ss:$16 sps:$4 sm:$0xff]  }
  0x20   :  { %5020 = vmatpush1.bf16.msra.mxu1 %v8287_v31  ;;  %4980 = vmatprep.subr.bf16.mxu0 %v8288_v32  ;;  %v9824_v0 = vcombine.high %v9811_v60, %v9811_v60  ;;  %v8330_v9 = vld [vmem:[%s12699_s2 + $0x104] ss:$16 sps:$4 sm:$0xff]   ;;  %v8334_v12 = vld [vmem:[%s12699_s2 + $0x100] ss:$16 sps:$4 sm:$0xff]   ;;  %v9873_v17 = vrot.slane %v871_v11, %v9783_v49 }
  0x21   :  { %5021 = vmatprep.subr.bf16.mxu1 %v8290_v33  ;;  %4996 = vmatprep.mubr.bf16.mxu0 %v9811_v60  ;;  %v8332_v10 = vld [vmem:[%s12699_s2 + $0x304] ss:$16 sps:$4 sm:$0xff]   ;;  %v8335_v14 = vld [vmem:[%s12699_s2 + $0x300] ss:$16 sps:$4 sm:$0xff]  }
  0x22   :  { %5037 = vmatprep.mubr.bf16.mxu1 %v9824_v0  ;;  %v8338_v15 = vld [vmem:[%s12699_s2 + $0x4e4] ss:$16 sps:$4 sm:$0xff]   ;;  %v8336_v18 = vld [vmem:[%s12699_s2 + $0x4e0] ss:$16 sps:$4 sm:$0xff]   ;;  %v9893_v23 = vcombine.high %v9873_v17, %v9873_v17 }
  0x23   :  { %4981 = vmatpush2.bf16.msra.mxu0 %v8292_v34  ;;  %v8341_v16 = vld [vmem:[%s12699_s2 + $0x6e4] ss:$16 sps:$4 sm:$0xff]   ;;  %v8339_v20 = vld [vmem:[%s12699_s2 + $0x6e0] ss:$16 sps:$4 sm:$0xff]  }
  0x24   :  { %5022 = vmatpush2.bf16.msra.mxu1 %v8293_v35  ;;  %4982 = vmatprep.subr.bf16.mxu0 %v8294_v39  ;;  %v8344_v21 = vld [vmem:[%s12699_s2 + $0x4c4] ss:$16 sps:$4 sm:$0xff]   ;;  %v8342_v24 = vld [vmem:[%s12699_s2 + $0x4c0] ss:$16 sps:$4 sm:$0xff]  }
  0x25   :  { %5023 = vmatprep.subr.bf16.mxu1 %v8296_v40  ;;  %v8347_v22 = vld [vmem:[%s12699_s2 + $0x6c4] ss:$16 sps:$4 sm:$0xff]   ;;  %v8345_v25 = vld [vmem:[%s12699_s2 + $0x6c0] ss:$16 sps:$4 sm:$0xff]  }
  0x26   :  { %v8350_v26 = vld [vmem:[%s12699_s2 + $0x4a4] ss:$16 sps:$4 sm:$0xff]   ;;  %v8348_v28 = vld [vmem:[%s12699_s2 + $0x4a0] ss:$16 sps:$4 sm:$0xff]  }
  0x27   :  { %4983 = vmatpush2.bf16.msra.mxu0 %v8298_v41  ;;  %v8353_v27 = vld [vmem:[%s12699_s2 + $0x6a4] ss:$16 sps:$4 sm:$0xff]   ;;  %v8351_v29 = vld [vmem:[%s12699_s2 + $0x6a0] ss:$16 sps:$4 sm:$0xff]  }
  0x28   :  { %5024 = vmatpush2.bf16.msra.mxu1 %v8299_v44  ;;  %4984 = vmatprep.subr.bf16.mxu0 %v8300_v45  ;;  %v8356_v30 = vld [vmem:[%s12699_s2 + $0x484] ss:$16 sps:$4 sm:$0xff]   ;;  %v8354_v32 = vld [vmem:[%s12699_s2 + $0x480] ss:$16 sps:$4 sm:$0xff]  }
  0x29   :  { %5025 = vmatprep.subr.bf16.mxu1 %v8302_v46  ;;  %v8359_v31 = vld [vmem:[%s12699_s2 + $0x684] ss:$16 sps:$4 sm:$0xff]   ;;  %v8357_v33 = vld [vmem:[%s12699_s2 + $0x680] ss:$16 sps:$4 sm:$0xff]  }
  0x2a   :  { %v8362_v34 = vld [vmem:[%s12699_s2 + $0x464] ss:$16 sps:$4 sm:$0xff]   ;;  %v8360_v36 = vld [vmem:[%s12699_s2 + $0x460] ss:$16 sps:$4 sm:$0xff]  }
  0x2b   :  { %4985 = vmatpush2.bf16.msra.mxu0 %v8304_v47  ;;  %v8365_v35 = vld [vmem:[%s12699_s2 + $0x664] ss:$16 sps:$4 sm:$0xff]   ;;  %v8363_v37 = vld [vmem:[%s12699_s2 + $0x660] ss:$16 sps:$4 sm:$0xff]  }
  0x2c   :  { %5026 = vmatpush2.bf16.msra.mxu1 %v8305_v48  ;;  %4986 = vmatprep.subr.bf16.mxu0 %v8306_v50  ;;  %v8368_v38 = vld [vmem:[%s12699_s2 + $0x444] ss:$16 sps:$4 sm:$0xff]   ;;  %v8366_v40 = vld [vmem:[%s12699_s2 + $0x440] ss:$16 sps:$4 sm:$0xff]  }
  0x2d   :  { %5027 = vmatprep.subr.bf16.mxu1 %v8308_v51  ;;  %v8371_v39 = vld [vmem:[%s12699_s2 + $0x644] ss:$16 sps:$4 sm:$0xff]   ;;  %v8369_v41 = vld [vmem:[%s12699_s2 + $0x640] ss:$16 sps:$4 sm:$0xff]  }
  0x2e   :  { %v8374_v43 = vld [vmem:[%s12699_s2 + $0x424] ss:$16 sps:$4 sm:$0xff]   ;;  %v8372_v45 = vld [vmem:[%s12699_s2 + $0x420] ss:$16 sps:$4 sm:$0xff]  }
  0x2f   :  { %4987 = vmatpush2.bf16.msra.mxu0 %v8310_v53  ;;  %v8377_v44 = vld [vmem:[%s12699_s2 + $0x624] ss:$16 sps:$4 sm:$0xff]   ;;  %v8375_v46 = vld [vmem:[%s12699_s2 + $0x620] ss:$16 sps:$4 sm:$0xff]  }
  0x30   :  { %5028 = vmatpush2.bf16.msra.mxu1 %v8311_v55  ;;  %4988 = vmatprep.subr.bf16.mxu0 %v8312_v56  ;;  %v8380_v47 = vld [vmem:[%s12699_s2 + $0x404] ss:$16 sps:$4 sm:$0xff]   ;;  %v8378_v50 = vld [vmem:[%s12699_s2 + $0x400] ss:$16 sps:$4 sm:$0xff]  }
  0x31   :  { %5029 = vmatprep.subr.bf16.mxu1 %v8314_v57  ;;  %v8383_v48 = vld [vmem:[%s12699_s2 + $0x604] ss:$16 sps:$4 sm:$0xff]   ;;  %v8381_v51 = vld [vmem:[%s12699_s2 + $0x600] ss:$16 sps:$4 sm:$0xff]  }
  0x32   :  { %v8386_v52 = vld [vmem:[%s12699_s2 + $0x5e4] ss:$16 sps:$4 sm:$0xff]   ;;  %v8384_v54 = vld [vmem:[%s12699_s2 + $0x5e0] ss:$16 sps:$4 sm:$0xff]  }
  0x33   :  { %4989 = vmatpush2.bf16.msra.mxu0 %v8316_v59  ;;  %v8389_v53 = vld [vmem:[%s12699_s2 + $0x7e4] ss:$16 sps:$4 sm:$0xff]   ;;  %v8387_v55 = vld [vmem:[%s12699_s2 + $0x7e0] ss:$16 sps:$4 sm:$0xff]  }
  0x34   :  { %5030 = vmatpush2.bf16.msra.mxu1 %v8317_v61  ;;  %4990 = vmatprep.subr.bf16.mxu0 %v8318_v62  ;;  %v8392_v56 = vld [vmem:[%s12699_s2 + $0x5c4] ss:$16 sps:$4 sm:$0xff]   ;;  %v8390_v58 = vld [vmem:[%s12699_s2 + $0x5c0] ss:$16 sps:$4 sm:$0xff]  }
  0x35   :  { %5031 = vmatprep.subr.bf16.mxu1 %v8320_v63  ;;  %v8395_v57 = vld [vmem:[%s12699_s2 + $0x7c4] ss:$16 sps:$4 sm:$0xff]   ;;  %v8393_v59 = vld [vmem:[%s12699_s2 + $0x7c0] ss:$16 sps:$4 sm:$0xff]  }
  0x36   :  { %v8398_v61 = vld [vmem:[%s12699_s2 + $0x5a4] ss:$16 sps:$4 sm:$0xff]   ;;  %v8396_v63 = vld [vmem:[%s12699_s2 + $0x5a0] ss:$16 sps:$4 sm:$0xff]  }
  0x37   :  { %4991 = vmatpush2.bf16.msra.mxu0 %v8322_v2  ;;  %v8401_v62 = vld [vmem:[%s12699_s2 + $0x7a4] ss:$16 sps:$4 sm:$0xff]   ;;  %v8399_v1 = vld [vmem:[%s12699_s2 + $0x7a0] ss:$16 sps:$4 sm:$0xff]  }
  0x38   :  { %5032 = vmatpush2.bf16.msra.mxu1 %v8323_v3  ;;  %4992 = vmatprep.subr.bf16.mxu0 %v8324_v4  ;;  %v8404_v2 = vld [vmem:[%s12699_s2 + $0x584] ss:$16 sps:$4 sm:$0xff]   ;;  %v8402_v4 = vld [vmem:[%s12699_s2 + $0x580] ss:$16 sps:$4 sm:$0xff]  }
  0x39   :  { %5033 = vmatprep.subr.bf16.mxu1 %v8326_v5  ;;  %v8407_v3 = vld [vmem:[%s12699_s2 + $0x784] ss:$16 sps:$4 sm:$0xff]   ;;  %v8405_v5 = vld [vmem:[%s12699_s2 + $0x780] ss:$16 sps:$4 sm:$0xff]  }
  0x3a   :  { %v8416_v11 = vld [vmem:[%s12699_s2 + $0x544] ss:$16 sps:$4 sm:$0xff]  }
  0x3b   :  { %4993 = vmatpush2.bf16.msra.mxu0 %v8328_v7  ;;  %v8410_v7 = vld [vmem:[%s12699_s2 + $0x564] ss:$16 sps:$4 sm:$0xff]  }
  0x3c   :  { %5034 = vmatpush2.bf16.msra.mxu1 %v8329_v8  ;;  %4994 = vmatprep.subr.bf16.mxu0 %v8330_v9  ;;  %v8413_v8 = vld [vmem:[%s12699_s2 + $0x764] ss:$16 sps:$4 sm:$0xff]   ;;  %v8408_v9 = vld [vmem:[%s12699_s2 + $0x560] ss:$16 sps:$4 sm:$0xff]  }
  0x3d   :  { %5035 = vmatprep.subr.bf16.mxu1 %v8332_v10  ;;  %v8411_v10 = vld [vmem:[%s12699_s2 + $0x760] ss:$16 sps:$4 sm:$0xff]  }
  0x3f   :  { %4995 = vmatpush2.bf16.msra.mxu0 %v8334_v12  ;;  %v8419_v12 = vld [vmem:[%s12699_s2 + $0x744] ss:$16 sps:$4 sm:$0xff]  }
  0x40   :  { %5036 = vmatpush2.bf16.msra.mxu1 %v8335_v14  ;;  %5046 = vmatprep.subr.bf16.mxu0 %v8338_v15  ;;  %v8414_v14 = vld [vmem:[%s12699_s2 + $0x540] ss:$16 sps:$4 sm:$0xff]  }
  0x41   :  { %5087 = vmatprep.subr.bf16.mxu1 %v8341_v16  ;;  %v8417_v15 = vld [vmem:[%s12699_s2 + $0x740] ss:$16 sps:$4 sm:$0xff]   ;;  %v8422_v16 = vld [vmem:[%s12699_s2 + $0x524] ss:$16 sps:$4 sm:$0xff]  }
  0x42   :  { %4997 = vmatmul.mubr.bf16.vlgmr.msra.gmra.mxu0 %v9861_v13 }
  0x43   :  { %5038 = vmatmul.mubr.bf16.vlgmr.msra.gmra.mxu1 %v9880_v19  ;;  %5047 = vmatpush1.bf16.msra.mxu0 %v8336_v18  ;;  %v8425_v18 = vld [vmem:[%s12699_s2 + $0x724] ss:$16 sps:$4 sm:$0xff]  }
  0x44   :  { %5088 = vmatpush1.bf16.msra.mxu1 %v8339_v20  ;;  %5048 = vmatprep.subr.bf16.mxu0 %v8344_v21  ;;  %v8420_v20 = vld [vmem:[%s12699_s2 + $0x520] ss:$16 sps:$4 sm:$0xff]  }
  0x45   :  { %5089 = vmatprep.subr.bf16.mxu1 %v8347_v22  ;;  %5078 = vmatprep.mubr.bf16.mxu0 %v9873_v17  ;;  %v8423_v21 = vld [vmem:[%s12699_s2 + $0x720] ss:$16 sps:$4 sm:$0xff]   ;;  %v8428_v22 = vld [vmem:[%s12699_s2 + $0x504] ss:$16 sps:$4 sm:$0xff]  }
  0x46   :  { %5119 = vmatprep.mubr.bf16.mxu1 %v9893_v23 }
  0x47   :  { %5049 = vmatpush1.bf16.msra.mxu0 %v8342_v24  ;;  %v8431_v24 = vld [vmem:[%s12699_s2 + $0x704] ss:$16 sps:$4 sm:$0xff]  }
  0x48   :  { %5090 = vmatpush1.bf16.msra.mxu1 %v8345_v25  ;;  %5050 = vmatprep.subr.bf16.mxu0 %v8350_v26  ;;  %v8426_v25 = vld [vmem:[%s12699_s2 + $0x500] ss:$16 sps:$4 sm:$0xff]   ;;  %v10072_v26 = vrot.slane %v9841_v6, %v9783_v49 }
  0x49   :  { %5091 = vmatprep.subr.bf16.mxu1 %v8353_v27  ;;  %v8429_v27 = vld [vmem:[%s12699_s2 + $0x700] ss:$16 sps:$4 sm:$0xff]  }
  0x4a   :  { %v8433_v6 = vld [vmem:[%s12699_s2 + $0x8e0] ss:$16 sps:$4 sm:$0xff]  }
  0x4b   :  { %5051 = vmatpush1.bf16.msra.mxu0 %v8348_v28  ;;  %v8435_v28 = vld [vmem:[%s12699_s2 + $0x8e4] ss:$16 sps:$4 sm:$0xff]  }
  0x4c   :  { %5092 = vmatpush1.bf16.msra.mxu1 %v8351_v29  ;;  %5052 = vmatprep.subr.bf16.mxu0 %v8356_v30  ;;  %v8438_v29 = vld [vmem:[%s12699_s2 + $0xae4] ss:$16 sps:$4 sm:$0xff]   ;;  %v10088_v30 = vcombine.high %v10072_v26, %v10072_v26 }
  0x4d   :  { %5093 = vmatprep.subr.bf16.mxu1 %v8359_v31  ;;  %v8436_v31 = vld [vmem:[%s12699_s2 + $0xae0] ss:$16 sps:$4 sm:$0xff]  }
  0x4f   :  { %5053 = vmatpush1.bf16.msra.mxu0 %v8354_v32  ;;  %v10096_v32 = vld [vmem:[%s12700_s0 + $0x8] sm:$0xff] }
  0x50   :  { %5094 = vmatpush1.bf16.msra.mxu1 %v8357_v33  ;;  %5054 = vmatprep.subr.bf16.mxu0 %v8362_v34  ;;  %v8441_v33 = vld [vmem:[%s12699_s2 + $0x8c4] ss:$16 sps:$4 sm:$0xff]  }
  0x51   :  { %5095 = vmatprep.subr.bf16.mxu1 %v8365_v35  ;;  %v8444_v34 = vld [vmem:[%s12699_s2 + $0xac4] ss:$16 sps:$4 sm:$0xff]   ;;  %v10106_v35 = vrot.slane %v10096_v32, %v9783_v49 }
  0x53   :  { %5055 = vmatpush1.bf16.msra.mxu0 %v8360_v36  ;;  %v919_v36 = vcombine.high %v10106_v35, %v10106_v35 }
  0x54   :  { %5096 = vmatpush1.bf16.msra.mxu1 %v8363_v37  ;;  %5056 = vmatprep.subr.bf16.mxu0 %v8368_v38  ;;  %v8439_v37 = vld [vmem:[%s12699_s2 + $0x8c0] ss:$16 sps:$4 sm:$0xff]  }
  0x55   :  { %5097 = vmatprep.subr.bf16.mxu1 %v8371_v39  ;;  %v8442_v38 = vld [vmem:[%s12699_s2 + $0xac0] ss:$16 sps:$4 sm:$0xff]   ;;  %v8447_v39 = vld [vmem:[%s12699_s2 + $0x8a4] ss:$16 sps:$4 sm:$0xff]  }
  0x57   :  { %5057 = vmatpush1.bf16.msra.mxu0 %v8366_v40  ;;  %v8450_v40 = vld [vmem:[%s12699_s2 + $0xaa4] ss:$16 sps:$4 sm:$0xff]  }
  0x58   :  { %5098 = vmatpush1.bf16.msra.mxu1 %v8369_v41  ;;  %5058 = vmatprep.subr.bf16.mxu0 %v8374_v43  ;;  %v10125_v41 = vrot.slane %v919_v36, %v9783_v49  ;;  %v8511_v36 = vld [vmem:[%s12699_s2 + $0x940] ss:$16 sps:$4 sm:$0xff]  }
  0x59   :  { %5099 = vmatprep.subr.bf16.mxu1 %v8377_v44  ;;  %v8445_v44 = vld [vmem:[%s12699_s2 + $0x8a0] ss:$16 sps:$4 sm:$0xff]  }
  0x5a   :  { %v10130_v43 = vcombine.high %v10125_v41, %v10125_v41 }
  0x5b   :  { %5059 = vmatpush1.bf16.msra.mxu0 %v8372_v45  ;;  %v8448_v45 = vld [vmem:[%s12699_s2 + $0xaa0] ss:$16 sps:$4 sm:$0xff]  }
  0x5c   :  { %5100 = vmatpush1.bf16.msra.mxu1 %v8375_v46  ;;  %5060 = vmatprep.subr.bf16.mxu0 %v8380_v47  ;;  %v8453_v46 = vld [vmem:[%s12699_s2 + $0x884] ss:$16 sps:$4 sm:$0xff]  }
  0x5d   :  { %5101 = vmatprep.subr.bf16.mxu1 %v8383_v48  ;;  %v8456_v47 = vld [vmem:[%s12699_s2 + $0xa84] ss:$16 sps:$4 sm:$0xff]   ;;  %v8451_v48 = vld [vmem:[%s12699_s2 + $0x880] ss:$16 sps:$4 sm:$0xff]  }
  0x5f   :  { %5061 = vmatpush1.bf16.msra.mxu0 %v8378_v50  ;;  %v8454_v50 = vld [vmem:[%s12699_s2 + $0xa80] ss:$16 sps:$4 sm:$0xff]  }
  0x60   :  { %5102 = vmatpush1.bf16.msra.mxu1 %v8381_v51  ;;  %5062 = vmatprep.subr.bf16.mxu0 %v8386_v52  ;;  %v8459_v51 = vld [vmem:[%s12699_s2 + $0x864] ss:$16 sps:$4 sm:$0xff]  }
  0x61   :  { %5103 = vmatprep.subr.bf16.mxu1 %v8389_v53  ;;  %v8462_v52 = vld [vmem:[%s12699_s2 + $0xa64] ss:$16 sps:$4 sm:$0xff]   ;;  %v8457_v53 = vld [vmem:[%s12699_s2 + $0x860] ss:$16 sps:$4 sm:$0xff]  }
  0x63   :  { %5063 = vmatpush2.bf16.msra.mxu0 %v8384_v54  ;;  %v8460_v54 = vld [vmem:[%s12699_s2 + $0xa60] ss:$16 sps:$4 sm:$0xff]  }
  0x64   :  { %5104 = vmatpush2.bf16.msra.mxu1 %v8387_v55  ;;  %5064 = vmatprep.subr.bf16.mxu0 %v8392_v56  ;;  %v8465_v55 = vld [vmem:[%s12699_s2 + $0x844] ss:$16 sps:$4 sm:$0xff]  }
  0x65   :  { %5105 = vmatprep.subr.bf16.mxu1 %v8395_v57  ;;  %v8468_v56 = vld [vmem:[%s12699_s2 + $0xa44] ss:$16 sps:$4 sm:$0xff]   ;;  %v8463_v57 = vld [vmem:[%s12699_s2 + $0x840] ss:$16 sps:$4 sm:$0xff]  }
  0x67   :  { %5065 = vmatpush2.bf16.msra.mxu0 %v8390_v58  ;;  %v8466_v58 = vld [vmem:[%s12699_s2 + $0xa40] ss:$16 sps:$4 sm:$0xff]  }
  0x68   :  { %5106 = vmatpush2.bf16.msra.mxu1 %v8393_v59  ;;  %5066 = vmatprep.subr.bf16.mxu0 %v8398_v61  ;;  %v8471_v59 = vld [vmem:[%s12699_s2 + $0x824] ss:$16 sps:$4 sm:$0xff]  }
  0x69   :  { %5107 = vmatprep.subr.bf16.mxu1 %v8401_v62  ;;  %v8474_v61 = vld [vmem:[%s12699_s2 + $0xa24] ss:$16 sps:$4 sm:$0xff]   ;;  %v8469_v62 = vld [vmem:[%s12699_s2 + $0x820] ss:$16 sps:$4 sm:$0xff]  }
  0x6b   :  { %5067 = vmatpush2.bf16.msra.mxu0 %v8396_v63  ;;  %v8472_v63 = vld [vmem:[%s12699_s2 + $0xa20] ss:$16 sps:$4 sm:$0xff]  }
  0x6c   :  { %5108 = vmatpush2.bf16.msra.mxu1 %v8399_v1  ;;  %5068 = vmatprep.subr.bf16.mxu0 %v8404_v2  ;;  %v8477_v1 = vld [vmem:[%s12699_s2 + $0x804] ss:$16 sps:$4 sm:$0xff]  }
  0x6d   :  { %5109 = vmatprep.subr.bf16.mxu1 %v8407_v3  ;;  %v8480_v2 = vld [vmem:[%s12699_s2 + $0xa04] ss:$16 sps:$4 sm:$0xff]   ;;  %v8475_v3 = vld [vmem:[%s12699_s2 + $0x800] ss:$16 sps:$4 sm:$0xff]  }
  0x6f   :  { %5069 = vmatpush2.bf16.msra.mxu0 %v8402_v4  ;;  %v8478_v4 = vld [vmem:[%s12699_s2 + $0xa00] ss:$16 sps:$4 sm:$0xff]  }
  0x70   :  { %5110 = vmatpush2.bf16.msra.mxu1 %v8405_v5  ;;  %5070 = vmatprep.subr.bf16.mxu0 %v8410_v7  ;;  %v8483_v5 = vld [vmem:[%s12699_s2 + $0x9e4] ss:$16 sps:$4 sm:$0xff]  }
  0x71   :  { %5111 = vmatprep.subr.bf16.mxu1 %v8413_v8  ;;  %v8486_v7 = vld [vmem:[%s12699_s2 + $0xbe4] ss:$16 sps:$4 sm:$0xff]   ;;  %v8481_v8 = vld [vmem:[%s12699_s2 + $0x9e0] ss:$16 sps:$4 sm:$0xff]  }
  0x73   :  { %5071 = vmatpush2.bf16.msra.mxu0 %v8408_v9  ;;  %v8484_v9 = vld [vmem:[%s12699_s2 + $0xbe0] ss:$16 sps:$4 sm:$0xff]  }
  0x74   :  { %5112 = vmatpush2.bf16.msra.mxu1 %v8411_v10  ;;  %5072 = vmatprep.subr.bf16.mxu0 %v8416_v11  ;;  %v8489_v10 = vld [vmem:[%s12699_s2 + $0x9c4] ss:$16 sps:$4 sm:$0xff]  }
  0x75   :  { %5113 = vmatprep.subr.bf16.mxu1 %v8419_v12  ;;  %v8492_v11 = vld [vmem:[%s12699_s2 + $0xbc4] ss:$16 sps:$4 sm:$0xff]   ;;  %v8487_v12 = vld [vmem:[%s12699_s2 + $0x9c0] ss:$16 sps:$4 sm:$0xff]  }
  0x77   :  { %5073 = vmatpush2.bf16.msra.mxu0 %v8414_v14  ;;  %v8490_v14 = vld [vmem:[%s12699_s2 + $0xbc0] ss:$16 sps:$4 sm:$0xff]  }
  0x78   :  { %5114 = vmatpush2.bf16.msra.mxu1 %v8417_v15  ;;  %5074 = vmatprep.subr.bf16.mxu0 %v8422_v16  ;;  %v8495_v15 = vld [vmem:[%s12699_s2 + $0x9a4] ss:$16 sps:$4 sm:$0xff]  }
  0x79   :  { %5115 = vmatprep.subr.bf16.mxu1 %v8425_v18  ;;  %v8498_v16 = vld [vmem:[%s12699_s2 + $0xba4] ss:$16 sps:$4 sm:$0xff]   ;;  %v8493_v18 = vld [vmem:[%s12699_s2 + $0x9a0] ss:$16 sps:$4 sm:$0xff]  }
  0x7b   :  { %5075 = vmatpush2.bf16.msra.mxu0 %v8420_v20  ;;  %v8496_v20 = vld [vmem:[%s12699_s2 + $0xba0] ss:$16 sps:$4 sm:$0xff]  }
  0x7c   :  { %5116 = vmatpush2.bf16.msra.mxu1 %v8423_v21  ;;  %5076 = vmatprep.subr.bf16.mxu0 %v8428_v22  ;;  %v8501_v21 = vld [vmem:[%s12699_s2 + $0x984] ss:$16 sps:$4 sm:$0xff]  }
  0x7d   :  { %5117 = vmatprep.subr.bf16.mxu1 %v8431_v24  ;;  %v8504_v22 = vld [vmem:[%s12699_s2 + $0xb84] ss:$16 sps:$4 sm:$0xff]   ;;  %v8499_v24 = vld [vmem:[%s12699_s2 + $0x980] ss:$16 sps:$4 sm:$0xff]  }
  0x7f   :  { %5077 = vmatpush2.bf16.msra.mxu0 %v8426_v25  ;;  %v8502_v25 = vld [vmem:[%s12699_s2 + $0xb80] ss:$16 sps:$4 sm:$0xff]  }
  0x80   :  { %5118 = vmatpush2.bf16.msra.mxu1 %v8429_v27  ;;  %5128 = vmatprep.subr.bf16.mxu0 %v8435_v28  ;;  %v8507_v27 = vld [vmem:[%s12699_s2 + $0x964] ss:$16 sps:$4 sm:$0xff]  }
  0x81   :  { %5169 = vmatprep.subr.bf16.mxu1 %v8438_v29  ;;  %v8510_v28 = vld [vmem:[%s12699_s2 + $0xb64] ss:$16 sps:$4 sm:$0xff]   ;;  %v8505_v29 = vld [vmem:[%s12699_s2 + $0x960] ss:$16 sps:$4 sm:$0xff]  }
  0x82   :  { %5079 = vmatmul.mubr.bf16.vlgmr.msra.gmra.mxu0 %v10072_v26 }
  0x83   :  { %5120 = vmatmul.mubr.bf16.vlgmr.msra.gmra.mxu1 %v10088_v30  ;;  %5129 = vmatpush1.bf16.msra.mxu0 %v8433_v6  ;;  %v8508_v6 = vld [vmem:[%s12699_s2 + $0xb60] ss:$16 sps:$4 sm:$0xff]  }
  0x84   :  { %5170 = vmatpush1.bf16.msra.mxu1 %v8436_v31  ;;  %5130 = vmatprep.subr.bf16.mxu0 %v8441_v33  ;;  %v8513_v31 = vld [vmem:[%s12699_s2 + $0x944] ss:$16 sps:$4 sm:$0xff]  }
  0x85   :  { %5171 = vmatprep.subr.bf16.mxu1 %v8444_v34  ;;  %5160 = vmatprep.mubr.bf16.mxu0 %v10125_v41  ;;  %v8516_v33 = vld [vmem:[%s12699_s2 + $0xb44] ss:$16 sps:$4 sm:$0xff]   ;;  %v904_v34 = vcombine.high %v10096_v32, %v10096_v32 }
  0x86   :  { %5201 = vmatprep.mubr.bf16.mxu1 %v10130_v43  ;;  %v8522_v32 = vld [vmem:[%s12699_s2 + $0xb24] ss:$16 sps:$4 sm:$0xff]  }
  0x87   :  { %5131 = vmatpush1.bf16.msra.mxu0 %v8439_v37  ;;  %v8514_v37 = vld [vmem:[%s12699_s2 + $0xb40] ss:$16 sps:$4 sm:$0xff]  }
  0x88   :  { %5172 = vmatpush1.bf16.msra.mxu1 %v8442_v38  ;;  %5132 = vmatprep.subr.bf16.mxu0 %v8447_v39  ;;  %v8519_v38 = vld [vmem:[%s12699_s2 + $0x924] ss:$16 sps:$4 sm:$0xff]   ;;  %v10280_v39 = vrot.slane %v904_v34, %v9783_v49  ;;  %v8580_v34 = vld [vmem:[%s12699_s2 + $0xfe0] ss:$16 sps:$4 sm:$0xff]  }
  0x89   :  { %5173 = vmatprep.subr.bf16.mxu1 %v8450_v40  ;;  %v8517_v40 = vld [vmem:[%s12699_s2 + $0x920] ss:$16 sps:$4 sm:$0xff]  }
  0x8b   :  { %5133 = vmatpush1.bf16.msra.mxu0 %v8445_v44  ;;  %v8520_v44 = vld [vmem:[%s12699_s2 + $0xb20] ss:$16 sps:$4 sm:$0xff]  }
  0x8c   :  { %5174 = vmatpush1.bf16.msra.mxu1 %v8448_v45  ;;  %5134 = vmatprep.subr.bf16.mxu0 %v8453_v46  ;;  %v8525_v45 = vld [vmem:[%s12699_s2 + $0x904] ss:$16 sps:$4 sm:$0xff]  }
  0x8d   :  { %5175 = vmatprep.subr.bf16.mxu1 %v8456_v47  ;;  %v8528_v46 = vld [vmem:[%s12699_s2 + $0xb04] ss:$16 sps:$4 sm:$0xff]   ;;  %v920_v47 = vcombine.high %v10280_v39, %v10280_v39 }
  0x8f   :  { %5135 = vmatpush1.bf16.msra.mxu0 %v8451_v48  ;;  %v8523_v48 = vld [vmem:[%s12699_s2 + $0x900] ss:$16 sps:$4 sm:$0xff]  }
  0x90   :  { %5176 = vmatpush1.bf16.msra.mxu1 %v8454_v50  ;;  %5136 = vmatprep.subr.bf16.mxu0 %v8459_v51  ;;  %v10301_v50 = vrot.slane %v10106_v35, %v9783_v49  ;;  %v8526_v51 = vld [vmem:[%s12699_s2 + $0xb00] ss:$16 sps:$4 sm:$0xff]  }
  0x91   :  { %5177 = vmatprep.subr.bf16.mxu1 %v8462_v52  ;;  %v8531_v52 = vld [vmem:[%s12699_s2 + $0xce4] ss:$16 sps:$4 sm:$0xff]   ;;  %v8529_v35 = vld [vmem:[%s12699_s2 + $0xce0] ss:$16 sps:$4 sm:$0xff]  }
  0x93   :  { %5137 = vmatpush1.bf16.msra.mxu0 %v8457_v53  ;;  %v8534_v53 = vld [vmem:[%s12699_s2 + $0xee4] ss:$16 sps:$4 sm:$0xff]  }
  0x94   :  { %5178 = vmatpush1.bf16.msra.mxu1 %v8460_v54  ;;  %5138 = vmatprep.subr.bf16.mxu0 %v8465_v55  ;;  %v10313_v54 = vrot.slane %v920_v47, %v9783_v49  ;;  %v10320_v55 = vcombine.high %v10301_v50, %v10301_v50  ;;  %v8597_v47 = vld [vmem:[%s12699_s2 + $0xd84] ss:$16 sps:$4 sm:$0xff]  }
  0x95   :  { %5179 = vmatprep.subr.bf16.mxu1 %v8468_v56  ;;  %v8532_v56 = vld [vmem:[%s12699_s2 + $0xee0] ss:$16 sps:$4 sm:$0xff]  }
  0x97   :  { %5139 = vmatpush1.bf16.msra.mxu0 %v8463_v57  ;;  %v8537_v57 = vld [vmem:[%s12699_s2 + $0xcc4] ss:$16 sps:$4 sm:$0xff]  }
  0x98   :  { %5180 = vmatpush1.bf16.msra.mxu1 %v8466_v58  ;;  %5140 = vmatprep.subr.bf16.mxu0 %v8471_v59  ;;  %v8540_v58 = vld [vmem:[%s12699_s2 + $0xec4] ss:$16 sps:$4 sm:$0xff]   ;;  %v10333_v59 = vcombine.high %v10313_v54, %v10313_v54 }
  0x99   :  { %5181 = vmatprep.subr.bf16.mxu1 %v8474_v61  ;;  %v8535_v61 = vld [vmem:[%s12699_s2 + $0xcc0] ss:$16 sps:$4 sm:$0xff]  }
  0x9b   :  { %5141 = vmatpush1.bf16.msra.mxu0 %v8469_v62  ;;  %v8538_v62 = vld [vmem:[%s12699_s2 + $0xec0] ss:$16 sps:$4 sm:$0xff]  }
  0x9c   :  { %5182 = vmatpush1.bf16.msra.mxu1 %v8472_v63  ;;  %5142 = vmatprep.subr.bf16.mxu0 %v8477_v1  ;;  %v8543_v63 = vld [vmem:[%s12699_s2 + $0xca4] ss:$16 sps:$4 sm:$0xff]  }
  0x9d   :  { %5183 = vmatprep.subr.bf16.mxu1 %v8480_v2  ;;  %v8546_v1 = vld [vmem:[%s12699_s2 + $0xea4] ss:$16 sps:$4 sm:$0xff]   ;;  %v8541_v2 = vld [vmem:[%s12699_s2 + $0xca0] ss:$16 sps:$4 sm:$0xff]  }
  0x9f   :  { %5143 = vmatpush1.bf16.msra.mxu0 %v8475_v3  ;;  %v8544_v3 = vld [vmem:[%s12699_s2 + $0xea0] ss:$16 sps:$4 sm:$0xff]  }
  0xa0   :  { %5184 = vmatpush1.bf16.msra.mxu1 %v8478_v4  ;;  %5144 = vmatprep.subr.bf16.mxu0 %v8483_v5  ;;  %v8549_v4 = vld [vmem:[%s12699_s2 + $0xc84] ss:$16 sps:$4 sm:$0xff]  }
  0xa1   :  { %5185 = vmatprep.subr.bf16.mxu1 %v8486_v7  ;;  %v8552_v5 = vld [vmem:[%s12699_s2 + $0xe84] ss:$16 sps:$4 sm:$0xff]   ;;  %v8547_v7 = vld [vmem:[%s12699_s2 + $0xc80] ss:$16 sps:$4 sm:$0xff]  }
  0xa3   :  { %5145 = vmatpush2.bf16.msra.mxu0 %v8481_v8  ;;  %v8550_v8 = vld [vmem:[%s12699_s2 + $0xe80] ss:$16 sps:$4 sm:$0xff]  }
  0xa4   :  { %5186 = vmatpush2.bf16.msra.mxu1 %v8484_v9  ;;  %5146 = vmatprep.subr.bf16.mxu0 %v8489_v10  ;;  %v8555_v9 = vld [vmem:[%s12699_s2 + $0xc64] ss:$16 sps:$4 sm:$0xff]  }
  0xa5   :  { %5187 = vmatprep.subr.bf16.mxu1 %v8492_v11  ;;  %v8558_v10 = vld [vmem:[%s12699_s2 + $0xe64] ss:$16 sps:$4 sm:$0xff]   ;;  %v8553_v11 = vld [vmem:[%s12699_s2 + $0xc60] ss:$16 sps:$4 sm:$0xff]  }
  0xa7   :  { %5147 = vmatpush2.bf16.msra.mxu0 %v8487_v12  ;;  %v8556_v12 = vld [vmem:[%s12699_s2 + $0xe60] ss:$16 sps:$4 sm:$0xff]  }
  0xa8   :  { %5188 = vmatpush2.bf16.msra.mxu1 %v8490_v14  ;;  %5148 = vmatprep.subr.bf16.mxu0 %v8495_v15  ;;  %v8561_v14 = vld [vmem:[%s12699_s2 + $0xc44] ss:$16 sps:$4 sm:$0xff]  }
  0xa9   :  { %5189 = vmatprep.subr.bf16.mxu1 %v8498_v16  ;;  %v8564_v15 = vld [vmem:[%s12699_s2 + $0xe44] ss:$16 sps:$4 sm:$0xff]   ;;  %v8559_v16 = vld [vmem:[%s12699_s2 + $0xc40] ss:$16 sps:$4 sm:$0xff]  }
  0xab   :  { %5149 = vmatpush2.bf16.msra.mxu0 %v8493_v18  ;;  %v8562_v18 = vld [vmem:[%s12699_s2 + $0xe40] ss:$16 sps:$4 sm:$0xff]  }
  0xac   :  { %5190 = vmatpush2.bf16.msra.mxu1 %v8496_v20  ;;  %5150 = vmatprep.subr.bf16.mxu0 %v8501_v21  ;;  %v8567_v20 = vld [vmem:[%s12699_s2 + $0xc24] ss:$16 sps:$4 sm:$0xff]  }
  0xad   :  { %5191 = vmatprep.subr.bf16.mxu1 %v8504_v22  ;;  %v8570_v21 = vld [vmem:[%s12699_s2 + $0xe24] ss:$16 sps:$4 sm:$0xff]   ;;  %v8565_v22 = vld [vmem:[%s12699_s2 + $0xc20] ss:$16 sps:$4 sm:$0xff]  }
  0xaf   :  { %5151 = vmatpush2.bf16.msra.mxu0 %v8499_v24  ;;  %v8568_v24 = vld [vmem:[%s12699_s2 + $0xe20] ss:$16 sps:$4 sm:$0xff]  }
  0xb0   :  { %5192 = vmatpush2.bf16.msra.mxu1 %v8502_v25  ;;  %5152 = vmatprep.subr.bf16.mxu0 %v8507_v27  ;;  %v8573_v25 = vld [vmem:[%s12699_s2 + $0xc04] ss:$16 sps:$4 sm:$0xff]  }
  0xb1   :  { %5193 = vmatprep.subr.bf16.mxu1 %v8510_v28  ;;  %v8576_v27 = vld [vmem:[%s12699_s2 + $0xe04] ss:$16 sps:$4 sm:$0xff]   ;;  %v8571_v28 = vld [vmem:[%s12699_s2 + $0xc00] ss:$16 sps:$4 sm:$0xff]  }
  0xb3   :  { %5153 = vmatpush2.bf16.msra.mxu0 %v8505_v29  ;;  %v8574_v29 = vld [vmem:[%s12699_s2 + $0xe00] ss:$16 sps:$4 sm:$0xff]  }
  0xb4   :  { %5194 = vmatpush2.bf16.msra.mxu1 %v8508_v6  ;;  %5154 = vmatprep.subr.bf16.mxu0 %v8513_v31  ;;  %v8579_v6 = vld [vmem:[%s12699_s2 + $0xde4] ss:$16 sps:$4 sm:$0xff]  }
  0xb5   :  { %5195 = vmatprep.subr.bf16.mxu1 %v8516_v33  ;;  %v8582_v31 = vld [vmem:[%s12699_s2 + $0xfe4] ss:$16 sps:$4 sm:$0xff]   ;;  %v8577_v33 = vld [vmem:[%s12699_s2 + $0xde0] ss:$16 sps:$4 sm:$0xff]  }
  0xb7   :  { %5155 = vmatpush2.bf16.msra.mxu0 %v8511_v36  ;;  %v8585_v36 = vld [vmem:[%s12699_s2 + $0xdc4] ss:$16 sps:$4 sm:$0xff]  }
  0xb8   :  { %5196 = vmatpush2.bf16.msra.mxu1 %v8514_v37  ;;  %5156 = vmatprep.subr.bf16.mxu0 %v8519_v38  ;;  %v8588_v37 = vld [vmem:[%s12699_s2 + $0xfc4] ss:$16 sps:$4 sm:$0xff]   ;;  %v8583_v38 = vld [vmem:[%s12699_s2 + $0xdc0] ss:$16 sps:$4 sm:$0xff]  }
  0xb9   :  { %5197 = vmatprep.subr.bf16.mxu1 %v8522_v32  ;;  %v8586_v32 = vld [vmem:[%s12699_s2 + $0xfc0] ss:$16 sps:$4 sm:$0xff]  }
  0xbb   :  { %5157 = vmatpush2.bf16.msra.mxu0 %v8517_v40  ;;  %v8591_v40 = vld [vmem:[%s12699_s2 + $0xda4] ss:$16 sps:$4 sm:$0xff]  }
  0xbc   :  { %5198 = vmatpush2.bf16.msra.mxu1 %v8520_v44  ;;  %5158 = vmatprep.subr.bf16.mxu0 %v8525_v45  ;;  %v8594_v44 = vld [vmem:[%s12699_s2 + $0xfa4] ss:$16 sps:$4 sm:$0xff]   ;;  %v8589_v45 = vld [vmem:[%s12699_s2 + $0xda0] ss:$16 sps:$4 sm:$0xff]  }
  0xbd   :  { %5199 = vmatprep.subr.bf16.mxu1 %v8528_v46  ;;  %v8592_v46 = vld [vmem:[%s12699_s2 + $0xfa0] ss:$16 sps:$4 sm:$0xff]  }
  0xbf   :  { %5159 = vmatpush2.bf16.msra.mxu0 %v8523_v48  ;;  %v8600_v48 = vld [vmem:[%s12699_s2 + $0xf84] ss:$16 sps:$4 sm:$0xff]  }
  0xc0   :  { %5200 = vmatpush2.bf16.msra.mxu1 %v8526_v51  ;;  %5210 = vmatprep.subr.bf16.mxu0 %v8531_v52  ;;  %v8595_v51 = vld [vmem:[%s12699_s2 + $0xd80] ss:$16 sps:$4 sm:$0xff]  }
  0xc1   :  { %5251 = vmatprep.subr.bf16.mxu1 %v8534_v53  ;;  %v8598_v52 = vld [vmem:[%s12699_s2 + $0xf80] ss:$16 sps:$4 sm:$0xff]   ;;  %v8603_v53 = vld [vmem:[%s12699_s2 + $0xd64] ss:$16 sps:$4 sm:$0xff]  }
  0xc2   :  { %5161 = vmatmul.mubr.bf16.vlgmr.msra.gmra.mxu0 %v10301_v50 }
  0xc3   :  { %5202 = vmatmul.mubr.bf16.vlgmr.msra.gmra.mxu1 %v10320_v55  ;;  %5211 = vmatpush1.bf16.msra.mxu0 %v8529_v35  ;;  %v8606_v35 = vld [vmem:[%s12699_s2 + $0xf64] ss:$16 sps:$4 sm:$0xff]  }
  0xc4   :  { %5252 = vmatpush1.bf16.msra.mxu1 %v8532_v56  ;;  %5212 = vmatprep.subr.bf16.mxu0 %v8537_v57  ;;  %v8601_v56 = vld [vmem:[%s12699_s2 + $0xd60] ss:$16 sps:$4 sm:$0xff]  }
  0xc5   :  { %5253 = vmatprep.subr.bf16.mxu1 %v8540_v58  ;;  %5242 = vmatprep.mubr.bf16.mxu0 %v10313_v54  ;;  %v8604_v57 = vld [vmem:[%s12699_s2 + $0xf60] ss:$16 sps:$4 sm:$0xff]   ;;  %v8609_v58 = vld [vmem:[%s12699_s2 + $0xd44] ss:$16 sps:$4 sm:$0xff]  }
  0xc6   :  { %5283 = vmatprep.mubr.bf16.mxu1 %v10333_v59 }
  0xc7   :  { %5213 = vmatpush1.bf16.msra.mxu0 %v8535_v61  ;;  %v8612_v61 = vld [vmem:[%s12699_s2 + $0xf44] ss:$16 sps:$4 sm:$0xff]  }
  0xc8   :  { %5254 = vmatpush1.bf16.msra.mxu1 %v8538_v62  ;;  %5214 = vmatprep.subr.bf16.mxu0 %v8543_v63  ;;  %v8607_v62 = vld [vmem:[%s12699_s2 + $0xd40] ss:$16 sps:$4 sm:$0xff]  }
  0xc9   :  { %5255 = vmatprep.subr.bf16.mxu1 %v8546_v1  ;;  %v8610_v63 = vld [vmem:[%s12699_s2 + $0xf40] ss:$16 sps:$4 sm:$0xff]  }
  0xca   :  { %v10492_v1 = vld [vmem:[%s12700_s0 + $0x10] sm:$0xff] }
  0xcb   :  { %5215 = vmatpush1.bf16.msra.mxu0 %v8541_v2  ;;  %v8615_v2 = vld [vmem:[%s12699_s2 + $0xd24] ss:$16 sps:$4 sm:$0xff]  }
  0xcc   :  { %5256 = vmatpush1.bf16.msra.mxu1 %v8544_v3  ;;  %5216 = vmatprep.subr.bf16.mxu0 %v8549_v4  ;;  %v8618_v3 = vld [vmem:[%s12699_s2 + $0xf24] ss:$16 sps:$4 sm:$0xff]   ;;  %v10502_v4 = vrot.slane %v10492_v1, %v9783_v49 }
  0xcd   :  { %5257 = vmatprep.subr.bf16.mxu1 %v8552_v5  ;;  %v8613_v5 = vld [vmem:[%s12699_s2 + $0xd20] ss:$16 sps:$4 sm:$0xff]  }
  0xcf   :  { %5217 = vmatpush1.bf16.msra.mxu0 %v8547_v7  ;;  %v8616_v7 = vld [vmem:[%s12699_s2 + $0xf20] ss:$16 sps:$4 sm:$0xff]  }
  0xd0   :  { %5258 = vmatpush1.bf16.msra.mxu1 %v8550_v8  ;;  %5218 = vmatprep.subr.bf16.mxu0 %v8555_v9  ;;  %v8621_v8 = vld [vmem:[%s12699_s2 + $0xd04] ss:$16 sps:$4 sm:$0xff]  }
  0xd1   :  { %5259 = vmatprep.subr.bf16.mxu1 %v8558_v10  ;;  %v8624_v9 = vld [vmem:[%s12699_s2 + $0xf04] ss:$16 sps:$4 sm:$0xff]   ;;  %v8619_v10 = vld [vmem:[%s12699_s2 + $0xd00] ss:$16 sps:$4 sm:$0xff]  }
  0xd3   :  { %5219 = vmatpush1.bf16.msra.mxu0 %v8553_v11  ;;  %v968_v11 = vcombine.high %v10502_v4, %v10502_v4 }
  0xd4   :  { %5260 = vmatpush1.bf16.msra.mxu1 %v8556_v12  ;;  %5220 = vmatprep.subr.bf16.mxu0 %v8561_v14  ;;  %v8622_v12 = vld [vmem:[%s12699_s2 + $0xf00] ss:$16 sps:$4 sm:$0xff]  }
  0xd5   :  { %5261 = vmatprep.subr.bf16.mxu1 %v8564_v15  ;;  %v829_v14 = vld [vmem:[%s12701_s3] sm:$0xf]  ;;  %v10529_v15 = vrot.slane %v10280_v39, %v9783_v49  ;;  %v10544_v39 = vrot.slane %v968_v11, %v9783_v49 }
  0xd6   :  { %v8659_v11 = vld [vmem:[%s12699_s2 + $0x1240] ss:$16 sps:$4 sm:$0xff]  }
  0xd7   :  { %5221 = vmatpush1.bf16.msra.mxu0 %v8559_v16  ;;  %v10532_v16 = vsub.s32 0, %v9765_v42 }
  0xd8   :  { %5262 = vmatpush1.bf16.msra.mxu1 %v8562_v18  ;;  %5222 = vmatprep.subr.bf16.mxu0 %v8567_v20  ;;  %v8628_v18 = vld [vmem:[%s12699_s2 + $0x10e4] ss:$16 sps:$4 sm:$0xff]  }
  0xd9   :  { %5263 = vmatprep.subr.bf16.mxu1 %v8570_v21  ;;  %v8631_v20 = vld [vmem:[%s12699_s2 + $0x12e4] ss:$16 sps:$4 sm:$0xff]   ;;  %v10541_v21 = vsub.s32 1, %v9765_v42 }
  0xdb   :  { %5223 = vmatpush1.bf16.msra.mxu0 %v8565_v22  ;;  %v8626_v22 = vld [vmem:[%s12699_s2 + $0x10e0] ss:$16 sps:$4 sm:$0xff]  }
  0xdc   :  { %5264 = vmatpush1.bf16.msra.mxu1 %v8568_v24  ;;  %5224 = vmatprep.subr.bf16.mxu0 %v8573_v25  ;;  %v8629_v24 = vld [vmem:[%s12699_s2 + $0x12e0] ss:$16 sps:$4 sm:$0xff]   ;;  %v10554_v25 = vcombine.high %v10529_v15, %v10529_v15 }
  0xdd   :  { %5265 = vmatprep.subr.bf16.mxu1 %v8576_v27  ;;  %v834_v27 = vrot.slane %v829_v14, %v10532_v16 }
  0xdf   :  { %5225 = vmatpush1.bf16.msra.mxu0 %v8571_v28  ;;  %v8634_v28 = vld [vmem:[%s12699_s2 + $0x10c4] ss:$16 sps:$4 sm:$0xff]  }
  0xe0   :  { %5266 = vmatpush1.bf16.msra.mxu1 %v8574_v29  ;;  %5226 = vmatprep.subr.bf16.mxu0 %v8579_v6  ;;  %v8637_v29 = vld [vmem:[%s12699_s2 + $0x12c4] ss:$16 sps:$4 sm:$0xff]   ;;  %v838_v6 = vrot.slane %v829_v14, %v10541_v21 }
  0xe1   :  { %5267 = vmatprep.subr.bf16.mxu1 %v8582_v31  ;;  %v10566_v31 = vcombine.high %v10544_v39, %v10544_v39  ;;  %v8667_v14 = vld [vmem:[%s12699_s2 + $0x1224] ss:$16 sps:$4 sm:$0xff]  }
  0xe3   :  { %5227 = vmatpush2.bf16.msra.mxu0 %v8577_v33 }
  0xe4   :  { %5268 = vmatpush2.bf16.msra.mxu1 %v8580_v34  ;;  %5228 = vmatprep.subr.bf16.mxu0 %v8585_v36  ;;  %v8632_v36 = vld [vmem:[%s12699_s2 + $0x10c0] ss:$16 sps:$4 sm:$0xff]  }
  0xe5   :  { %5269 = vmatprep.subr.bf16.mxu1 %v8588_v37  ;;  %v8635_v37 = vld [vmem:[%s12699_s2 + $0x12c0] ss:$16 sps:$4 sm:$0xff]  }
  0xe7   :  { %5229 = vmatpush2.bf16.msra.mxu0 %v8583_v38 }
  0xe8   :  { %5270 = vmatpush2.bf16.msra.mxu1 %v8586_v32  ;;  %5230 = vmatprep.subr.bf16.mxu0 %v8591_v40 }
  0xe9   :  { %5271 = vmatprep.subr.bf16.mxu1 %v8594_v44  ;;  %v8640_v44 = vld [vmem:[%s12699_s2 + $0x10a4] ss:$16 sps:$4 sm:$0xff]  }
  0xeb   :  { %5231 = vmatpush2.bf16.msra.mxu0 %v8589_v45  ;;  %v8643_v45 = vld [vmem:[%s12699_s2 + $0x12a4] ss:$16 sps:$4 sm:$0xff]  }
  0xec   :  { %5272 = vmatpush2.bf16.msra.mxu1 %v8592_v46  ;;  %5232 = vmatprep.subr.bf16.mxu0 %v8597_v47 }
  0xed   :  { %5273 = vmatprep.subr.bf16.mxu1 %v8600_v48  ;;  %v8638_v48 = vld [vmem:[%s12699_s2 + $0x10a0] ss:$16 sps:$4 sm:$0xff]  }
  0xef   :  { %5233 = vmatpush2.bf16.msra.mxu0 %v8595_v51  ;;  %v8641_v51 = vld [vmem:[%s12699_s2 + $0x12a0] ss:$16 sps:$4 sm:$0xff]  }
  0xf0   :  { %5274 = vmatpush2.bf16.msra.mxu1 %v8598_v52  ;;  %5234 = vmatprep.subr.bf16.mxu0 %v8603_v53 }
  0xf1   :  { %5275 = vmatprep.subr.bf16.mxu1 %v8606_v35 }
  0xf3   :  { %5235 = vmatpush2.bf16.msra.mxu0 %v8601_v56 }
  0xf4   :  { %5276 = vmatpush2.bf16.msra.mxu1 %v8604_v57  ;;  %5236 = vmatprep.subr.bf16.mxu0 %v8609_v58  ;;  %v8646_v57 = vld [vmem:[%s12699_s2 + $0x1084] ss:$16 sps:$4 sm:$0xff]  }
  0xf5   :  { %5277 = vmatprep.subr.bf16.mxu1 %v8612_v61  ;;  %v8649_v58 = vld [vmem:[%s12699_s2 + $0x1284] ss:$16 sps:$4 sm:$0xff]  }
  0xf7   :  { %5237 = vmatpush2.bf16.msra.mxu0 %v8607_v62  ;;  %v8644_v62 = vld [vmem:[%s12699_s2 + $0x1080] ss:$16 sps:$4 sm:$0xff]  }
  0xf8   :  { %5278 = vmatpush2.bf16.msra.mxu1 %v8610_v63  ;;  %5238 = vmatprep.subr.bf16.mxu0 %v8615_v2  ;;  %v8647_v63 = vld [vmem:[%s12699_s2 + $0x1280] ss:$16 sps:$4 sm:$0xff]   ;;  %v8652_v2 = vld [vmem:[%s12699_s2 + $0x1064] ss:$16 sps:$4 sm:$0xff]  }
  0xf9   :  { %5279 = vmatprep.subr.bf16.mxu1 %v8618_v3  ;;  %v8655_v3 = vld [vmem:[%s12699_s2 + $0x1264] ss:$16 sps:$4 sm:$0xff]  }
  0xfb   :  { %5239 = vmatpush2.bf16.msra.mxu0 %v8613_v5  ;;  %v8650_v5 = vld [vmem:[%s12699_s2 + $0x1060] ss:$16 sps:$4 sm:$0xff]  }
  0xfc   :  { %5280 = vmatpush2.bf16.msra.mxu1 %v8616_v7  ;;  %5240 = vmatprep.subr.bf16.mxu0 %v8621_v8  ;;  %v8653_v7 = vld [vmem:[%s12699_s2 + $0x1260] ss:$16 sps:$4 sm:$0xff]   ;;  %v8658_v8 = vld [vmem:[%s12699_s2 + $0x1044] ss:$16 sps:$4 sm:$0xff]  }
  0xfd   :  { %5281 = vmatprep.subr.bf16.mxu1 %v8624_v9  ;;  %v8661_v9 = vld [vmem:[%s12699_s2 + $0x1244] ss:$16 sps:$4 sm:$0xff]  }
  0xff   :  { %5241 = vmatpush2.bf16.msra.mxu0 %v8619_v10  ;;  %v8656_v10 = vld [vmem:[%s12699_s2 + $0x1040] ss:$16 sps:$4 sm:$0xff]  }
 0x100   :  { %5282 = vmatpush2.bf16.msra.mxu1 %v8622_v12  ;;  %5292 = vmatprep.subr.bf16.mxu0 %v8628_v18  ;;  %v8664_v12 = vld [vmem:[%s12699_s2 + $0x1024] ss:$16 sps:$4 sm:$0xff]   ;;  %v8662_v18 = vld [vmem:[%s12699_s2 + $0x1020] ss:$16 sps:$4 sm:$0xff]  }
 0x101   :  { %5333 = vmatprep.subr.bf16.mxu1 %v8631_v20  ;;  %v8665_v20 = vld [vmem:[%s12699_s2 + $0x1220] ss:$16 sps:$4 sm:$0xff]  }
 0x102   :  { %v4998_v33 = vpop.f32.mrf.mxu0  ;;  %5243 = vmatmul.mubr.bf16.vlgmr.msra.gmra.mxu0 %v10529_v15 }
 0x103   :  { %5284 = vmatmul.mubr.bf16.vlgmr.msra.gmra.mxu1 %v10554_v25  ;;  %v5039_v34 = vpop.f32.mrf.mxu1  ;;  %v4999_v38 = vadd.f32 %v4998_v33, %v834_v27  ;;  %5293 = vmatpush1.bf16.msra.mxu0 %v8626_v22  ;;  %v8670_v22 = vld [vmem:[%s12699_s2 + $0x1004] ss:$16 sps:$4 sm:$0xff]   ;;  %v8668_v27 = vld [vmem:[%s12699_s2 + $0x1000] ss:$16 sps:$4 sm:$0xff]  }
 0x104   :  { %5334 = vmatpush1.bf16.msra.mxu1 %v8629_v24  ;;  %v5000_v32 = vpop.f32.mrf.mxu0  ;;  %5294 = vmatprep.subr.bf16.mxu0 %v8634_v28  ;;  %v8673_v24 = vld [vmem:[%s12699_s2 + $0x1204] ss:$16 sps:$4 sm:$0xff]   ;;  %v8671_v28 = vld [vmem:[%s12699_s2 + $0x1200] ss:$16 sps:$4 sm:$0xff]  }
 0x105   :  { %v5041_v40 = vpop.f32.mrf.mxu1  ;;  %5335 = vmatprep.subr.bf16.mxu1 %v8637_v29  ;;  %v5001_v46 = vadd.f32 %v5000_v32, %v838_v6  ;;  %v10582_v47 = vadd.f32 %v5039_v34, %v4999_v38  ;;  %5324 = vmatprep.mubr.bf16.mxu0 %v10544_v39  ;;  %v8676_v29 = vld [vmem:[%s12699_s2 + $0x11e4] ss:$16 sps:$4 sm:$0xff]   ;;  %v8674_v33 = vld [vmem:[%s12699_s2 + $0x11e0] ss:$16 sps:$4 sm:$0xff]  }
 0x106   :  { %5365 = vmatprep.mubr.bf16.mxu1 %v10566_v31  ;;  %v5002_v52 = vpop.f32.mrf.mxu0  ;;  %v8679_v6 = vld [vmem:[%s12699_s2 + $0x13e4] ss:$16 sps:$4 sm:$0xff]   ;;  %v8677_v34 = vld [vmem:[%s12699_s2 + $0x13e0] ss:$16 sps:$4 sm:$0xff]  }
 0x107   :  { %v5043_v53 = vpop.f32.mrf.mxu1  ;;  %v10592_v35 = vadd.f32 %v5041_v40, %v5001_v46  ;;  %5295 = vmatpush1.bf16.msra.mxu0 %v8632_v36  ;;  %v8682_v36 = vld [vmem:[%s12699_s2 + $0x11c4] ss:$16 sps:$4 sm:$0xff]   ;;  %v8680_v38 = vld [vmem:[%s12699_s2 + $0x11c0] ss:$16 sps:$4 sm:$0xff]  }
 0x108   :  { %5336 = vmatpush1.bf16.msra.mxu1 %v8635_v37  ;;  %v5003_v56 = vpop.f32.mrf.mxu0  ;;  %5296 = vmatprep.subr.bf16.mxu0 %v8640_v44  ;;  %v8685_v37 = vld [vmem:[%s12699_s2 + $0x13c4] ss:$16 sps:$4 sm:$0xff]   ;;  %v8683_v32 = vld [vmem:[%s12699_s2 + $0x13c0] ss:$16 sps:$4 sm:$0xff]  }
 0x109   :  { %5337 = vmatprep.subr.bf16.mxu1 %v8643_v45  ;;  %v5044_v61 = vpop.f32.mrf.mxu1  ;;  %v8688_v40 = vld [vmem:[%s12699_s2 + $0x11a4] ss:$16 sps:$4 sm:$0xff]   ;;  %v8686_v45 = vld [vmem:[%s12699_s2 + $0x11a0] ss:$16 sps:$4 sm:$0xff]  }
 0x10a   :  { %v8691_v44 = vld [vmem:[%s12699_s2 + $0x13a4] ss:$16 sps:$4 sm:$0xff]   ;;  %v8689_v46 = vld [vmem:[%s12699_s2 + $0x13a0] ss:$16 sps:$4 sm:$0xff]  }
 0x10b   :  { %5297 = vmatpush1.bf16.msra.mxu0 %v8638_v48  ;;  %v8694_v48 = vld [vmem:[%s12699_s2 + $0x1184] ss:$16 sps:$4 sm:$0xff]   ;;  %v8692_v52 = vld [vmem:[%s12699_s2 + $0x1180] ss:$16 sps:$4 sm:$0xff]  }
 0x10c   :  { %5338 = vmatpush1.bf16.msra.mxu1 %v8641_v51  ;;  %5298 = vmatprep.subr.bf16.mxu0 %v8646_v57  ;;  %v8697_v51 = vld [vmem:[%s12699_s2 + $0x1384] ss:$16 sps:$4 sm:$0xff]   ;;  %v8695_v53 = vld [vmem:[%s12699_s2 + $0x1380] ss:$16 sps:$4 sm:$0xff]  }
 0x10d   :  { %5339 = vmatprep.subr.bf16.mxu1 %v8649_v58  ;;  %v8700_v56 = vld [vmem:[%s12699_s2 + $0x1164] ss:$16 sps:$4 sm:$0xff]   ;;  %v8698_v58 = vld [vmem:[%s12699_s2 + $0x1160] ss:$16 sps:$4 sm:$0xff]  }
 0x10e   :  { %v8703_v57 = vld [vmem:[%s12699_s2 + $0x1364] ss:$16 sps:$4 sm:$0xff]   ;;  %v8701_v61 = vld [vmem:[%s12699_s2 + $0x1360] ss:$16 sps:$4 sm:$0xff]  }
 0x10f   :  { %5299 = vmatpush1.bf16.msra.mxu0 %v8644_v62  ;;  %v8706_v62 = vld [vmem:[%s12699_s2 + $0x1144] ss:$16 sps:$4 sm:$0xff]  }
 0x110   :  { %5340 = vmatpush1.bf16.msra.mxu1 %v8647_v63  ;;  %5300 = vmatprep.subr.bf16.mxu0 %v8652_v2  ;;  %v8709_v63 = vld [vmem:[%s12699_s2 + $0x1344] ss:$16 sps:$4 sm:$0xff]   ;;  %v953_v2 = vcombine.high %v10492_v1, %v10492_v1 }
 0x111   :  { %5341 = vmatprep.subr.bf16.mxu1 %v8655_v3  ;;  %v8704_v3 = vld [vmem:[%s12699_s2 + $0x1140] ss:$16 sps:$4 sm:$0xff]   ;;  %v8715_v1 = vld [vmem:[%s12699_s2 + $0x1324] ss:$16 sps:$4 sm:$0xff]  }
 0x113   :  { %5301 = vmatpush1.bf16.msra.mxu0 %v8650_v5  ;;  %v8707_v5 = vld [vmem:[%s12699_s2 + $0x1340] ss:$16 sps:$4 sm:$0xff]  }
 0x114   :  { %5342 = vmatpush1.bf16.msra.mxu1 %v8653_v7  ;;  %5302 = vmatprep.subr.bf16.mxu0 %v8658_v8  ;;  %v8712_v7 = vld [vmem:[%s12699_s2 + $0x1124] ss:$16 sps:$4 sm:$0xff]   ;;  %v10735_v8 = vrot.slane %v953_v2, %v9783_v49 }
 0x115   :  { %5343 = vmatprep.subr.bf16.mxu1 %v8661_v9  ;;  %v8710_v9 = vld [vmem:[%s12699_s2 + $0x1120] ss:$16 sps:$4 sm:$0xff]  }
 0x117   :  { %5303 = vmatpush1.bf16.msra.mxu0 %v8656_v10  ;;  %v8713_v10 = vld [vmem:[%s12699_s2 + $0x1320] ss:$16 sps:$4 sm:$0xff]  }
 0x118   :  { %5344 = vmatpush1.bf16.msra.mxu1 %v8659_v11  ;;  %5304 = vmatprep.subr.bf16.mxu0 %v8664_v12  ;;  %v8718_v11 = vld [vmem:[%s12699_s2 + $0x1104] ss:$16 sps:$4 sm:$0xff]  }
 0x119   :  { %5345 = vmatprep.subr.bf16.mxu1 %v8667_v14  ;;  %v8721_v12 = vld [vmem:[%s12699_s2 + $0x1304] ss:$16 sps:$4 sm:$0xff]   ;;  %v969_v14 = vcombine.high %v10735_v8, %v10735_v8 }
 0x11b   :  { %5305 = vmatpush1.bf16.msra.mxu0 %v8662_v18  ;;  %v10753_v18 = vrot.slane %v10502_v4, %v9783_v49  ;;  %v8727_v4 = vld [vmem:[%s12699_s2 + $0x16e4] ss:$16 sps:$4 sm:$0xff]  }
 0x11c   :  { %5346 = vmatpush1.bf16.msra.mxu1 %v8665_v20  ;;  %5306 = vmatprep.subr.bf16.mxu0 %v8670_v22  ;;  %v8716_v20 = vld [vmem:[%s12699_s2 + $0x1100] ss:$16 sps:$4 sm:$0xff]  }
 0x11d   :  { %5347 = vmatprep.subr.bf16.mxu1 %v8673_v24  ;;  %v8719_v22 = vld [vmem:[%s12699_s2 + $0x1300] ss:$16 sps:$4 sm:$0xff]   ;;  %v8724_v24 = vld [vmem:[%s12699_s2 + $0x14e4] ss:$16 sps:$4 sm:$0xff]  }
 0x11f   :  { %5307 = vmatpush1.bf16.msra.mxu0 %v8668_v27  ;;  %v8722_v27 = vld [vmem:[%s12699_s2 + $0x14e0] ss:$16 sps:$4 sm:$0xff]  }
 0x120   :  { %5348 = vmatpush1.bf16.msra.mxu1 %v8671_v28  ;;  %5308 = vmatprep.subr.bf16.mxu0 %v8676_v29  ;;  %v8725_v28 = vld [vmem:[%s12699_s2 + $0x16e0] ss:$16 sps:$4 sm:$0xff]   ;;  %v10774_v29 = vrot.slane %v969_v14, %v9783_v49 }
 0x121   :  { %5349 = vmatprep.subr.bf16.mxu1 %v8679_v6  ;;  %v10778_v6 = vcombine.high %v10753_v18, %v10753_v18  ;;  %v8752_v14 = vld [vmem:[%s12699_s2 + $0x1440] ss:$16 sps:$4 sm:$0xff]  }
 0x123   :  { %5309 = vmatpush2.bf16.msra.mxu0 %v8674_v33  ;;  %v8730_v33 = vld [vmem:[%s12699_s2 + $0x14c4] ss:$16 sps:$4 sm:$0xff]  }
 0x124   :  { %5350 = vmatpush2.bf16.msra.mxu1 %v8677_v34  ;;  %5310 = vmatprep.subr.bf16.mxu0 %v8682_v36  ;;  %v8733_v34 = vld [vmem:[%s12699_s2 + $0x16c4] ss:$16 sps:$4 sm:$0xff]   ;;  %v8728_v36 = vld [vmem:[%s12699_s2 + $0x14c0] ss:$16 sps:$4 sm:$0xff]  }
 0x125   :  { %5351 = vmatprep.subr.bf16.mxu1 %v8685_v37  ;;  %v8731_v37 = vld [vmem:[%s12699_s2 + $0x16c0] ss:$16 sps:$4 sm:$0xff]  }
 0x127   :  { %5311 = vmatpush2.bf16.msra.mxu0 %v8680_v38  ;;  %v10794_v38 = vcombine.high %v10774_v29, %v10774_v29 }
 0x128   :  { %5352 = vmatpush2.bf16.msra.mxu1 %v8683_v32  ;;  %5312 = vmatprep.subr.bf16.mxu0 %v8688_v40 }
 0x129   :  { %5353 = vmatprep.subr.bf16.mxu1 %v8691_v44 }
 0x12b   :  { %5313 = vmatpush2.bf16.msra.mxu0 %v8686_v45 }
 0x12c   :  { %5354 = vmatpush2.bf16.msra.mxu1 %v8689_v46  ;;  %5314 = vmatprep.subr.bf16.mxu0 %v8694_v48  ;;  %v8736_v48 = vld [vmem:[%s12699_s2 + $0x14a4] ss:$16 sps:$4 sm:$0xff]  }
 0x12d   :  { %5355 = vmatprep.subr.bf16.mxu1 %v8697_v51  ;;  %v8739_v51 = vld [vmem:[%s12699_s2 + $0x16a4] ss:$16 sps:$4 sm:$0xff]  }
 0x12f   :  { %5315 = vmatpush2.bf16.msra.mxu0 %v8692_v52 }
 0x130   :  { %5356 = vmatpush2.bf16.msra.mxu1 %v8695_v53  ;;  %5316 = vmatprep.subr.bf16.mxu0 %v8700_v56  ;;  %v8737_v56 = vld [vmem:[%s12699_s2 + $0x16a0] ss:$16 sps:$4 sm:$0xff]  }
 0x131   :  { %5357 = vmatprep.subr.bf16.mxu1 %v8703_v57 }
 0x133   :  { %5317 = vmatpush2.bf16.msra.mxu0 %v8698_v58 }
 0x134   :  { %5358 = vmatpush2.bf16.msra.mxu1 %v8701_v61  ;;  %5318 = vmatprep.subr.bf16.mxu0 %v8706_v62  ;;  %v8742_v62 = vld [vmem:[%s12699_s2 + $0x1484] ss:$16 sps:$4 sm:$0xff]  }
 0x135   :  { %5359 = vmatprep.subr.bf16.mxu1 %v8709_v63  ;;  %v8745_v63 = vld [vmem:[%s12699_s2 + $0x1684] ss:$16 sps:$4 sm:$0xff]  }
 0x137   :  { %5319 = vmatpush2.bf16.msra.mxu0 %v8704_v3  ;;  %v8740_v3 = vld [vmem:[%s12699_s2 + $0x1480] ss:$16 sps:$4 sm:$0xff]  }
 0x138   :  { %5360 = vmatpush2.bf16.msra.mxu1 %v8707_v5  ;;  %5320 = vmatprep.subr.bf16.mxu0 %v8712_v7  ;;  %v8743_v5 = vld [vmem:[%s12699_s2 + $0x1680] ss:$16 sps:$4 sm:$0xff]   ;;  %v8748_v7 = vld [vmem:[%s12699_s2 + $0x1464] ss:$16 sps:$4 sm:$0xff]  }
 0x139   :  { %5361 = vmatprep.subr.bf16.mxu1 %v8715_v1  ;;  %v8751_v1 = vld [vmem:[%s12699_s2 + $0x1664] ss:$16 sps:$4 sm:$0xff]  }
 0x13b   :  { %5321 = vmatpush2.bf16.msra.mxu0 %v8710_v9  ;;  %v8746_v9 = vld [vmem:[%s12699_s2 + $0x1460] ss:$16 sps:$4 sm:$0xff]  }
 0x13c   :  { %5362 = vmatpush2.bf16.msra.mxu1 %v8713_v10  ;;  %5322 = vmatprep.subr.bf16.mxu0 %v8718_v11  ;;  %v8749_v10 = vld [vmem:[%s12699_s2 + $0x1660] ss:$16 sps:$4 sm:$0xff]   ;;  %v8754_v11 = vld [vmem:[%s12699_s2 + $0x1444] ss:$16 sps:$4 sm:$0xff]  }
 0x13d   :  { %5363 = vmatprep.subr.bf16.mxu1 %v8721_v12  ;;  %v8757_v12 = vld [vmem:[%s12699_s2 + $0x1644] ss:$16 sps:$4 sm:$0xff]  }
 0x13f   :  { %5323 = vmatpush2.bf16.msra.mxu0 %v8716_v20  ;;  %v8755_v20 = vld [vmem:[%s12699_s2 + $0x1640] ss:$16 sps:$4 sm:$0xff]  }
 0x140   :  { %5364 = vmatpush2.bf16.msra.mxu1 %v8719_v22  ;;  %5374 = vmatprep.subr.bf16.mxu0 %v8724_v24  ;;  %v8760_v22 = vld [vmem:[%s12699_s2 + $0x1424] ss:$16 sps:$4 sm:$0xff]  }
 0x141   :  { %5415 = vmatprep.subr.bf16.mxu1 %v8727_v4  ;;  %v8763_v24 = vld [vmem:[%s12699_s2 + $0x1624] ss:$16 sps:$4 sm:$0xff]   ;;  %v8758_v4 = vld [vmem:[%s12699_s2 + $0x1420] ss:$16 sps:$4 sm:$0xff]  }
 0x142   :  { %v5080_v32 = vpop.f32.mrf.mxu0  ;;  %5325 = vmatmul.mubr.bf16.vlgmr.msra.gmra.mxu0 %v10753_v18 }
 0x143   :  { %5366 = vmatmul.mubr.bf16.vlgmr.msra.gmra.mxu1 %v10778_v6  ;;  %v5121_v40 = vpop.f32.mrf.mxu1  ;;  %v5081_v44 = vadd.f32 %v5080_v32, %v10582_v47  ;;  %5375 = vmatpush1.bf16.msra.mxu0 %v8722_v27  ;;  %v8734_v47 = vld [vmem:[%s12699_s2 + $0x14a0] ss:$16 sps:$4 sm:$0xff]   ;;  %v8775_v32 = vld [vmem:[%s12699_s2 + $0x17e4] ss:$16 sps:$4 sm:$0xff]  }
 0x144   :  { %5416 = vmatpush1.bf16.msra.mxu1 %v8725_v28  ;;  %v5082_v45 = vpop.f32.mrf.mxu0  ;;  %5376 = vmatprep.subr.bf16.mxu0 %v8730_v33  ;;  %v8761_v27 = vld [vmem:[%s12699_s2 + $0x1620] ss:$16 sps:$4 sm:$0xff]   ;;  %v8766_v28 = vld [vmem:[%s12699_s2 + $0x1404] ss:$16 sps:$4 sm:$0xff]  }
 0x145   :  { %v5123_v46 = vpop.f32.mrf.mxu1  ;;  %5417 = vmatprep.subr.bf16.mxu1 %v8733_v34  ;;  %v5083_v52 = vadd.f32 %v5082_v45, %v10592_v35  ;;  %v10806_v53 = vadd.f32 %v5121_v40, %v5081_v44  ;;  %5406 = vmatprep.mubr.bf16.mxu0 %v10774_v29  ;;  %v8769_v33 = vld [vmem:[%s12699_s2 + $0x1604] ss:$16 sps:$4 sm:$0xff]   ;;  %v8764_v34 = vld [vmem:[%s12699_s2 + $0x1400] ss:$16 sps:$4 sm:$0xff]  }
 0x146   :  { %5447 = vmatprep.mubr.bf16.mxu1 %v10794_v38  ;;  %v5084_v57 = vpop.f32.mrf.mxu0  ;;  %v8770_v40 = vld [vmem:[%s12699_s2 + $0x15e0] ss:$16 sps:$4 sm:$0xff]   ;;  %v8778_v45 = vld [vmem:[%s12699_s2 + $0x15c4] ss:$16 sps:$4 sm:$0xff]  }
 0x147   :  { %v5125_v58 = vpop.f32.mrf.mxu1  ;;  %v10816_v61 = vadd.f32 %v5123_v46, %v5083_v52  ;;  %5377 = vmatpush1.bf16.msra.mxu0 %v8728_v36  ;;  %v8767_v36 = vld [vmem:[%s12699_s2 + $0x1600] ss:$16 sps:$4 sm:$0xff]   ;;  %v8781_v46 = vld [vmem:[%s12699_s2 + $0x17c4] ss:$16 sps:$4 sm:$0xff]  }
 0x148   :  { %5418 = vmatpush1.bf16.msra.mxu1 %v8731_v37  ;;  %v5085_v35 = vpop.f32.mrf.mxu0  ;;  %5378 = vmatprep.subr.bf16.mxu0 %v8736_v48  ;;  %v8772_v37 = vld [vmem:[%s12699_s2 + $0x15e4] ss:$16 sps:$4 sm:$0xff]   ;;  %v8773_v44 = vld [vmem:[%s12699_s2 + $0x17e0] ss:$16 sps:$4 sm:$0xff]  }
 0x149   :  { %5419 = vmatprep.subr.bf16.mxu1 %v8739_v51  ;;  %v5126_v2 = vpop.f32.mrf.mxu1  ;;  %v8776_v48 = vld [vmem:[%s12699_s2 + $0x15c0] ss:$16 sps:$4 sm:$0xff]   ;;  %v8784_v52 = vld [vmem:[%s12699_s2 + $0x15a4] ss:$16 sps:$4 sm:$0xff]  }
 0x14a   :  { %v8779_v51 = vld [vmem:[%s12699_s2 + $0x17c0] ss:$16 sps:$4 sm:$0xff]   ;;  %v8790_v58 = vld [vmem:[%s12699_s2 + $0x1584] ss:$16 sps:$4 sm:$0xff]  }
 0x14b   :  { %5379 = vmatpush1.bf16.msra.mxu0 %v8734_v47  ;;  %v8787_v47 = vld [vmem:[%s12699_s2 + $0x17a4] ss:$16 sps:$4 sm:$0xff]   ;;  %v8785_v57 = vld [vmem:[%s12699_s2 + $0x17a0] ss:$16 sps:$4 sm:$0xff]  }
 0x14c   :  { %5420 = vmatpush1.bf16.msra.mxu1 %v8737_v56  ;;  %5380 = vmatprep.subr.bf16.mxu0 %v8742_v62  ;;  %v8782_v56 = vld [vmem:[%s12699_s2 + $0x15a0] ss:$16 sps:$4 sm:$0xff]   ;;  %v8793_v35 = vld [vmem:[%s12699_s2 + $0x1784] ss:$16 sps:$4 sm:$0xff]  }
 0x14d   :  { %5421 = vmatprep.subr.bf16.mxu1 %v8745_v63  ;;  %v8788_v62 = vld [vmem:[%s12699_s2 + $0x1580] ss:$16 sps:$4 sm:$0xff]   ;;  %v8796_v2 = vld [vmem:[%s12699_s2 + $0x1564] ss:$16 sps:$4 sm:$0xff]  }
 0x14e   :  { %v8791_v63 = vld [vmem:[%s12699_s2 + $0x1780] ss:$16 sps:$4 sm:$0xff]  }
 0x14f   :  { %5381 = vmatpush1.bf16.msra.mxu0 %v8740_v3  ;;  %v8799_v3 = vld [vmem:[%s12699_s2 + $0x1764] ss:$16 sps:$4 sm:$0xff]  }
 0x150   :  { %5422 = vmatpush1.bf16.msra.mxu1 %v8743_v5  ;;  %5382 = vmatprep.subr.bf16.mxu0 %v8748_v7  ;;  %v8794_v5 = vld [vmem:[%s12699_s2 + $0x1560] ss:$16 sps:$4 sm:$0xff]  }
 0x151   :  { %5423 = vmatprep.subr.bf16.mxu1 %v8751_v1  ;;  %v8797_v7 = vld [vmem:[%s12699_s2 + $0x1760] ss:$16 sps:$4 sm:$0xff]   ;;  %v8802_v1 = vld [vmem:[%s12699_s2 + $0x1544] ss:$16 sps:$4 sm:$0xff]  }
 0x153   :  { %5383 = vmatpush1.bf16.msra.mxu0 %v8746_v9  ;;  %v8805_v9 = vld [vmem:[%s12699_s2 + $0x1744] ss:$16 sps:$4 sm:$0xff]  }
 0x154   :  { %5424 = vmatpush1.bf16.msra.mxu1 %v8749_v10  ;;  %5384 = vmatprep.subr.bf16.mxu0 %v8754_v11  ;;  %v8800_v10 = vld [vmem:[%s12699_s2 + $0x1540] ss:$16 sps:$4 sm:$0xff]  }
 0x155   :  { %5425 = vmatprep.subr.bf16.mxu1 %v8757_v12  ;;  %v8803_v11 = vld [vmem:[%s12699_s2 + $0x1740] ss:$16 sps:$4 sm:$0xff]   ;;  %v8808_v12 = vld [vmem:[%s12699_s2 + $0x1524] ss:$16 sps:$4 sm:$0xff]  }
 0x157   :  { %5385 = vmatpush1.bf16.msra.mxu0 %v8752_v14  ;;  %v8811_v14 = vld [vmem:[%s12699_s2 + $0x1724] ss:$16 sps:$4 sm:$0xff]  }
 0x158   :  { %5426 = vmatpush1.bf16.msra.mxu1 %v8755_v20  ;;  %5386 = vmatprep.subr.bf16.mxu0 %v8760_v22  ;;  %v8806_v20 = vld [vmem:[%s12699_s2 + $0x1520] ss:$16 sps:$4 sm:$0xff]  }
 0x159   :  { %5427 = vmatprep.subr.bf16.mxu1 %v8763_v24  ;;  %v8809_v22 = vld [vmem:[%s12699_s2 + $0x1720] ss:$16 sps:$4 sm:$0xff]   ;;  %v8814_v24 = vld [vmem:[%s12699_s2 + $0x1504] ss:$16 sps:$4 sm:$0xff]  }
 0x15b   :  { %5387 = vmatpush1.bf16.msra.mxu0 %v8758_v4  ;;  %v8817_v4 = vld [vmem:[%s12699_s2 + $0x1704] ss:$16 sps:$4 sm:$0xff]  }
 0x15c   :  { %5428 = vmatpush1.bf16.msra.mxu1 %v8761_v27  ;;  %5388 = vmatprep.subr.bf16.mxu0 %v8766_v28  ;;  %v10970_v27 = vrot.slane %v10735_v8, %v9783_v49  ;;  %v8812_v28 = vld [vmem:[%s12699_s2 + $0x1500] ss:$16 sps:$4 sm:$0xff]   ;;  %v8824_v8 = vld [vmem:[%s12699_s2 + $0xec] ss:$16 sps:$4 sm:$0xff]  }
 0x15d   :  { %5429 = vmatprep.subr.bf16.mxu1 %v8769_v33  ;;  %v8815_v33 = vld [vmem:[%s12699_s2 + $0x1700] ss:$16 sps:$4 sm:$0xff]  }
 0x15f   :  { %5389 = vmatpush1.bf16.msra.mxu0 %v8764_v34  ;;  %v8821_v34 = vld [vmem:[%s12699_s2 + $0x1864] ss:$16 sps:$4 sm:$0xff]  }
 0x160   :  { %5430 = vmatpush1.bf16.msra.mxu1 %v8767_v36  ;;  %5390 = vmatprep.subr.bf16.mxu0 %v8772_v37  ;;  %v8819_v36 = vld [vmem:[%s12699_s2 + $0x1860] ss:$16 sps:$4 sm:$0xff]   ;;  %v8822_v37 = vld [vmem:[%s12699_s2 + $0xe8] ss:$16 sps:$4 sm:$0xff]  }
 0x161   :  { %5431 = vmatprep.subr.bf16.mxu1 %v8775_v32  ;;  %v10992_v32 = vcombine.high %v10970_v27, %v10970_v27 }
 0x163   :  { %5391 = vmatpush2.bf16.msra.mxu0 %v8770_v40  ;;  %v8827_v40 = vld [vmem:[%s12699_s2 + $0x1844] ss:$16 sps:$4 sm:$0xff]  }
 0x164   :  { %5432 = vmatpush2.bf16.msra.mxu1 %v8773_v44  ;;  %5392 = vmatprep.subr.bf16.mxu0 %v8778_v45  ;;  %v8830_v44 = vld [vmem:[%s12699_s2 + $0xcc] ss:$16 sps:$4 sm:$0xff]   ;;  %v8825_v45 = vld [vmem:[%s12699_s2 + $0x1840] ss:$16 sps:$4 sm:$0xff]  }
 0x165   :  { %5433 = vmatprep.subr.bf16.mxu1 %v8781_v46  ;;  %v8828_v46 = vld [vmem:[%s12699_s2 + $0xc8] ss:$16 sps:$4 sm:$0xff]  }
 0x167   :  { %5393 = vmatpush2.bf16.msra.mxu0 %v8776_v48 }
 0x168   :  { %5434 = vmatpush2.bf16.msra.mxu1 %v8779_v51  ;;  %5394 = vmatprep.subr.bf16.mxu0 %v8784_v52 }
 0x169   :  { %5435 = vmatprep.subr.bf16.mxu1 %v8787_v47 }
 0x16b   :  { %5395 = vmatpush2.bf16.msra.mxu0 %v8782_v56 }
 0x16c   :  { %5436 = vmatpush2.bf16.msra.mxu1 %v8785_v57  ;;  %5396 = vmatprep.subr.bf16.mxu0 %v8790_v58  ;;  %v8833_v57 = vld [vmem:[%s12699_s2 + $0x1824] ss:$16 sps:$4 sm:$0xff]   ;;  %v8836_v58 = vld [vmem:[%s12699_s2 + $0xac] ss:$16 sps:$4 sm:$0xff]  }
 0x16d   :  { %5437 = vmatprep.subr.bf16.mxu1 %v8793_v35 }
 0x16f   :  { %5397 = vmatpush2.bf16.msra.mxu0 %v8788_v62 }
 0x170   :  { %5438 = vmatpush2.bf16.msra.mxu1 %v8791_v63  ;;  %5398 = vmatprep.subr.bf16.mxu0 %v8796_v2  ;;  %v8834_v63 = vld [vmem:[%s12699_s2 + $0xa8] ss:$16 sps:$4 sm:$0xff]   ;;  %v9585_v2 = vmov 0  }
 0x171   :  { %5439 = vmatprep.subr.bf16.mxu1 %v8799_v3 }
 0x173   :  { %5399 = vmatpush2.bf16.msra.mxu0 %v8794_v5 }
 0x174   :  { %5440 = vmatpush2.bf16.msra.mxu1 %v8797_v7  ;;  %5400 = vmatprep.subr.bf16.mxu0 %v8802_v1  ;;  %v8839_v1 = vld [vmem:[%s12699_s2 + $0x1804] ss:$16 sps:$4 sm:$0xff]  }
 0x175   :  { %5441 = vmatprep.subr.bf16.mxu1 %v8805_v9  ;;  %v8842_v9 = vld [vmem:[%s12699_s2 + $0x8c] ss:$16 sps:$4 sm:$0xff]  }
 0x177   :  { %5401 = vmatpush2.bf16.msra.mxu0 %v8800_v10 }
 0x178   :  { %5442 = vmatpush2.bf16.msra.mxu1 %v8803_v11  ;;  %5402 = vmatprep.subr.bf16.mxu0 %v8808_v12  ;;  %v8840_v11 = vld [vmem:[%s12699_s2 + $0x88] ss:$16 sps:$4 sm:$0xff]  }
 0x179   :  { %5443 = vmatprep.subr.bf16.mxu1 %v8811_v14  ;;  %v7232_v12 = vld.sshfl [vmem:[%s12700_s0 + $0x18] sm:$0x1 pattern:$0x75316420]  ;;  %v8845_v14 = vld [vmem:[%s12699_s2 + $0x6c] ss:$16 sps:$4 sm:$0xff]  }
 0x17b   :  { %5403 = vmatpush2.bf16.msra.mxu0 %v8806_v20  ;;  %v8848_v20 = vld [vmem:[%s12699_s2 + $0x2ec] ss:$16 sps:$4 sm:$0xff]  }
 0x17c   :  { %5444 = vmatpush2.bf16.msra.mxu1 %v8809_v22  ;;  %5404 = vmatprep.subr.bf16.mxu0 %v8814_v24  ;;  %v8843_v22 = vld [vmem:[%s12699_s2 + $0x68] ss:$16 sps:$4 sm:$0xff]  }
 0x17d   :  { %5445 = vmatprep.subr.bf16.mxu1 %v8817_v4  ;;  %v8846_v24 = vld [vmem:[%s12699_s2 + $0x2e8] ss:$16 sps:$4 sm:$0xff]   ;;  %v11056_v4 = vrot.slane %v7232_v12, %v9783_v49 }
 0x17e   :  { %v8849_v49 = vld [vmem:[%s12699_s2 + $0x48] ss:$16 sps:$4 sm:$0xff]  }
 0x17f   :  { %5405 = vmatpush2.bf16.msra.mxu0 %v8812_v28  ;;  %v8851_v28 = vld [vmem:[%s12699_s2 + $0x4c] ss:$16 sps:$4 sm:$0xff]   ;;  %v8891_v12 = vld [vmem:[%s12699_s2 + $0x168] ss:$16 sps:$4 sm:$0xff]  }
 0x180   :  { %5446 = vmatpush2.bf16.msra.mxu1 %v8815_v33  ;;  %5464 = vmatprep.subr.bf16.mxu0 %v8821_v34  ;;  %v8854_v33 = vld [vmem:[%s12699_s2 + $0x2cc] ss:$16 sps:$4 sm:$0xff]   ;;  %v8852_v34 = vld [vmem:[%s12699_s2 + $0x2c8] ss:$16 sps:$4 sm:$0xff]  }
 0x181   :  { %5497 = vmatprep.subr.bf16.mxu1 %v8824_v8  ;;  %v8857_v8 = vld [vmem:[%s12699_s2 + $0x2c] ss:$16 sps:$4 sm:$0xff]  }
 0x182   :  { %v5162_v48 = vpop.f32.mrf.mxu0  ;;  %5407 = vmatmul.mubr.bf16.vlgmr.msra.gmra.mxu0 %v10970_v27 }
 0x183   :  { %5448 = vmatmul.mubr.bf16.vlgmr.msra.gmra.mxu1 %v10992_v32  ;;  %v5203_v51 = vpop.f32.mrf.mxu1  ;;  %v5163_v52 = vadd.f32 %v5162_v48, %v10806_v53  ;;  %5465 = vmatpush1.bf16.msra.mxu0 %v8819_v36  ;;  %v8831_v53 = vld [vmem:[%s12699_s2 + $0x1820] ss:$16 sps:$4 sm:$0xff]   ;;  %v8860_v36 = vld [vmem:[%s12699_s2 + $0x2ac] ss:$16 sps:$4 sm:$0xff]  }
 0x184   :  { %5498 = vmatpush1.bf16.msra.mxu1 %v8822_v37  ;;  %v5164_v47 = vpop.f32.mrf.mxu0  ;;  %5466 = vmatprep.subr.bf16.mxu0 %v8827_v40  ;;  %v8855_v37 = vld [vmem:[%s12699_s2 + $0x28] ss:$16 sps:$4 sm:$0xff]   ;;  %v8869_v48 = vld [vmem:[%s12699_s2 + $0x1ec] ss:$16 sps:$4 sm:$0xff]  }
 0x185   :  { %v5205_v56 = vpop.f32.mrf.mxu1  ;;  %5499 = vmatprep.subr.bf16.mxu1 %v8830_v44  ;;  %v5165_v35 = vadd.f32 %v5164_v47, %v10816_v61  ;;  %v11016_v62 = vadd.f32 %v5203_v51, %v5163_v52  ;;  %5488 = vmatprep.mubr.bf16.mxu0 %v9585_v2  ;;  %v8858_v40 = vld [vmem:[%s12699_s2 + $0x2a8] ss:$16 sps:$4 sm:$0xff]   ;;  %v8863_v44 = vld [vmem:[%s12699_s2 + $0xc] ss:$16 sps:$4 sm:$0xff]  }
 0x186   :  { %5529 = vmatprep.mubr.bf16.mxu1 %v9811_v60  ;;  %v5166_v3 = vpop.f32.mrf.mxu0  ;;  %v8837_v60 = vld [vmem:[%s12699_s2 + $0x1800] ss:$16 sps:$4 sm:$0xff]   ;;  %v8872_v51 = vld [vmem:[%s12699_s2 + $0x26c] ss:$16 sps:$4 sm:$0xff]   ;;  %v8867_v52 = vld [vmem:[%s12699_s2 + $0x1e8] ss:$16 sps:$4 sm:$0xff]  }
 0x187   :  { %v5207_v5 = vpop.f32.mrf.mxu1  ;;  %v11026_v7 = vadd.f32 %v5205_v56, %v5165_v35  ;;  %5467 = vmatpush1.bf16.msra.mxu0 %v8825_v45  ;;  %v8861_v45 = vld [vmem:[%s12699_s2 + $0x8] ss:$16 sps:$4 sm:$0xff]   ;;  %v8875_v56 = vld [vmem:[%s12699_s2 + $0x1cc] ss:$16 sps:$4 sm:$0xff]  }
 0x188   :  { %5500 = vmatpush1.bf16.msra.mxu1 %v8828_v46  ;;  %v5167_v61 = vpop.f32.mrf.mxu0  ;;  %5468 = vmatprep.subr.bf16.mxu0 %v8833_v57  ;;  %v8864_v46 = vld [vmem:[%s12699_s2 + $0x288] ss:$16 sps:$4 sm:$0xff]   ;;  %v8878_v57 = vld [vmem:[%s12699_s2 + $0x24c] ss:$16 sps:$4 sm:$0xff]  }
 0x189   :  { %5501 = vmatprep.subr.bf16.mxu1 %v8836_v58  ;;  %v5208_v10 = vpop.f32.mrf.mxu1  ;;  %v8870_v47 = vld [vmem:[%s12699_s2 + $0x268] ss:$16 sps:$4 sm:$0xff]   ;;  %v8887_v61 = vld [vmem:[%s12699_s2 + $0x18c] ss:$16 sps:$4 sm:$0xff]  }
 0x18a   :  { %v8873_v58 = vld [vmem:[%s12699_s2 + $0x1c8] ss:$16 sps:$4 sm:$0xff]  }
 0x18b   :  { %5469 = vmatpush1.bf16.msra.mxu0 %v8831_v53  ;;  %v8876_v35 = vld [vmem:[%s12699_s2 + $0x248] ss:$16 sps:$4 sm:$0xff]   ;;  %v8881_v53 = vld [vmem:[%s12699_s2 + $0x1ac] ss:$16 sps:$4 sm:$0xff]  }
 0x18c   :  { %5502 = vmatpush1.bf16.msra.mxu1 %v8834_v63  ;;  %5470 = vmatprep.subr.bf16.mxu0 %v8839_v1  ;;  %v8884_v63 = vld [vmem:[%s12699_s2 + $0x22c] ss:$16 sps:$4 sm:$0xff]   ;;  %v8879_v3 = vld [vmem:[%s12699_s2 + $0x1a8] ss:$16 sps:$4 sm:$0xff]  }
 0x18d   :  { %5503 = vmatprep.subr.bf16.mxu1 %v8842_v9  ;;  %v8882_v5 = vld [vmem:[%s12699_s2 + $0x228] ss:$16 sps:$4 sm:$0xff]   ;;  %v8890_v1 = vld [vmem:[%s12699_s2 + $0x20c] ss:$16 sps:$4 sm:$0xff]  }
 0x18e   :  { %v8885_v9 = vld [vmem:[%s12699_s2 + $0x188] ss:$16 sps:$4 sm:$0xff]  }
 0x18f   :  { %5471 = vmatpush1.bf16.msra.mxu0 %v8837_v60  ;;  %v8888_v10 = vld [vmem:[%s12699_s2 + $0x208] ss:$16 sps:$4 sm:$0xff]   ;;  %v8893_v60 = vld [vmem:[%s12699_s2 + $0x16c] ss:$16 sps:$4 sm:$0xff]  }
 0x190   :  { %5504 = vmatpush1.bf16.msra.mxu1 %v8840_v11  ;;  %5538 = vmatprep.subr.bf16.mxu0 %v8848_v20  ;;  %v8896_v11 = vld [vmem:[%s12699_s2 + $0x3ec] ss:$16 sps:$4 sm:$0xff]  }
 0x191   :  { %5505 = vmatprep.subr.bf16.mxu1 %v8845_v14  ;;  %v8894_v14 = vld [vmem:[%s12699_s2 + $0x3e8] ss:$16 sps:$4 sm:$0xff]   ;;  %v8899_v20 = vld [vmem:[%s12699_s2 + $0x14c] ss:$16 sps:$4 sm:$0xff]  }
 0x192   :  { %8017 = vmatmul.mubr.msk.bf16.vlgmr.msra.gmra.mxu0 %vm4960_vm0, %v11056_v4 }
 0x193   :  { %5539 = vmatpush1.bf16.msra.mxu0 %v8846_v24  ;;  %5570 = vmatprep.mubr.bf16.mxu0 %v9824_v0  ;;  %v8866_v0 = vld [vmem:[%s12699_s2 + $0x28c] ss:$16 sps:$4 sm:$0xff]   ;;  %v8897_v24 = vld [vmem:[%s12699_s2 + $0x148] ss:$16 sps:$4 sm:$0xff]  }
 0x194   :  { %5506 = vmatpush1.bf16.msra.mxu1 %v8843_v22  ;;  %5540 = vmatprep.subr.bf16.mxu0 %v8854_v33  ;;  %v8902_v22 = vld [vmem:[%s12699_s2 + $0x3cc] ss:$16 sps:$4 sm:$0xff]  }
 0x195   :  { %5507 = vmatprep.subr.bf16.mxu1 %v8851_v28  ;;  %v8900_v28 = vld [vmem:[%s12699_s2 + $0x3c8] ss:$16 sps:$4 sm:$0xff]   ;;  %v8905_v33 = vld [vmem:[%s12699_s2 + $0x12c] ss:$16 sps:$4 sm:$0xff]  }
 0x197   :  { %5541 = vmatpush1.bf16.msra.mxu0 %v8852_v34  ;;  %v8903_v34 = vld [vmem:[%s12699_s2 + $0x128] ss:$16 sps:$4 sm:$0xff]  }
 0x198   :  { %5508 = vmatpush1.bf16.msra.mxu1 %v8849_v49  ;;  %5542 = vmatprep.subr.bf16.mxu0 %v8860_v36  ;;  %v8908_v49 = vld [vmem:[%s12699_s2 + $0x3ac] ss:$16 sps:$4 sm:$0xff]  }
 0x199   :  { %5509 = vmatprep.subr.bf16.mxu1 %v8857_v8  ;;  %v8906_v8 = vld [vmem:[%s12699_s2 + $0x3a8] ss:$16 sps:$4 sm:$0xff]   ;;  %v8911_v36 = vld [vmem:[%s12699_s2 + $0x10c] ss:$16 sps:$4 sm:$0xff]  }
 0x19b   :  { %5543 = vmatpush1.bf16.msra.mxu0 %v8858_v40  ;;  %v8909_v40 = vld [vmem:[%s12699_s2 + $0x108] ss:$16 sps:$4 sm:$0xff]  }
 0x19c   :  { %5510 = vmatpush1.bf16.msra.mxu1 %v8855_v37  ;;  %5544 = vmatprep.subr.bf16.mxu0 %v8866_v0  ;;  %v8914_v37 = vld [vmem:[%s12699_s2 + $0x38c] ss:$16 sps:$4 sm:$0xff]  }
 0x19d   :  { %5511 = vmatprep.subr.bf16.mxu1 %v8863_v44  ;;  %v8912_v44 = vld [vmem:[%s12699_s2 + $0x388] ss:$16 sps:$4 sm:$0xff]   ;;  %v8917_v0 = vld [vmem:[%s12699_s2 + $0x36c] ss:$16 sps:$4 sm:$0xff]  }
 0x19f   :  { %5545 = vmatpush1.bf16.msra.mxu0 %v8864_v46  ;;  %v8915_v46 = vld [vmem:[%s12699_s2 + $0x368] ss:$16 sps:$4 sm:$0xff]  }
 0x1a0   :  { %5512 = vmatpush1.bf16.msra.mxu1 %v8861_v45  ;;  %5546 = vmatprep.subr.bf16.mxu0 %v8872_v51  ;;  %v8920_v45 = vld [vmem:[%s12699_s2 + $0x4ec] ss:$16 sps:$4 sm:$0xff]  }
 0x1a1   :  { %5513 = vmatprep.subr.bf16.mxu1 %v8869_v48  ;;  %v8918_v48 = vld [vmem:[%s12699_s2 + $0x4e8] ss:$16 sps:$4 sm:$0xff]   ;;  %v8923_v51 = vld [vmem:[%s12699_s2 + $0x34c] ss:$16 sps:$4 sm:$0xff]  }
 0x1a3   :  { %5547 = vmatpush1.bf16.msra.mxu0 %v8870_v47  ;;  %v8921_v47 = vld [vmem:[%s12699_s2 + $0x348] ss:$16 sps:$4 sm:$0xff]  }
 0x1a4   :  { %5514 = vmatpush2.bf16.msra.mxu1 %v8867_v52  ;;  %5548 = vmatprep.subr.bf16.mxu0 %v8878_v57  ;;  %v8926_v52 = vld [vmem:[%s12699_s2 + $0x4cc] ss:$16 sps:$4 sm:$0xff]  }
 0x1a5   :  { %5515 = vmatprep.subr.bf16.mxu1 %v8875_v56  ;;  %v8924_v56 = vld [vmem:[%s12699_s2 + $0x4c8] ss:$16 sps:$4 sm:$0xff]  }
 0x1a7   :  { %5549 = vmatpush1.bf16.msra.mxu0 %v8876_v35 }
 0x1a8   :  { %5516 = vmatpush2.bf16.msra.mxu1 %v8873_v58  ;;  %5550 = vmatprep.subr.bf16.mxu0 %v8884_v63 }
 0x1a9   :  { %5517 = vmatprep.subr.bf16.mxu1 %v8881_v53 }
 0x1ab   :  { %5551 = vmatpush1.bf16.msra.mxu0 %v8882_v5  ;;  %v8932_v5 = vld [vmem:[%s12699_s2 + $0x4ac] ss:$16 sps:$4 sm:$0xff]  }
 0x1ac   :  { %5518 = vmatpush2.bf16.msra.mxu1 %v8879_v3  ;;  %5552 = vmatprep.subr.bf16.mxu0 %v8890_v1  ;;  %v8929_v3 = vld [vmem:[%s12699_s2 + $0x32c] ss:$16 sps:$4 sm:$0xff]   ;;  %v8930_v1 = vld [vmem:[%s12699_s2 + $0x4a8] ss:$16 sps:$4 sm:$0xff]  }
 0x1ad   :  { %5519 = vmatprep.subr.bf16.mxu1 %v8887_v61 }
 0x1af   :  { %5553 = vmatpush1.bf16.msra.mxu0 %v8888_v10 }
 0x1b0   :  { %5520 = vmatpush2.bf16.msra.mxu1 %v8885_v9  ;;  %5554 = vmatprep.subr.bf16.mxu0 %v8896_v11 }
 0x1b1   :  { %5521 = vmatprep.subr.bf16.mxu1 %v8893_v60 }
 0x1b3   :  { %5555 = vmatpush2.bf16.msra.mxu0 %v8894_v14 }
 0x1b4   :  { %5522 = vmatpush2.bf16.msra.mxu1 %v8891_v12  ;;  %5556 = vmatprep.subr.bf16.mxu0 %v8902_v22  ;;  %v8938_v12 = vld [vmem:[%s12699_s2 + $0x48c] ss:$16 sps:$4 sm:$0xff]  }
 0x1b5   :  { %5523 = vmatprep.subr.bf16.mxu1 %v8899_v20  ;;  %v8936_v20 = vld [vmem:[%s12699_s2 + $0x488] ss:$16 sps:$4 sm:$0xff]   ;;  %v8941_v22 = vld [vmem:[%s12699_s2 + $0x46c] ss:$16 sps:$4 sm:$0xff]  }
 0x1b7   :  { %5557 = vmatpush2.bf16.msra.mxu0 %v8900_v28  ;;  %v8939_v28 = vld [vmem:[%s12699_s2 + $0x468] ss:$16 sps:$4 sm:$0xff]  }
 0x1b8   :  { %5524 = vmatpush2.bf16.msra.mxu1 %v8897_v24  ;;  %5558 = vmatprep.subr.bf16.mxu0 %v8908_v49  ;;  %v8944_v24 = vld [vmem:[%s12699_s2 + $0x6ec] ss:$16 sps:$4 sm:$0xff]  }
 0x1b9   :  { %5525 = vmatprep.subr.bf16.mxu1 %v8905_v33  ;;  %v8942_v33 = vld [vmem:[%s12699_s2 + $0x6e8] ss:$16 sps:$4 sm:$0xff]   ;;  %v8947_v49 = vld [vmem:[%s12699_s2 + $0x44c] ss:$16 sps:$4 sm:$0xff]  }
 0x1bb   :  { %5559 = vmatpush2.bf16.msra.mxu0 %v8906_v8  ;;  %v8945_v8 = vld [vmem:[%s12699_s2 + $0x448] ss:$16 sps:$4 sm:$0xff]  }
 0x1bc   :  { %5526 = vmatpush2.bf16.msra.mxu1 %v8903_v34  ;;  %5560 = vmatprep.subr.bf16.mxu0 %v8914_v37  ;;  %v8950_v34 = vld [vmem:[%s12699_s2 + $0x6cc] ss:$16 sps:$4 sm:$0xff]  }
 0x1bd   :  { %5527 = vmatprep.subr.bf16.mxu1 %v8911_v36  ;;  %v8948_v36 = vld [vmem:[%s12699_s2 + $0x6c8] ss:$16 sps:$4 sm:$0xff]   ;;  %v8953_v37 = vld [vmem:[%s12699_s2 + $0x42c] ss:$16 sps:$4 sm:$0xff]  }
 0x1bf   :  { %5561 = vmatpush2.bf16.msra.mxu0 %v8912_v44  ;;  %v8954_v44 = vld [vmem:[%s12699_s2 + $0x6a8] ss:$16 sps:$4 sm:$0xff]  }
 0x1c0   :  { %5528 = vmatpush2.bf16.msra.mxu1 %v8909_v40  ;;  %5562 = vmatprep.subr.bf16.mxu0 %v8917_v0  ;;  %v8951_v40 = vld [vmem:[%s12699_s2 + $0x428] ss:$16 sps:$4 sm:$0xff]   ;;  %v8959_v0 = vld [vmem:[%s12699_s2 + $0x40c] ss:$16 sps:$4 sm:$0xff]  }
 0x1c1   :  { %5579 = vmatprep.subr.bf16.mxu1 %v8920_v45  ;;  %v8957_v45 = vld [vmem:[%s12699_s2 + $0x408] ss:$16 sps:$4 sm:$0xff]  }
 0x1c2   :  { %v5244_v57 = vpop.f32.mrf.mxu0 }
 0x1c3   :  { %5530 = vmatmul.mubr.bf16.vlgmr.msra.gmra.mxu1 %v9861_v13  ;;  %v5285_v58 = vpop.f32.mrf.mxu1  ;;  %v5245_v35 = vadd.f32 %v5244_v57, %v11016_v62  ;;  %5563 = vmatpush2.bf16.msra.mxu0 %v8915_v46  ;;  %v8927_v62 = vld [vmem:[%s12699_s2 + $0x328] ss:$16 sps:$4 sm:$0xff]   ;;  %v8974_v57 = vld [vmem:[%s12699_s2 + $0x64c] ss:$16 sps:$4 sm:$0xff]  }
 0x1c4   :  { %5580 = vmatpush1.bf16.msra.mxu1 %v8918_v48  ;;  %v5246_v53 = vpop.f32.mrf.mxu0  ;;  %5564 = vmatprep.subr.bf16.mxu0 %v8923_v51  ;;  %v8960_v46 = vld [vmem:[%s12699_s2 + $0x688] ss:$16 sps:$4 sm:$0xff]   ;;  %v8965_v48 = vld [vmem:[%s12699_s2 + $0x5ec] ss:$16 sps:$4 sm:$0xff]  }
 0x1c5   :  { %v5287_v63 = vpop.f32.mrf.mxu1  ;;  %5581 = vmatprep.subr.bf16.mxu1 %v8926_v52  ;;  %v5247_v61 = vadd.f32 %v5246_v53, %v11026_v7  ;;  %v11226_v13 = vadd.f32 %v5285_v58, %v5245_v35  ;;  %5611 = vmatprep.mubr.bf16.mxu1 %v9873_v17  ;;  %v8935_v7 = vld [vmem:[%s12699_s2 + $0x30c] ss:$16 sps:$4 sm:$0xff]   ;;  %v8933_v17 = vld [vmem:[%s12699_s2 + $0x308] ss:$16 sps:$4 sm:$0xff]  }
 0x1c6   :  { %v5248_v9 = vpop.f32.mrf.mxu0  ;;  %v8968_v51 = vld [vmem:[%s12699_s2 + $0x66c] ss:$16 sps:$4 sm:$0xff]   ;;  %v8963_v52 = vld [vmem:[%s12699_s2 + $0x5e8] ss:$16 sps:$4 sm:$0xff]  }
 0x1c7   :  { %v5289_v10 = vpop.f32.mrf.mxu1  ;;  %v11235_v60 = vadd.f32 %v5287_v63, %v5247_v61  ;;  %5565 = vmatpush2.bf16.msra.mxu0 %v8921_v47  ;;  %v8966_v47 = vld [vmem:[%s12699_s2 + $0x668] ss:$16 sps:$4 sm:$0xff]   ;;  %v8977_v53 = vld [vmem:[%s12699_s2 + $0x5ac] ss:$16 sps:$4 sm:$0xff]  }
 0x1c8   :  { %5582 = vmatpush1.bf16.msra.mxu1 %v8924_v56  ;;  %v5249_v11 = vpop.f32.mrf.mxu0  ;;  %5566 = vmatprep.subr.bf16.mxu0 %v8929_v3  ;;  %v8971_v56 = vld [vmem:[%s12699_s2 + $0x5cc] ss:$16 sps:$4 sm:$0xff]   ;;  %v8969_v58 = vld [vmem:[%s12699_s2 + $0x5c8] ss:$16 sps:$4 sm:$0xff]  }
 0x1c9   :  { %5583 = vmatprep.subr.bf16.mxu1 %v8932_v5  ;;  %v5290_v14 = vpop.f32.mrf.mxu1  ;;  %v8972_v35 = vld [vmem:[%s12699_s2 + $0x648] ss:$16 sps:$4 sm:$0xff]   ;;  %v8980_v63 = vld [vmem:[%s12699_s2 + $0x62c] ss:$16 sps:$4 sm:$0xff]  }
 0x1ca   :  { %v8975_v3 = vld [vmem:[%s12699_s2 + $0x5a8] ss:$16 sps:$4 sm:$0xff]   ;;  %v8983_v61 = vld [vmem:[%s12699_s2 + $0x58c] ss:$16 sps:$4 sm:$0xff]  }
 0x1cb   :  { %5567 = vmatpush2.bf16.msra.mxu0 %v8927_v62  ;;  %v8978_v5 = vld [vmem:[%s12699_s2 + $0x628] ss:$16 sps:$4 sm:$0xff]   ;;  %v8986_v62 = vld [vmem:[%s12699_s2 + $0x60c] ss:$16 sps:$4 sm:$0xff]  }
 0x1cc   :  { %5584 = vmatpush1.bf16.msra.mxu1 %v8930_v1  ;;  %5568 = vmatprep.subr.bf16.mxu0 %v8935_v7  ;;  %v8981_v1 = vld [vmem:[%s12699_s2 + $0x588] ss:$16 sps:$4 sm:$0xff]   ;;  %v8989_v10 = vld [vmem:[%s12699_s2 + $0x56c] ss:$16 sps:$4 sm:$0xff]  }
 0x1cd   :  { %5585 = vmatprep.subr.bf16.mxu1 %v8938_v12  ;;  %v8984_v9 = vld [vmem:[%s12699_s2 + $0x608] ss:$16 sps:$4 sm:$0xff]   ;;  %v8992_v11 = vld [vmem:[%s12699_s2 + $0x7ec] ss:$16 sps:$4 sm:$0xff]  }
 0x1ce   :  { %v8987_v7 = vld [vmem:[%s12699_s2 + $0x568] ss:$16 sps:$4 sm:$0xff]   ;;  %v8995_v14 = vld [vmem:[%s12699_s2 + $0x54c] ss:$16 sps:$4 sm:$0xff]  }
 0x1cf   :  { %5569 = vmatpush2.bf16.msra.mxu0 %v8933_v17  ;;  %v8990_v12 = vld [vmem:[%s12699_s2 + $0x7e8] ss:$16 sps:$4 sm:$0xff]   ;;  %v8998_v17 = vld [vmem:[%s12699_s2 + $0x7cc] ss:$16 sps:$4 sm:$0xff]  }
 0x1d0   :  { %5586 = vmatpush1.bf16.msra.mxu1 %v8936_v20  ;;  %5620 = vmatprep.subr.bf16.mxu0 %v8944_v24  ;;  %v8993_v20 = vld [vmem:[%s12699_s2 + $0x548] ss:$16 sps:$4 sm:$0xff]   ;;  %v9001_v24 = vld [vmem:[%s12699_s2 + $0x52c] ss:$16 sps:$4 sm:$0xff]  }
 0x1d1   :  { %5587 = vmatprep.subr.bf16.mxu1 %v8941_v22  ;;  %v8996_v22 = vld [vmem:[%s12699_s2 + $0x7c8] ss:$16 sps:$4 sm:$0xff]  }
 0x1d2   :  { %5571 = vmatmul.mubr.bf16.vlgmr.msra.gmra.mxu0 %v9880_v19  ;;  %v8956_v19 = vld [vmem:[%s12699_s2 + $0x6ac] ss:$16 sps:$4 sm:$0xff]  }
 0x1d3   :  { %5621 = vmatpush1.bf16.msra.mxu0 %v8942_v33  ;;  %5652 = vmatprep.mubr.bf16.mxu0 %v9893_v23  ;;  %v8962_v23 = vld [vmem:[%s12699_s2 + $0x68c] ss:$16 sps:$4 sm:$0xff]   ;;  %v8999_v33 = vld [vmem:[%s12699_s2 + $0x528] ss:$16 sps:$4 sm:$0xff]  }
 0x1d4   :  { %5588 = vmatpush1.bf16.msra.mxu1 %v8939_v28  ;;  %5622 = vmatprep.subr.bf16.mxu0 %v8950_v34  ;;  %v9004_v28 = vld [vmem:[%s12699_s2 + $0x7ac] ss:$16 sps:$4 sm:$0xff]  }
 0x1d5   :  { %5589 = vmatprep.subr.bf16.mxu1 %v8947_v49  ;;  %v9002_v49 = vld [vmem:[%s12699_s2 + $0x7a8] ss:$16 sps:$4 sm:$0xff]   ;;  %v9007_v34 = vld [vmem:[%s12699_s2 + $0x50c] ss:$16 sps:$4 sm:$0xff]  }
 0x1d7   :  { %5623 = vmatpush1.bf16.msra.mxu0 %v8948_v36  ;;  %v9005_v36 = vld [vmem:[%s12699_s2 + $0x508] ss:$16 sps:$4 sm:$0xff]  }
 0x1d8   :  { %5590 = vmatpush1.bf16.msra.mxu1 %v8945_v8  ;;  %5624 = vmatprep.subr.bf16.mxu0 %v8956_v19  ;;  %v9010_v8 = vld [vmem:[%s12699_s2 + $0x78c] ss:$16 sps:$4 sm:$0xff]  }
 0x1d9   :  { %5591 = vmatprep.subr.bf16.mxu1 %v8953_v37  ;;  %v9008_v37 = vld [vmem:[%s12699_s2 + $0x788] ss:$16 sps:$4 sm:$0xff]   ;;  %v9013_v19 = vld [vmem:[%s12699_s2 + $0x76c] ss:$16 sps:$4 sm:$0xff]  }
 0x1db   :  { %5625 = vmatpush1.bf16.msra.mxu0 %v8954_v44  ;;  %v9011_v44 = vld [vmem:[%s12699_s2 + $0x768] ss:$16 sps:$4 sm:$0xff]  }
 0x1dc   :  { %5592 = vmatpush1.bf16.msra.mxu1 %v8951_v40  ;;  %5626 = vmatprep.subr.bf16.mxu0 %v8962_v23  ;;  %v9016_v40 = vld [vmem:[%s12699_s2 + $0x8ec] ss:$16 sps:$4 sm:$0xff]  }
 0x1dd   :  { %5593 = vmatprep.subr.bf16.mxu1 %v8959_v0  ;;  %v9014_v0 = vld [vmem:[%s12699_s2 + $0x8e8] ss:$16 sps:$4 sm:$0xff]   ;;  %v9019_v23 = vld [vmem:[%s12699_s2 + $0x74c] ss:$16 sps:$4 sm:$0xff]  }
 0x1df   :  { %5627 = vmatpush1.bf16.msra.mxu0 %v8960_v46 }
 0x1e0   :  { %5594 = vmatpush1.bf16.msra.mxu1 %v8957_v45  ;;  %5628 = vmatprep.subr.bf16.mxu0 %v8968_v51  ;;  %v9022_v45 = vld [vmem:[%s12699_s2 + $0x8cc] ss:$16 sps:$4 sm:$0xff]  }
 0x1e1   :  { %5595 = vmatprep.subr.bf16.mxu1 %v8965_v48 }
 0x1e3   :  { %5629 = vmatpush1.bf16.msra.mxu0 %v8966_v47  ;;  %v9020_v47 = vld [vmem:[%s12699_s2 + $0x8c8] ss:$16 sps:$4 sm:$0xff]  }
 0x1e4   :  { %5596 = vmatpush2.bf16.msra.mxu1 %v8963_v52  ;;  %5630 = vmatprep.subr.bf16.mxu0 %v8974_v57  ;;  %v9017_v52 = vld [vmem:[%s12699_s2 + $0x748] ss:$16 sps:$4 sm:$0xff]  }
 0x1e5   :  { %5597 = vmatprep.subr.bf16.mxu1 %v8971_v56 }
 0x1e7   :  { %5631 = vmatpush1.bf16.msra.mxu0 %v8972_v35 }
 0x1e8   :  { %5598 = vmatpush2.bf16.msra.mxu1 %v8969_v58  ;;  %5632 = vmatprep.subr.bf16.mxu0 %v8980_v63 }
 0x1e9   :  { %5599 = vmatprep.subr.bf16.mxu1 %v8977_v53 }
 0x1eb   :  { %5633 = vmatpush1.bf16.msra.mxu0 %v8978_v5  ;;  %v9023_v5 = vld [vmem:[%s12699_s2 + $0x728] ss:$16 sps:$4 sm:$0xff]  }
 0x1ec   :  { %5600 = vmatpush2.bf16.msra.mxu1 %v8975_v3  ;;  %5634 = vmatprep.subr.bf16.mxu0 %v8986_v62 }
 0x1ed   :  { %5601 = vmatprep.subr.bf16.mxu1 %v8983_v61  ;;  %v9026_v61 = vld [vmem:[%s12699_s2 + $0x8a8] ss:$16 sps:$4 sm:$0xff]  }
 0x1ef   :  { %5635 = vmatpush1.bf16.msra.mxu0 %v8984_v9  ;;  %v9029_v9 = vld [vmem:[%s12699_s2 + $0x708] ss:$16 sps:$4 sm:$0xff]  }
 0x1f0   :  { %5602 = vmatpush2.bf16.msra.mxu1 %v8981_v1  ;;  %5636 = vmatprep.subr.bf16.mxu0 %v8992_v11  ;;  %v9037_v11 = vld [vmem:[%s12699_s2 + $0x86c] ss:$16 sps:$4 sm:$0xff]  }
 0x1f1   :  { %5603 = vmatprep.subr.bf16.mxu1 %v8989_v10  ;;  %v9032_v10 = vld [vmem:[%s12699_s2 + $0x888] ss:$16 sps:$4 sm:$0xff]  }
 0x1f3   :  { %5637 = vmatpush2.bf16.msra.mxu0 %v8990_v12  ;;  %v9035_v12 = vld [vmem:[%s12699_s2 + $0x868] ss:$16 sps:$4 sm:$0xff]  }
 0x1f4   :  { %5604 = vmatpush2.bf16.msra.mxu1 %v8987_v7  ;;  %5638 = vmatprep.subr.bf16.mxu0 %v8998_v17  ;;  %v9040_v7 = vld [vmem:[%s12699_s2 + $0xaec] ss:$16 sps:$4 sm:$0xff]  }
 0x1f5   :  { %5605 = vmatprep.subr.bf16.mxu1 %v8995_v14  ;;  %v9038_v14 = vld [vmem:[%s12699_s2 + $0xae8] ss:$16 sps:$4 sm:$0xff]   ;;  %v9043_v17 = vld [vmem:[%s12699_s2 + $0x84c] ss:$16 sps:$4 sm:$0xff]  }
 0x1f7   :  { %5639 = vmatpush2.bf16.msra.mxu0 %v8996_v22  ;;  %v9041_v22 = vld [vmem:[%s12699_s2 + $0x848] ss:$16 sps:$4 sm:$0xff]  }
 0x1f8   :  { %5606 = vmatpush2.bf16.msra.mxu1 %v8993_v20  ;;  %5640 = vmatprep.subr.bf16.mxu0 %v9004_v28  ;;  %v9046_v20 = vld [vmem:[%s12699_s2 + $0xacc] ss:$16 sps:$4 sm:$0xff]  }
 0x1f9   :  { %5607 = vmatprep.subr.bf16.mxu1 %v9001_v24  ;;  %v9044_v24 = vld [vmem:[%s12699_s2 + $0xac8] ss:$16 sps:$4 sm:$0xff]   ;;  %v9049_v28 = vld [vmem:[%s12699_s2 + $0x82c] ss:$16 sps:$4 sm:$0xff]  }
 0x1fb   :  { %5641 = vmatpush2.bf16.msra.mxu0 %v9002_v49  ;;  %v9050_v49 = vld [vmem:[%s12699_s2 + $0xaa8] ss:$16 sps:$4 sm:$0xff]  }
 0x1fc   :  { %5608 = vmatpush2.bf16.msra.mxu1 %v8999_v33  ;;  %5642 = vmatprep.subr.bf16.mxu0 %v9010_v8  ;;  %v9047_v33 = vld [vmem:[%s12699_s2 + $0x828] ss:$16 sps:$4 sm:$0xff]  }
 0x1fd   :  { %5609 = vmatprep.subr.bf16.mxu1 %v9007_v34  ;;  %v9055_v34 = vld [vmem:[%s12699_s2 + $0x80c] ss:$16 sps:$4 sm:$0xff]   ;;  %v9053_v8 = vld [vmem:[%s12699_s2 + $0x808] ss:$16 sps:$4 sm:$0xff]  }
 0x1ff   :  { %5643 = vmatpush2.bf16.msra.mxu0 %v9008_v37  ;;  %v9061_v37 = vld [vmem:[%s12699_s2 + $0x9ec] ss:$16 sps:$4 sm:$0xff]  }
 0x200   :  { %5610 = vmatpush2.bf16.msra.mxu1 %v9005_v36  ;;  %5644 = vmatprep.subr.bf16.mxu0 %v9013_v19  ;;  %v9056_v36 = vld [vmem:[%s12699_s2 + $0xa88] ss:$16 sps:$4 sm:$0xff]   ;;  %v9064_v19 = vld [vmem:[%s12699_s2 + $0xa6c] ss:$16 sps:$4 sm:$0xff]  }
 0x201   :  { %5661 = vmatprep.subr.bf16.mxu1 %v9016_v40  ;;  %v9059_v40 = vld [vmem:[%s12699_s2 + $0x9e8] ss:$16 sps:$4 sm:$0xff]  }
 0x202   :  { %v5326_v46 = vpop.f32.mrf.mxu0 }
 0x203   :  { %5612 = vmatmul.mubr.bf16.vlgmr.msra.gmra.mxu1 %v10072_v26  ;;  %v5367_v48 = vpop.f32.mrf.mxu1  ;;  %v5327_v51 = vadd.f32 %v5326_v46, %v11226_v13  ;;  %5645 = vmatpush2.bf16.msra.mxu0 %v9011_v44  ;;  %v9025_v26 = vld [vmem:[%s12699_s2 + $0x72c] ss:$16 sps:$4 sm:$0xff]   ;;  %v9062_v44 = vld [vmem:[%s12699_s2 + $0xa68] ss:$16 sps:$4 sm:$0xff]  }
 0x204   :  { %5662 = vmatpush1.bf16.msra.mxu1 %v9014_v0  ;;  %v5328_v56 = vpop.f32.mrf.mxu0  ;;  %5646 = vmatprep.subr.bf16.mxu0 %v9019_v23  ;;  %v9028_v13 = vld [vmem:[%s12699_s2 + $0x8ac] ss:$16 sps:$4 sm:$0xff]   ;;  %v9068_v46 = vld [vmem:[%s12699_s2 + $0xa48] ss:$16 sps:$4 sm:$0xff]  }
 0x205   :  { %v5369_v57 = vpop.f32.mrf.mxu1  ;;  %5663 = vmatprep.subr.bf16.mxu1 %v9022_v45  ;;  %v5329_v58 = vadd.f32 %v5328_v56, %v11235_v60  ;;  %v11428_v35 = vadd.f32 %v5367_v48, %v5327_v51  ;;  %5693 = vmatprep.mubr.bf16.mxu1 %v10125_v41  ;;  %v9031_v41 = vld [vmem:[%s12699_s2 + $0x70c] ss:$16 sps:$4 sm:$0xff]   ;;  %v9065_v45 = vld [vmem:[%s12699_s2 + $0x9c8] ss:$16 sps:$4 sm:$0xff]  }
 0x206   :  { %v5330_v53 = vpop.f32.mrf.mxu0  ;;  %v9034_v60 = vld [vmem:[%s12699_s2 + $0x88c] ss:$16 sps:$4 sm:$0xff]  }
 0x207   :  { %v5371_v63 = vpop.f32.mrf.mxu1  ;;  %v11431_v3 = vadd.f32 %v5369_v57, %v5329_v58  ;;  %5647 = vmatpush2.bf16.msra.mxu0 %v9017_v52  ;;  %v9067_v0 = vld [vmem:[%s12699_s2 + $0x9cc] ss:$16 sps:$4 sm:$0xff]   ;;  %v9071_v52 = vld [vmem:[%s12699_s2 + $0x9a8] ss:$16 sps:$4 sm:$0xff]  }
 0x208   :  { %5664 = vmatpush1.bf16.msra.mxu1 %v9020_v47  ;;  %v5331_v62 = vpop.f32.mrf.mxu0  ;;  %5648 = vmatprep.subr.bf16.mxu0 %v9025_v26  ;;  %v9070_v23 = vld [vmem:[%s12699_s2 + $0xa4c] ss:$16 sps:$4 sm:$0xff]   ;;  %v9074_v47 = vld [vmem:[%s12699_s2 + $0xa28] ss:$16 sps:$4 sm:$0xff]  }
 0x209   :  { %5665 = vmatprep.subr.bf16.mxu1 %v9028_v13  ;;  %v5372_v1 = vpop.f32.mrf.mxu1  ;;  %v9073_v48 = vld [vmem:[%s12699_s2 + $0x9ac] ss:$16 sps:$4 sm:$0xff]   ;;  %v9077_v26 = vld [vmem:[%s12699_s2 + $0x988] ss:$16 sps:$4 sm:$0xff]  }
 0x20a   :  { %v9076_v51 = vld [vmem:[%s12699_s2 + $0xa2c] ss:$16 sps:$4 sm:$0xff]   ;;  %v9080_v13 = vld [vmem:[%s12699_s2 + $0xa08] ss:$16 sps:$4 sm:$0xff]  }
 0x20b   :  { %5649 = vmatpush2.bf16.msra.mxu0 %v9023_v5  ;;  %v9079_v56 = vld [vmem:[%s12699_s2 + $0x98c] ss:$16 sps:$4 sm:$0xff]   ;;  %v9083_v63 = vld [vmem:[%s12699_s2 + $0x968] ss:$16 sps:$4 sm:$0xff]  }
 0x20c   :  { %5666 = vmatpush1.bf16.msra.mxu1 %v9026_v61  ;;  %5650 = vmatprep.subr.bf16.mxu0 %v9031_v41  ;;  %v9082_v57 = vld [vmem:[%s12699_s2 + $0xa0c] ss:$16 sps:$4 sm:$0xff]   ;;  %v9086_v5 = vld [vmem:[%s12699_s2 + $0xbe8] ss:$16 sps:$4 sm:$0xff]  }
 0x20d   :  { %5667 = vmatprep.subr.bf16.mxu1 %v9034_v60  ;;  %v9085_v58 = vld [vmem:[%s12699_s2 + $0x96c] ss:$16 sps:$4 sm:$0xff]   ;;  %v9089_v41 = vld [vmem:[%s12699_s2 + $0x948] ss:$16 sps:$4 sm:$0xff]  }
 0x20e   :  { %v9088_v53 = vld [vmem:[%s12699_s2 + $0xbec] ss:$16 sps:$4 sm:$0xff]   ;;  %v9092_v60 = vld [vmem:[%s12699_s2 + $0xbc8] ss:$16 sps:$4 sm:$0xff]  }
 0x20f   :  { %5651 = vmatpush2.bf16.msra.mxu0 %v9029_v9  ;;  %v9091_v61 = vld [vmem:[%s12699_s2 + $0x94c] ss:$16 sps:$4 sm:$0xff]  }
 0x210   :  { %5668 = vmatpush1.bf16.msra.mxu1 %v9032_v10  ;;  %5702 = vmatprep.subr.bf16.mxu0 %v9040_v7  ;;  %v9094_v62 = vld [vmem:[%s12699_s2 + $0xbcc] ss:$16 sps:$4 sm:$0xff]   ;;  %v9095_v10 = vld [vmem:[%s12699_s2 + $0x928] ss:$16 sps:$4 sm:$0xff]  }
 0x211   :  { %5669 = vmatprep.subr.bf16.mxu1 %v9037_v11  ;;  %v9097_v1 = vld [vmem:[%s12699_s2 + $0x92c] ss:$16 sps:$4 sm:$0xff]   ;;  %v9098_v11 = vld [vmem:[%s12699_s2 + $0xba8] ss:$16 sps:$4 sm:$0xff]  }
 0x212   :  { %5653 = vmatmul.mubr.bf16.vlgmr.msra.gmra.mxu0 %v10088_v30  ;;  %v9052_v30 = vld [vmem:[%s12699_s2 + $0xaac] ss:$16 sps:$4 sm:$0xff]  }
 0x213   :  { %5703 = vmatpush1.bf16.msra.mxu0 %v9038_v14  ;;  %5734 = vmatprep.mubr.bf16.mxu0 %v10130_v43  ;;  %v9058_v43 = vld [vmem:[%s12699_s2 + $0xa8c] ss:$16 sps:$4 sm:$0xff]   ;;  %v9101_v14 = vld [vmem:[%s12699_s2 + $0x908] ss:$16 sps:$4 sm:$0xff]  }
 0x214   :  { %5670 = vmatpush1.bf16.msra.mxu1 %v9035_v12  ;;  %5704 = vmatprep.subr.bf16.mxu0 %v9046_v20  ;;  %v9100_v9 = vld [vmem:[%s12699_s2 + $0xbac] ss:$16 sps:$4 sm:$0xff]  }
 0x215   :  { %5671 = vmatprep.subr.bf16.mxu1 %v9043_v17  ;;  %v9103_v7 = vld [vmem:[%s12699_s2 + $0x90c] ss:$16 sps:$4 sm:$0xff]   ;;  %v9104_v17 = vld [vmem:[%s12699_s2 + $0xb88] ss:$16 sps:$4 sm:$0xff]  }
 0x216   :  { %v9106_v12 = vld [vmem:[%s12699_s2 + $0xb8c] ss:$16 sps:$4 sm:$0xff]  }
 0x217   :  { %5705 = vmatpush1.bf16.msra.mxu0 %v9044_v24  ;;  %v9109_v20 = vld [vmem:[%s12699_s2 + $0xb6c] ss:$16 sps:$4 sm:$0xff]   ;;  %v9107_v24 = vld [vmem:[%s12699_s2 + $0xb68] ss:$16 sps:$4 sm:$0xff]  }
 0x218   :  { %5672 = vmatpush1.bf16.msra.mxu1 %v9041_v22  ;;  %5706 = vmatprep.subr.bf16.mxu0 %v9052_v30  ;;  %v9112_v22 = vld [vmem:[%s12699_s2 + $0xcec] ss:$16 sps:$4 sm:$0xff]  }
 0x219   :  { %5673 = vmatprep.subr.bf16.mxu1 %v9049_v28  ;;  %v9110_v28 = vld [vmem:[%s12699_s2 + $0xce8] ss:$16 sps:$4 sm:$0xff]   ;;  %v9115_v30 = vld [vmem:[%s12699_s2 + $0xb4c] ss:$16 sps:$4 sm:$0xff]  }
 0x21b   :  { %5707 = vmatpush1.bf16.msra.mxu0 %v9050_v49 }
 0x21c   :  { %5674 = vmatpush1.bf16.msra.mxu1 %v9047_v33  ;;  %5708 = vmatprep.subr.bf16.mxu0 %v9058_v43  ;;  %v9118_v33 = vld [vmem:[%s12699_s2 + $0xccc] ss:$16 sps:$4 sm:$0xff]  }
 0x21d   :  { %5675 = vmatprep.subr.bf16.mxu1 %v9055_v34 }
 0x21f   :  { %5709 = vmatpush1.bf16.msra.mxu0 %v9056_v36  ;;  %v9116_v36 = vld [vmem:[%s12699_s2 + $0xcc8] ss:$16 sps:$4 sm:$0xff]  }
 0x220   :  { %5676 = vmatpush1.bf16.msra.mxu1 %v9053_v8  ;;  %5710 = vmatprep.subr.bf16.mxu0 %v9064_v19  ;;  %v9113_v8 = vld [vmem:[%s12699_s2 + $0xb48] ss:$16 sps:$4 sm:$0xff]  }
 0x221   :  { %5677 = vmatprep.subr.bf16.mxu1 %v9061_v37 }
 0x223   :  { %5711 = vmatpush1.bf16.msra.mxu0 %v9062_v44 }
 0x224   :  { %5678 = vmatpush2.bf16.msra.mxu1 %v9059_v40  ;;  %5712 = vmatprep.subr.bf16.mxu0 %v9070_v23 }
 0x225   :  { %5679 = vmatprep.subr.bf16.mxu1 %v9067_v0 }
 0x227   :  { %5713 = vmatpush1.bf16.msra.mxu0 %v9068_v46  ;;  %v9119_v46 = vld [vmem:[%s12699_s2 + $0xb28] ss:$16 sps:$4 sm:$0xff]  }
 0x228   :  { %5680 = vmatpush2.bf16.msra.mxu1 %v9065_v45  ;;  %5714 = vmatprep.subr.bf16.mxu0 %v9076_v51 }
 0x229   :  { %5681 = vmatprep.subr.bf16.mxu1 %v9073_v48  ;;  %v9122_v48 = vld [vmem:[%s12699_s2 + $0xca8] ss:$16 sps:$4 sm:$0xff]  }
 0x22b   :  { %5715 = vmatpush1.bf16.msra.mxu0 %v9074_v47  ;;  %v9125_v47 = vld [vmem:[%s12699_s2 + $0xb08] ss:$16 sps:$4 sm:$0xff]  }
 0x22c   :  { %5682 = vmatpush2.bf16.msra.mxu1 %v9071_v52  ;;  %5716 = vmatprep.subr.bf16.mxu0 %v9082_v57  ;;  %v9133_v57 = vld [vmem:[%s12699_s2 + $0xc6c] ss:$16 sps:$4 sm:$0xff]  }
 0x22d   :  { %5683 = vmatprep.subr.bf16.mxu1 %v9079_v56  ;;  %v9128_v56 = vld [vmem:[%s12699_s2 + $0xc88] ss:$16 sps:$4 sm:$0xff]  }
 0x22f   :  { %5717 = vmatpush1.bf16.msra.mxu0 %v9080_v13  ;;  %v9131_v13 = vld [vmem:[%s12699_s2 + $0xc68] ss:$16 sps:$4 sm:$0xff]  }
 0x230   :  { %5684 = vmatpush2.bf16.msra.mxu1 %v9077_v26  ;;  %5718 = vmatprep.subr.bf16.mxu0 %v9088_v53  ;;  %v9136_v26 = vld [vmem:[%s12699_s2 + $0xeec] ss:$16 sps:$4 sm:$0xff]  }
 0x231   :  { %5685 = vmatprep.subr.bf16.mxu1 %v9085_v58  ;;  %v9134_v58 = vld [vmem:[%s12699_s2 + $0xee8] ss:$16 sps:$4 sm:$0xff]   ;;  %v9139_v53 = vld [vmem:[%s12699_s2 + $0xc4c] ss:$16 sps:$4 sm:$0xff]  }
 0x233   :  { %5719 = vmatpush2.bf16.msra.mxu0 %v9086_v5 }
 0x234   :  { %5686 = vmatpush2.bf16.msra.mxu1 %v9083_v63  ;;  %5720 = vmatprep.subr.bf16.mxu0 %v9094_v62  ;;  %v9142_v63 = vld [vmem:[%s12699_s2 + $0xecc] ss:$16 sps:$4 sm:$0xff]   ;;  %v9137_v62 = vld [vmem:[%s12699_s2 + $0xc48] ss:$16 sps:$4 sm:$0xff]  }
 0x235   :  { %5687 = vmatprep.subr.bf16.mxu1 %v9091_v61 }
 0x237   :  { %5721 = vmatpush2.bf16.msra.mxu0 %v9092_v60 }
 0x238   :  { %5688 = vmatpush2.bf16.msra.mxu1 %v9089_v41  ;;  %5722 = vmatprep.subr.bf16.mxu0 %v9100_v9  ;;  %v9140_v41 = vld [vmem:[%s12699_s2 + $0xec8] ss:$16 sps:$4 sm:$0xff]  }
 0x239   :  { %5689 = vmatprep.subr.bf16.mxu1 %v9097_v1  ;;  %v9145_v1 = vld [vmem:[%s12699_s2 + $0xc2c] ss:$16 sps:$4 sm:$0xff]  }
 0x23b   :  { %5723 = vmatpush2.bf16.msra.mxu0 %v9098_v11  ;;  %v9143_v11 = vld [vmem:[%s12699_s2 + $0xc28] ss:$16 sps:$4 sm:$0xff]  }
 0x23c   :  { %5690 = vmatpush2.bf16.msra.mxu1 %v9095_v10  ;;  %5724 = vmatprep.subr.bf16.mxu0 %v9106_v12 }
 0x23d   :  { %5691 = vmatprep.subr.bf16.mxu1 %v9103_v7  ;;  %v9146_v7 = vld [vmem:[%s12699_s2 + $0xea8] ss:$16 sps:$4 sm:$0xff]  }
 0x23f   :  { %5725 = vmatpush2.bf16.msra.mxu0 %v9104_v17  ;;  %v9149_v17 = vld [vmem:[%s12699_s2 + $0xc08] ss:$16 sps:$4 sm:$0xff]  }
 0x240   :  { %5692 = vmatpush2.bf16.msra.mxu1 %v9101_v14  ;;  %5726 = vmatprep.subr.bf16.mxu0 %v9109_v20  ;;  %v9151_v14 = vld [vmem:[%s12699_s2 + $0xc0c] ss:$16 sps:$4 sm:$0xff]   ;;  %v9152_v20 = vld [vmem:[%s12699_s2 + $0xe88] ss:$16 sps:$4 sm:$0xff]  }
 0x241   :  { %5743 = vmatprep.subr.bf16.mxu1 %v9112_v22  ;;  %v9157_v22 = vld [vmem:[%s12699_s2 + $0xdec] ss:$16 sps:$4 sm:$0xff]  }
 0x242   :  { %v5408_v49 = vpop.f32.mrf.mxu0 }
 0x243   :  { %5694 = vmatmul.mubr.bf16.vlgmr.msra.gmra.mxu1 %v10301_v50  ;;  %v5449_v34 = vpop.f32.mrf.mxu1  ;;  %v5409_v43 = vadd.f32 %v5408_v49, %v11428_v35  ;;  %5727 = vmatpush2.bf16.msra.mxu0 %v9107_v24  ;;  %v9121_v50 = vld [vmem:[%s12699_s2 + $0xb2c] ss:$16 sps:$4 sm:$0xff]  }
 0x244   :  { %5744 = vmatpush1.bf16.msra.mxu1 %v9110_v28  ;;  %v5410_v37 = vpop.f32.mrf.mxu0  ;;  %5728 = vmatprep.subr.bf16.mxu0 %v9115_v30  ;;  %v9124_v35 = vld [vmem:[%s12699_s2 + $0xcac] ss:$16 sps:$4 sm:$0xff]   ;;  %v9155_v28 = vld [vmem:[%s12699_s2 + $0xde8] ss:$16 sps:$4 sm:$0xff]  }
 0x245   :  { %v5451_v19 = vpop.f32.mrf.mxu1  ;;  %5745 = vmatprep.subr.bf16.mxu1 %v9118_v33  ;;  %v5411_v40 = vadd.f32 %v5410_v37, %v11431_v3  ;;  %v5450_v44 = vadd.f32 %v5449_v34, %v5409_v43  ;;  %5775 = vmatprep.mubr.bf16.mxu1 %v10313_v54  ;;  %v9127_v54 = vld [vmem:[%s12699_s2 + $0xb0c] ss:$16 sps:$4 sm:$0xff]   ;;  %v9158_v30 = vld [vmem:[%s12699_s2 + $0xe68] ss:$16 sps:$4 sm:$0xff]  }
 0x246   :  { %v5412_v0 = vpop.f32.mrf.mxu0  ;;  %v9130_v3 = vld [vmem:[%s12699_s2 + $0xc8c] ss:$16 sps:$4 sm:$0xff]   ;;  %v9161_v34 = vld [vmem:[%s12699_s2 + $0xdc8] ss:$16 sps:$4 sm:$0xff]  }
 0x247   :  { %v5453_v23 = vpop.f32.mrf.mxu1  ;;  %v5452_v45 = vadd.f32 %v5451_v19, %v5411_v40  ;;  %5729 = vmatpush2.bf16.msra.mxu0 %v9113_v8  ;;  %v9160_v24 = vld [vmem:[%s12699_s2 + $0xe6c] ss:$16 sps:$4 sm:$0xff]   ;;  %v9164_v43 = vld [vmem:[%s12699_s2 + $0xe48] ss:$16 sps:$4 sm:$0xff]  }
 0x248   :  { %5746 = vmatpush1.bf16.msra.mxu1 %v9116_v36  ;;  %v5413_v51 = vpop.f32.mrf.mxu0  ;;  %5730 = vmatprep.subr.bf16.mxu0 %v9121_v50  ;;  %v9163_v33 = vld [vmem:[%s12699_s2 + $0xdcc] ss:$16 sps:$4 sm:$0xff]   ;;  %v9167_v37 = vld [vmem:[%s12699_s2 + $0xda8] ss:$16 sps:$4 sm:$0xff]  }
 0x249   :  { %5747 = vmatprep.subr.bf16.mxu1 %v9124_v35  ;;  %v5454_v52 = vpop.f32.mrf.mxu1  ;;  %v9166_v49 = vld [vmem:[%s12699_s2 + $0xe4c] ss:$16 sps:$4 sm:$0xff]   ;;  %v9170_v19 = vld [vmem:[%s12699_s2 + $0xe28] ss:$16 sps:$4 sm:$0xff]  }
 0x24a   :  { %v9169_v8 = vld [vmem:[%s12699_s2 + $0xdac] ss:$16 sps:$4 sm:$0xff]   ;;  %v9173_v40 = vld [vmem:[%s12699_s2 + $0xd88] ss:$16 sps:$4 sm:$0xff]  }
 0x24b   :  { %5731 = vmatpush2.bf16.msra.mxu0 %v9119_v46  ;;  %v9172_v36 = vld [vmem:[%s12699_s2 + $0xe2c] ss:$16 sps:$4 sm:$0xff]   ;;  %v9182_v46 = vld [vmem:[%s12699_s2 + $0xfe8] ss:$16 sps:$4 sm:$0xff]  }
 0x24c   :  { %5748 = vmatpush1.bf16.msra.mxu1 %v9122_v48  ;;  %5732 = vmatprep.subr.bf16.mxu0 %v9127_v54  ;;  %v9175_v50 = vld [vmem:[%s12699_s2 + $0xd8c] ss:$16 sps:$4 sm:$0xff]   ;;  %v9185_v54 = vld [vmem:[%s12699_s2 + $0xd48] ss:$16 sps:$4 sm:$0xff]  }
 0x24d   :  { %5749 = vmatprep.subr.bf16.mxu1 %v9130_v3  ;;  %v9178_v35 = vld [vmem:[%s12699_s2 + $0xe0c] ss:$16 sps:$4 sm:$0xff]   ;;  %v9188_v3 = vld [vmem:[%s12699_s2 + $0xfc8] ss:$16 sps:$4 sm:$0xff]  }
 0x24e   :  { %v9181_v0 = vld [vmem:[%s12699_s2 + $0xd6c] ss:$16 sps:$4 sm:$0xff]  }
 0x24f   :  { %5733 = vmatpush2.bf16.msra.mxu0 %v9125_v47  ;;  %v9184_v23 = vld [vmem:[%s12699_s2 + $0xfec] ss:$16 sps:$4 sm:$0xff]  }
 0x250   :  { %5750 = vmatpush1.bf16.msra.mxu1 %v9128_v56  ;;  %5784 = vmatprep.subr.bf16.mxu0 %v9136_v26  ;;  %v9187_v48 = vld [vmem:[%s12699_s2 + $0xd4c] ss:$16 sps:$4 sm:$0xff]   ;;  %v9191_v56 = vld [vmem:[%s12699_s2 + $0xd28] ss:$16 sps:$4 sm:$0xff]  }
 0x251   :  { %5751 = vmatprep.subr.bf16.mxu1 %v9133_v57  ;;  %v9190_v51 = vld [vmem:[%s12699_s2 + $0xfcc] ss:$16 sps:$4 sm:$0xff]   ;;  %v9194_v57 = vld [vmem:[%s12699_s2 + $0xfa8] ss:$16 sps:$4 sm:$0xff]  }
 0x252   :  { %v5490_v5 = vpop.f32.mrf.mxu0  ;;  %5735 = vmatmul.mubr.bf16.vlgmr.msra.gmra.mxu0 %v10320_v55  ;;  %v9148_v55 = vld [vmem:[%s12699_s2 + $0xeac] ss:$16 sps:$4 sm:$0xff]  }
 0x253   :  { %v11668_v61 = vadd.f32 %v5490_v5, %v5450_v44  ;;  %5785 = vmatpush1.bf16.msra.mxu0 %v9134_v58  ;;  %5816 = vmatprep.mubr.bf16.mxu0 %v10333_v59  ;;  %v9154_v59 = vld [vmem:[%s12699_s2 + $0xe8c] ss:$16 sps:$4 sm:$0xff]   ;;  %v9176_v44 = vld [vmem:[%s12699_s2 + $0xe08] ss:$16 sps:$4 sm:$0xff]  }
 0x254   :  { %5752 = vmatpush1.bf16.msra.mxu1 %v9131_v13  ;;  %v5492_v60 = vpop.f32.mrf.mxu0  ;;  %5786 = vmatprep.subr.bf16.mxu0 %v9142_v63  ;;  %v9193_v52 = vld [vmem:[%s12699_s2 + $0xd2c] ss:$16 sps:$4 sm:$0xff]   ;;  %v9197_v58 = vld [vmem:[%s12699_s2 + $0xd08] ss:$16 sps:$4 sm:$0xff]  }
 0x255   :  { %5753 = vmatprep.subr.bf16.mxu1 %v9139_v53  ;;  %v11682_v9 = vadd.f32 %v5492_v60, %v5452_v45  ;;  %v9179_v45 = vld [vmem:[%s12699_s2 + $0xd68] ss:$16 sps:$4 sm:$0xff]   ;;  %v9196_v47 = vld [vmem:[%s12699_s2 + $0xfac] ss:$16 sps:$4 sm:$0xff]  }
 0x256   :  { %v5494_v10 = vpop.f32.mrf.mxu0  ;;  %v9199_v26 = vld [vmem:[%s12699_s2 + $0xd0c] ss:$16 sps:$4 sm:$0xff]   ;;  %v9200_v53 = vld [vmem:[%s12699_s2 + $0xf88] ss:$16 sps:$4 sm:$0xff]  }
 0x257   :  { %5787 = vmatpush1.bf16.msra.mxu0 %v9140_v41  ;;  %v9202_v13 = vld [vmem:[%s12699_s2 + $0xf8c] ss:$16 sps:$4 sm:$0xff]   ;;  %v9206_v41 = vld [vmem:[%s12699_s2 + $0x10e8] ss:$16 sps:$4 sm:$0xff]  }
 0x258   :  { %5754 = vmatpush1.bf16.msra.mxu1 %v9137_v62  ;;  %v5495_v12 = vpop.f32.mrf.mxu0  ;;  %5788 = vmatprep.subr.bf16.mxu0 %v9148_v55  ;;  %v9205_v63 = vld [vmem:[%s12699_s2 + $0xf6c] ss:$16 sps:$4 sm:$0xff]   ;;  %v9203_v62 = vld [vmem:[%s12699_s2 + $0xf68] ss:$16 sps:$4 sm:$0xff]  }
 0x259   :  { %5755 = vmatprep.subr.bf16.mxu1 %v9145_v1  ;;  %v9208_v5 = vld [vmem:[%s12699_s2 + $0x10ec] ss:$16 sps:$4 sm:$0xff]   ;;  %v9209_v10 = vld [vmem:[%s12699_s2 + $0xf48] ss:$16 sps:$4 sm:$0xff]  }
 0x25a   :  { %v9211_v60 = vld [vmem:[%s12699_s2 + $0xf4c] ss:$16 sps:$4 sm:$0xff]  }
 0x25b   :  { %5789 = vmatpush1.bf16.msra.mxu0 %v9146_v7  ;;  %v9214_v1 = vld [vmem:[%s12699_s2 + $0x10cc] ss:$16 sps:$4 sm:$0xff]  }
 0x25c   :  { %5756 = vmatpush1.bf16.msra.mxu1 %v9143_v11  ;;  %5790 = vmatprep.subr.bf16.mxu0 %v9154_v59  ;;  %v9212_v11 = vld [vmem:[%s12699_s2 + $0x10c8] ss:$16 sps:$4 sm:$0xff]   ;;  %v9217_v7 = vld [vmem:[%s12699_s2 + $0xf2c] ss:$16 sps:$4 sm:$0xff]  }
 0x25d   :  { %5757 = vmatprep.subr.bf16.mxu1 %v9151_v14  ;;  %v9215_v59 = vld [vmem:[%s12699_s2 + $0xf28] ss:$16 sps:$4 sm:$0xff]  }
 0x25f   :  { %5791 = vmatpush1.bf16.msra.mxu0 %v9152_v20  ;;  %v11838_v20 = vsub.s32 2, %v9765_v42 }
 0x260   :  { %5758 = vmatpush1.bf16.msra.mxu1 %v9149_v17  ;;  %5792 = vmatprep.subr.bf16.mxu0 %v9160_v24  ;;  %v9218_v17 = vld [vmem:[%s12699_s2 + $0x10a8] ss:$16 sps:$4 sm:$0xff]  }
 0x261   :  { %5759 = vmatprep.subr.bf16.mxu1 %v9157_v22  ;;  %v9226_v22 = vld [vmem:[%s12699_s2 + $0x108c] ss:$16 sps:$4 sm:$0xff]  }
 0x263   :  { %5793 = vmatpush1.bf16.msra.mxu0 %v9158_v30  ;;  %v9221_v30 = vld [vmem:[%s12699_s2 + $0xf08] ss:$16 sps:$4 sm:$0xff]  }
 0x264   :  { %5760 = vmatpush2.bf16.msra.mxu1 %v9155_v28  ;;  %5794 = vmatprep.subr.bf16.mxu0 %v9166_v49  ;;  %v845_v28 = vsub.s32 3, %v9765_v42  ;;  %v9583_v49 = vld [vmem:[%s12701_s3] sm:$0xf]  ;;  %v9229_v42 = vld [vmem:[%s12699_s2 + $0x106c] ss:$16 sps:$4 sm:$0xff]  }
 0x265   :  { %5761 = vmatprep.subr.bf16.mxu1 %v9163_v33  ;;  %v9224_v33 = vld [vmem:[%s12699_s2 + $0x1088] ss:$16 sps:$4 sm:$0xff]  }
 0x267   :  { %5795 = vmatpush1.bf16.msra.mxu0 %v9164_v43  ;;  %v9232_v43 = vld [vmem:[%s12699_s2 + $0x12ec] ss:$16 sps:$4 sm:$0xff]  }
 0x268   :  { %5762 = vmatpush2.bf16.msra.mxu1 %v9161_v34  ;;  %5796 = vmatprep.subr.bf16.mxu0 %v9172_v36  ;;  %v842_v34 = vrot.slane %v9583_v49, %v11838_v20 }
 0x269   :  { %5763 = vmatprep.subr.bf16.mxu1 %v9169_v8  ;;  %v846_v8 = vrot.slane %v9583_v49, %v845_v28  ;;  %v9286_v28 = vld [vmem:[%s12699_s2 + $0x13cc] ss:$16 sps:$4 sm:$0xff]  }
 0x26a   :  { %v9289_v49 = vld [vmem:[%s12699_s2 + $0x112c] ss:$16 sps:$4 sm:$0xff]  }
 0x26b   :  { %5797 = vmatpush1.bf16.msra.mxu0 %v9170_v19  ;;  %v9230_v19 = vld [vmem:[%s12699_s2 + $0x12e8] ss:$16 sps:$4 sm:$0xff]  }
 0x26c   :  { %5764 = vmatpush2.bf16.msra.mxu1 %v9167_v37  ;;  %5798 = vmatprep.subr.bf16.mxu0 %v9178_v35  ;;  %v9227_v37 = vld [vmem:[%s12699_s2 + $0x1068] ss:$16 sps:$4 sm:$0xff]   ;;  %v9238_v35 = vld [vmem:[%s12699_s2 + $0x12cc] ss:$16 sps:$4 sm:$0xff]  }
 0x26d   :  { %5765 = vmatprep.subr.bf16.mxu1 %v9175_v50  ;;  %v9235_v50 = vld [vmem:[%s12699_s2 + $0x104c] ss:$16 sps:$4 sm:$0xff]  }
 0x26f   :  { %5799 = vmatpush1.bf16.msra.mxu0 %v9176_v44  ;;  %v9233_v44 = vld [vmem:[%s12699_s2 + $0x1048] ss:$16 sps:$4 sm:$0xff]  }
 0x270   :  { %5766 = vmatpush2.bf16.msra.mxu1 %v9173_v40  ;;  %5800 = vmatprep.subr.bf16.mxu0 %v9184_v23 }
 0x271   :  { %5767 = vmatprep.subr.bf16.mxu1 %v9181_v0  ;;  %v9236_v0 = vld [vmem:[%s12699_s2 + $0x12c8] ss:$16 sps:$4 sm:$0xff]  }
 0x273   :  { %5801 = vmatpush2.bf16.msra.mxu0 %v9182_v46 }
 0x274   :  { %5768 = vmatpush2.bf16.msra.mxu1 %v9179_v45  ;;  %5802 = vmatprep.subr.bf16.mxu0 %v9190_v51  ;;  %v9244_v51 = vld [vmem:[%s12699_s2 + $0x12ac] ss:$16 sps:$4 sm:$0xff]  }
 0x275   :  { %5769 = vmatprep.subr.bf16.mxu1 %v9187_v48  ;;  %v9241_v48 = vld [vmem:[%s12699_s2 + $0x102c] ss:$16 sps:$4 sm:$0xff]  }
 0x277   :  { %5803 = vmatpush2.bf16.msra.mxu0 %v9188_v3  ;;  %v9239_v3 = vld [vmem:[%s12699_s2 + $0x1028] ss:$16 sps:$4 sm:$0xff]  }
 0x278   :  { %5770 = vmatpush2.bf16.msra.mxu1 %v9185_v54  ;;  %5804 = vmatprep.subr.bf16.mxu0 %v9196_v47 }
 0x279   :  { %5771 = vmatprep.subr.bf16.mxu1 %v9193_v52  ;;  %v9242_v52 = vld [vmem:[%s12699_s2 + $0x12a8] ss:$16 sps:$4 sm:$0xff]  }
 0x27b   :  { %5805 = vmatpush2.bf16.msra.mxu0 %v9194_v57  ;;  %v9245_v57 = vld [vmem:[%s12699_s2 + $0x1008] ss:$16 sps:$4 sm:$0xff]  }
 0x27c   :  { %5772 = vmatpush2.bf16.msra.mxu1 %v9191_v56  ;;  %5806 = vmatprep.subr.bf16.mxu0 %v9202_v13  ;;  %v9247_v56 = vld [vmem:[%s12699_s2 + $0x100c] ss:$16 sps:$4 sm:$0xff]  }
 0x27d   :  { %5773 = vmatprep.subr.bf16.mxu1 %v9199_v26  ;;  %v9248_v26 = vld [vmem:[%s12699_s2 + $0x1288] ss:$16 sps:$4 sm:$0xff]   ;;  %v9253_v13 = vld [vmem:[%s12699_s2 + $0x11ec] ss:$16 sps:$4 sm:$0xff]  }
 0x27f   :  { %5807 = vmatpush2.bf16.msra.mxu0 %v9200_v53  ;;  %v9251_v53 = vld [vmem:[%s12699_s2 + $0x11e8] ss:$16 sps:$4 sm:$0xff]  }
 0x280   :  { %5774 = vmatpush2.bf16.msra.mxu1 %v9197_v58  ;;  %5808 = vmatprep.subr.bf16.mxu0 %v9205_v63  ;;  %v9256_v58 = vld [vmem:[%s12699_s2 + $0x126c] ss:$16 sps:$4 sm:$0xff]   ;;  %v9254_v63 = vld [vmem:[%s12699_s2 + $0x1268] ss:$16 sps:$4 sm:$0xff]  }
 0x281   :  { %5825 = vmatprep.subr.bf16.mxu1 %v9208_v5  ;;  %v9259_v5 = vld [vmem:[%s12699_s2 + $0x11cc] ss:$16 sps:$4 sm:$0xff]  }
 0x283   :  { %5776 = vmatmul.mubr.bf16.vlgmr.msra.gmra.mxu1 %v10529_v15  ;;  %v5531_v55 = vpop.f32.mrf.mxu1  ;;  %5809 = vmatpush2.bf16.msra.mxu0 %v9203_v62  ;;  %v9220_v15 = vld [vmem:[%s12699_s2 + $0x10ac] ss:$16 sps:$4 sm:$0xff]  }
 0x284   :  { %5826 = vmatpush1.bf16.msra.mxu1 %v9206_v41  ;;  %5810 = vmatprep.subr.bf16.mxu0 %v9211_v60  ;;  %v5532_v36 = vadd.f32 %v5531_v55, %v842_v34  ;;  %v9262_v62 = vld [vmem:[%s12699_s2 + $0x124c] ss:$16 sps:$4 sm:$0xff]   ;;  %v9257_v41 = vld [vmem:[%s12699_s2 + $0x11c8] ss:$16 sps:$4 sm:$0xff]  }
 0x285   :  { %5827 = vmatprep.subr.bf16.mxu1 %v9214_v1  ;;  %v5533_v12 = vpop.f32.mrf.mxu1  ;;  %5857 = vmatprep.mubr.bf16.mxu1 %v10544_v39  ;;  %v9223_v39 = vld [vmem:[%s12699_s2 + $0xf0c] ss:$16 sps:$4 sm:$0xff]   ;;  %v9260_v60 = vld [vmem:[%s12699_s2 + $0x1248] ss:$16 sps:$4 sm:$0xff]  }
 0x286   :  { %v5534_v40 = vadd.f32 %v5533_v12, %v846_v8  ;;  %v9265_v1 = vld [vmem:[%s12699_s2 + $0x11ac] ss:$16 sps:$4 sm:$0xff]   ;;  %v9269_v12 = vld [vmem:[%s12699_s2 + $0x1188] ss:$16 sps:$4 sm:$0xff]  }
 0x287   :  { %v5535_v14 = vpop.f32.mrf.mxu1  ;;  %5811 = vmatpush2.bf16.msra.mxu0 %v9209_v10  ;;  %v9268_v55 = vld [vmem:[%s12699_s2 + $0x122c] ss:$16 sps:$4 sm:$0xff]   ;;  %v9263_v10 = vld [vmem:[%s12699_s2 + $0x11a8] ss:$16 sps:$4 sm:$0xff]  }
 0x288   :  { %5828 = vmatpush1.bf16.msra.mxu1 %v9212_v11  ;;  %5812 = vmatprep.subr.bf16.mxu0 %v9217_v7  ;;  %v9266_v11 = vld [vmem:[%s12699_s2 + $0x1228] ss:$16 sps:$4 sm:$0xff]   ;;  %v9271_v7 = vld [vmem:[%s12699_s2 + $0x118c] ss:$16 sps:$4 sm:$0xff]  }
 0x289   :  { %5829 = vmatprep.subr.bf16.mxu1 %v9220_v15  ;;  %v5536_v24 = vpop.f32.mrf.mxu1  ;;  %v9274_v15 = vld [vmem:[%s12699_s2 + $0x120c] ss:$16 sps:$4 sm:$0xff]   ;;  %v9272_v14 = vld [vmem:[%s12699_s2 + $0x1208] ss:$16 sps:$4 sm:$0xff]  }
 0x28a   :  { %v9283_v24 = vld [vmem:[%s12699_s2 + $0x114c] ss:$16 sps:$4 sm:$0xff]  }
 0x28b   :  { %5813 = vmatpush2.bf16.msra.mxu0 %v9215_v59  ;;  %v9277_v59 = vld [vmem:[%s12699_s2 + $0x116c] ss:$16 sps:$4 sm:$0xff]  }
 0x28c   :  { %5830 = vmatpush1.bf16.msra.mxu1 %v9218_v17  ;;  %5814 = vmatprep.subr.bf16.mxu0 %v9223_v39  ;;  %v9280_v17 = vld [vmem:[%s12699_s2 + $0x13ec] ss:$16 sps:$4 sm:$0xff]   ;;  %v9275_v39 = vld [vmem:[%s12699_s2 + $0x1168] ss:$16 sps:$4 sm:$0xff]  }
 0x28d   :  { %5831 = vmatprep.subr.bf16.mxu1 %v9226_v22  ;;  %v9278_v22 = vld [vmem:[%s12699_s2 + $0x13e8] ss:$16 sps:$4 sm:$0xff]   ;;  %v9292_v34 = vld [vmem:[%s12699_s2 + $0x13ac] ss:$16 sps:$4 sm:$0xff]  }
 0x28e   :  { %v9295_v8 = vld [vmem:[%s12699_s2 + $0x110c] ss:$16 sps:$4 sm:$0xff]  }
 0x28f   :  { %5815 = vmatpush2.bf16.msra.mxu0 %v9221_v30  ;;  %v9281_v30 = vld [vmem:[%s12699_s2 + $0x1148] ss:$16 sps:$4 sm:$0xff]  }
 0x290   :  { %5832 = vmatpush1.bf16.msra.mxu1 %v9224_v33  ;;  %5866 = vmatprep.subr.bf16.mxu0 %v9232_v43  ;;  %v9284_v33 = vld [vmem:[%s12699_s2 + $0x13c8] ss:$16 sps:$4 sm:$0xff]  }
 0x291   :  { %5833 = vmatprep.subr.bf16.mxu1 %v9229_v42  ;;  %v9287_v42 = vld [vmem:[%s12699_s2 + $0x1128] ss:$16 sps:$4 sm:$0xff]  }
 0x292   :  { %v5572_v23 = vpop.f32.mrf.mxu0  ;;  %5817 = vmatmul.mubr.bf16.vlgmr.msra.gmra.mxu0 %v10554_v25  ;;  %v9290_v43 = vld [vmem:[%s12699_s2 + $0x13a8] ss:$16 sps:$4 sm:$0xff]  }
 0x293   :  { %v11882_v45 = vadd.f32 %v5572_v23, %v5532_v36  ;;  %5867 = vmatpush1.bf16.msra.mxu0 %v9230_v19  ;;  %5898 = vmatprep.mubr.bf16.mxu0 %v10566_v31  ;;  %v9250_v31 = vld [vmem:[%s12699_s2 + $0x128c] ss:$16 sps:$4 sm:$0xff]   ;;  %v9296_v19 = vld [vmem:[%s12699_s2 + $0x1388] ss:$16 sps:$4 sm:$0xff]  }
 0x294   :  { %5834 = vmatpush1.bf16.msra.mxu1 %v9227_v37  ;;  %v5574_v46 = vpop.f32.mrf.mxu0  ;;  %5868 = vmatprep.subr.bf16.mxu0 %v9238_v35  ;;  %v9298_v36 = vld [vmem:[%s12699_s2 + $0x138c] ss:$16 sps:$4 sm:$0xff]   ;;  %v9293_v37 = vld [vmem:[%s12699_s2 + $0x1108] ss:$16 sps:$4 sm:$0xff]  }
 0x295   :  { %5835 = vmatprep.subr.bf16.mxu1 %v9235_v50  ;;  %v11890_v54 = vadd.f32 %v5574_v46, %v5534_v40  ;;  %v9301_v50 = vld [vmem:[%s12699_s2 + $0x136c] ss:$16 sps:$4 sm:$0xff]   ;;  %v9299_v40 = vld [vmem:[%s12699_s2 + $0x1368] ss:$16 sps:$4 sm:$0xff]  }
 0x296   :  { %v5576_v25 = vpop.f32.mrf.mxu0  ;;  %v9304_v35 = vld [vmem:[%s12699_s2 + $0x14ec] ss:$16 sps:$4 sm:$0xff]  }
 0x297   :  { %5869 = vmatpush1.bf16.msra.mxu0 %v9236_v0  ;;  %v9307_v0 = vld [vmem:[%s12699_s2 + $0x134c] ss:$16 sps:$4 sm:$0xff]   ;;  %v9308_v25 = vld [vmem:[%s12699_s2 + $0x14c8] ss:$16 sps:$4 sm:$0xff]  }
 0x298   :  { %5836 = vmatpush1.bf16.msra.mxu1 %v9233_v44  ;;  %v5577_v47 = vpop.f32.mrf.mxu0  ;;  %5870 = vmatprep.subr.bf16.mxu0 %v9244_v51  ;;  %v9302_v44 = vld [vmem:[%s12699_s2 + $0x14e8] ss:$16 sps:$4 sm:$0xff]   ;;  %v9310_v23 = vld [vmem:[%s12699_s2 + $0x14cc] ss:$16 sps:$4 sm:$0xff]  }
 0x299   :  { %5837 = vmatprep.subr.bf16.mxu1 %v9241_v48  ;;  %v9305_v51 = vld [vmem:[%s12699_s2 + $0x1348] ss:$16 sps:$4 sm:$0xff]  }
 0x29b   :  { %5871 = vmatpush1.bf16.msra.mxu0 %v9242_v52  ;;  %v9313_v52 = vld [vmem:[%s12699_s2 + $0x132c] ss:$16 sps:$4 sm:$0xff]  }
 0x29c   :  { %5838 = vmatpush1.bf16.msra.mxu1 %v9239_v3  ;;  %5872 = vmatprep.subr.bf16.mxu0 %v9250_v31  ;;  %v9314_v31 = vld [vmem:[%s12699_s2 + $0x14a8] ss:$16 sps:$4 sm:$0xff]  }
 0x29d   :  { %5839 = vmatprep.subr.bf16.mxu1 %v9247_v56  ;;  %v9311_v56 = vld [vmem:[%s12699_s2 + $0x1328] ss:$16 sps:$4 sm:$0xff]  }
 0x29f   :  { %5873 = vmatpush1.bf16.msra.mxu0 %v9248_v26  ;;  %v9317_v26 = vld [vmem:[%s12699_s2 + $0x1308] ss:$16 sps:$4 sm:$0xff]  }
 0x2a0   :  { %5840 = vmatpush1.bf16.msra.mxu1 %v9245_v57  ;;  %5874 = vmatprep.subr.bf16.mxu0 %v9256_v58  ;;  %v9319_v57 = vld [vmem:[%s12699_s2 + $0x130c] ss:$16 sps:$4 sm:$0xff]  }
 0x2a1   :  { %5841 = vmatprep.subr.bf16.mxu1 %v9253_v13  ;;  %v9320_v13 = vld [vmem:[%s12699_s2 + $0x1488] ss:$16 sps:$4 sm:$0xff]   ;;  %v9325_v58 = vld [vmem:[%s12699_s2 + $0x146c] ss:$16 sps:$4 sm:$0xff]  }
 0x2a3   :  { %5875 = vmatpush1.bf16.msra.mxu0 %v9254_v63  ;;  %v9323_v63 = vld [vmem:[%s12699_s2 + $0x1468] ss:$16 sps:$4 sm:$0xff]  }
 0x2a4   :  { %5842 = vmatpush2.bf16.msra.mxu1 %v9251_v53  ;;  %5876 = vmatprep.subr.bf16.mxu0 %v9262_v62  ;;  %v9328_v53 = vld [vmem:[%s12699_s2 + $0x16ec] ss:$16 sps:$4 sm:$0xff]  }
 0x2a5   :  { %5843 = vmatprep.subr.bf16.mxu1 %v9259_v5  ;;  %v9326_v5 = vld [vmem:[%s12699_s2 + $0x16e8] ss:$16 sps:$4 sm:$0xff]   ;;  %v9331_v62 = vld [vmem:[%s12699_s2 + $0x144c] ss:$16 sps:$4 sm:$0xff]  }
 0x2a7   :  { %5877 = vmatpush1.bf16.msra.mxu0 %v9260_v60 }
 0x2a8   :  { %5844 = vmatpush2.bf16.msra.mxu1 %v9257_v41  ;;  %5878 = vmatprep.subr.bf16.mxu0 %v9268_v55  ;;  %v9334_v41 = vld [vmem:[%s12699_s2 + $0x16cc] ss:$16 sps:$4 sm:$0xff]   ;;  %v9329_v55 = vld [vmem:[%s12699_s2 + $0x1448] ss:$16 sps:$4 sm:$0xff]  }
 0x2a9   :  { %5845 = vmatprep.subr.bf16.mxu1 %v9265_v1 }
 0x2ab   :  { %5879 = vmatpush1.bf16.msra.mxu0 %v9266_v11 }
 0x2ac   :  { %5846 = vmatpush2.bf16.msra.mxu1 %v9263_v10  ;;  %5880 = vmatprep.subr.bf16.mxu0 %v9274_v15  ;;  %v9332_v10 = vld [vmem:[%s12699_s2 + $0x16c8] ss:$16 sps:$4 sm:$0xff]  }
 0x2ad   :  { %5847 = vmatprep.subr.bf16.mxu1 %v9271_v7  ;;  %v9337_v7 = vld [vmem:[%s12699_s2 + $0x142c] ss:$16 sps:$4 sm:$0xff]  }
 0x2af   :  { %5881 = vmatpush1.bf16.msra.mxu0 %v9272_v14  ;;  %v9335_v14 = vld [vmem:[%s12699_s2 + $0x1428] ss:$16 sps:$4 sm:$0xff]  }
 0x2b0   :  { %5848 = vmatpush2.bf16.msra.mxu1 %v9269_v12  ;;  %5882 = vmatprep.subr.bf16.mxu0 %v9280_v17 }
 0x2b1   :  { %5849 = vmatprep.subr.bf16.mxu1 %v9277_v59  ;;  %v9338_v59 = vld [vmem:[%s12699_s2 + $0x16a8] ss:$16 sps:$4 sm:$0xff]  }
 0x2b3   :  { %5883 = vmatpush2.bf16.msra.mxu0 %v9278_v22  ;;  %v9341_v22 = vld [vmem:[%s12699_s2 + $0x1408] ss:$16 sps:$4 sm:$0xff]  }
 0x2b4   :  { %5850 = vmatpush2.bf16.msra.mxu1 %v9275_v39  ;;  %5884 = vmatprep.subr.bf16.mxu0 %v9286_v28  ;;  %v9343_v39 = vld [vmem:[%s12699_s2 + $0x140c] ss:$16 sps:$4 sm:$0xff]  }
 0x2b5   :  { %5851 = vmatprep.subr.bf16.mxu1 %v9283_v24  ;;  %v9344_v24 = vld [vmem:[%s12699_s2 + $0x1688] ss:$16 sps:$4 sm:$0xff]   ;;  %v9349_v28 = vld [vmem:[%s12699_s2 + $0x15ec] ss:$16 sps:$4 sm:$0xff]  }
 0x2b7   :  { %5885 = vmatpush2.bf16.msra.mxu0 %v9284_v33  ;;  %v9347_v33 = vld [vmem:[%s12699_s2 + $0x15e8] ss:$16 sps:$4 sm:$0xff]  }
 0x2b8   :  { %5852 = vmatpush2.bf16.msra.mxu1 %v9281_v30  ;;  %5886 = vmatprep.subr.bf16.mxu0 %v9292_v34  ;;  %v9352_v30 = vld [vmem:[%s12699_s2 + $0x166c] ss:$16 sps:$4 sm:$0xff]  }
 0x2b9   :  { %5853 = vmatprep.subr.bf16.mxu1 %v9289_v49  ;;  %v9350_v49 = vld [vmem:[%s12699_s2 + $0x1668] ss:$16 sps:$4 sm:$0xff]   ;;  %v9355_v34 = vld [vmem:[%s12699_s2 + $0x15cc] ss:$16 sps:$4 sm:$0xff]  }
 0x2bb   :  { %5887 = vmatpush2.bf16.msra.mxu0 %v9290_v43  ;;  %v9353_v43 = vld [vmem:[%s12699_s2 + $0x15c8] ss:$16 sps:$4 sm:$0xff]  }
 0x2bc   :  { %5854 = vmatpush2.bf16.msra.mxu1 %v9287_v42  ;;  %5888 = vmatprep.subr.bf16.mxu0 %v9298_v36  ;;  %v9358_v42 = vld [vmem:[%s12699_s2 + $0x164c] ss:$16 sps:$4 sm:$0xff]  }
 0x2bd   :  { %5855 = vmatprep.subr.bf16.mxu1 %v9295_v8  ;;  %v9356_v8 = vld [vmem:[%s12699_s2 + $0x1648] ss:$16 sps:$4 sm:$0xff]   ;;  %v9361_v36 = vld [vmem:[%s12699_s2 + $0x15ac] ss:$16 sps:$4 sm:$0xff]  }
 0x2bf   :  { %5889 = vmatpush2.bf16.msra.mxu0 %v9296_v19  ;;  %v9359_v19 = vld [vmem:[%s12699_s2 + $0x15a8] ss:$16 sps:$4 sm:$0xff]  }
 0x2c0   :  { %5856 = vmatpush2.bf16.msra.mxu1 %v9293_v37  ;;  %5890 = vmatprep.subr.bf16.mxu0 %v9301_v50  ;;  %v9364_v37 = vld [vmem:[%s12699_s2 + $0x162c] ss:$16 sps:$4 sm:$0xff]   ;;  %v9362_v50 = vld [vmem:[%s12699_s2 + $0x1628] ss:$16 sps:$4 sm:$0xff]  }
 0x2c1   :  { %5907 = vmatprep.subr.bf16.mxu1 %v9304_v35  ;;  %v9367_v35 = vld [vmem:[%s12699_s2 + $0x158c] ss:$16 sps:$4 sm:$0xff]  }
 0x2c3   :  { %v5613_v46 = vpop.f32.mrf.mxu1  ;;  %5858 = vmatmul.mubr.bf16.vlgmr.msra.gmra.mxu1 %v10753_v18  ;;  %5891 = vmatpush2.bf16.msra.mxu0 %v9299_v40  ;;  %v9316_v18 = vld [vmem:[%s12699_s2 + $0x14ac] ss:$16 sps:$4 sm:$0xff]  }
 0x2c4   :  { %v5614_v48 = vadd.f32 %v5613_v46, %v11882_v45  ;;  %5908 = vmatpush1.bf16.msra.mxu1 %v9302_v44  ;;  %5892 = vmatprep.subr.bf16.mxu0 %v9307_v0  ;;  %v9370_v40 = vld [vmem:[%s12699_s2 + $0x160c] ss:$16 sps:$4 sm:$0xff]   ;;  %v9365_v44 = vld [vmem:[%s12699_s2 + $0x1588] ss:$16 sps:$4 sm:$0xff]  }
 0x2c5   :  { %v5615_v3 = vpop.f32.mrf.mxu1  ;;  %5909 = vmatprep.subr.bf16.mxu1 %v9310_v23  ;;  %5939 = vmatprep.mubr.bf16.mxu1 %v10774_v29  ;;  %v9322_v29 = vld [vmem:[%s12699_s2 + $0x148c] ss:$16 sps:$4 sm:$0xff]   ;;  %v9368_v0 = vld [vmem:[%s12699_s2 + $0x1608] ss:$16 sps:$4 sm:$0xff]  }
 0x2c6   :  { %v5616_v45 = vadd.f32 %v5615_v3, %v11890_v54  ;;  %v9373_v23 = vld [vmem:[%s12699_s2 + $0x156c] ss:$16 sps:$4 sm:$0xff]  }
 0x2c7   :  { %v5617_v47 = vpop.f32.mrf.mxu1  ;;  %5893 = vmatpush2.bf16.msra.mxu0 %v9305_v51  ;;  %v9376_v46 = vld [vmem:[%s12699_s2 + $0x17ec] ss:$16 sps:$4 sm:$0xff]   ;;  %v9374_v51 = vld [vmem:[%s12699_s2 + $0x17e8] ss:$16 sps:$4 sm:$0xff]  }
 0x2c8   :  { %5910 = vmatpush1.bf16.msra.mxu1 %v9308_v25  ;;  %5894 = vmatprep.subr.bf16.mxu0 %v9313_v52  ;;  %v9379_v25 = vld [vmem:[%s12699_s2 + $0x154c] ss:$16 sps:$4 sm:$0xff]   ;;  %v9377_v52 = vld [vmem:[%s12699_s2 + $0x1548] ss:$16 sps:$4 sm:$0xff]  }
 0x2c9   :  { %5911 = vmatprep.subr.bf16.mxu1 %v9316_v18  ;;  %v5618_v54 = vpop.f32.mrf.mxu1  ;;  %v9382_v3 = vld [vmem:[%s12699_s2 + $0x17cc] ss:$16 sps:$4 sm:$0xff]   ;;  %v9380_v18 = vld [vmem:[%s12699_s2 + $0x17c8] ss:$16 sps:$4 sm:$0xff]  }
 0x2ca   :  { %v9388_v47 = vld [vmem:[%s12699_s2 + $0x17ac] ss:$16 sps:$4 sm:$0xff]   ;;  %v9389_v54 = vld [vmem:[%s12699_s2 + $0x1508] ss:$16 sps:$4 sm:$0xff]  }
 0x2cb   :  { %5895 = vmatpush2.bf16.msra.mxu0 %v9311_v56  ;;  %v9383_v56 = vld [vmem:[%s12699_s2 + $0x1528] ss:$16 sps:$4 sm:$0xff]  }
 0x2cc   :  { %5912 = vmatpush1.bf16.msra.mxu1 %v9314_v31  ;;  %5896 = vmatprep.subr.bf16.mxu0 %v9319_v57  ;;  %v9386_v31 = vld [vmem:[%s12699_s2 + $0x17a8] ss:$16 sps:$4 sm:$0xff]   ;;  %v9391_v57 = vld [vmem:[%s12699_s2 + $0x150c] ss:$16 sps:$4 sm:$0xff]  }
 0x2cd   :  { %5913 = vmatprep.subr.bf16.mxu1 %v9322_v29  ;;  %v9394_v29 = vld [vmem:[%s12699_s2 + $0x178c] ss:$16 sps:$4 sm:$0xff]  }
 0x2cf   :  { %5897 = vmatpush2.bf16.msra.mxu0 %v9317_v26  ;;  %v9392_v26 = vld [vmem:[%s12699_s2 + $0x1788] ss:$16 sps:$4 sm:$0xff]  }
 0x2d0   :  { %5914 = vmatpush1.bf16.msra.mxu1 %v9320_v13  ;;  %5948 = vmatprep.subr.bf16.mxu0 %v9328_v53  ;;  %v9397_v13 = vld [vmem:[%s12699_s2 + $0x176c] ss:$16 sps:$4 sm:$0xff]   ;;  %v9395_v53 = vld [vmem:[%s12699_s2 + $0x1768] ss:$16 sps:$4 sm:$0xff]  }
 0x2d1   :  { %5915 = vmatprep.subr.bf16.mxu1 %v9325_v58  ;;  %v9400_v58 = vld [vmem:[%s12699_s2 + $0x186c] ss:$16 sps:$4 sm:$0xff]  }
 0x2d2   :  { %v5654_v60 = vpop.f32.mrf.mxu0  ;;  %5899 = vmatmul.mubr.bf16.vlgmr.msra.gmra.mxu0 %v10778_v6  ;;  %v9340_v6 = vld [vmem:[%s12699_s2 + $0x16ac] ss:$16 sps:$4 sm:$0xff]  }
 0x2d3   :  { %v12078_v1 = vadd.f32 %v5654_v60, %v5614_v48  ;;  %5949 = vmatpush1.bf16.msra.mxu0 %v9326_v5  ;;  %5980 = vmatprep.mubr.bf16.mxu0 %v10794_v38  ;;  %v9346_v38 = vld [vmem:[%s12699_s2 + $0x168c] ss:$16 sps:$4 sm:$0xff]   ;;  %v9371_v48 = vld [vmem:[%s12699_s2 + $0x1568] ss:$16 sps:$4 sm:$0xff]  }
 0x2d4   :  { %5916 = vmatpush1.bf16.msra.mxu1 %v9323_v63  ;;  %v5656_v11 = vpop.f32.mrf.mxu0  ;;  %5950 = vmatprep.subr.bf16.mxu0 %v9334_v41  ;;  %v9398_v63 = vld [vmem:[%s12699_s2 + $0x1868] ss:$16 sps:$4 sm:$0xff]   ;;  %v9403_v5 = vld [vmem:[%s12699_s2 + $0x174c] ss:$16 sps:$4 sm:$0xff]  }
 0x2d5   :  { %5917 = vmatprep.subr.bf16.mxu1 %v9331_v62  ;;  %v12092_v15 = vadd.f32 %v5656_v11, %v5616_v45  ;;  %v9385_v45 = vld [vmem:[%s12699_s2 + $0x152c] ss:$16 sps:$4 sm:$0xff]  }
 0x2d6   :  { %v5658_v12 = vpop.f32.mrf.mxu0  ;;  %v9406_v62 = vld [vmem:[%s12699_s2 + $0x184c] ss:$16 sps:$4 sm:$0xff]  }
 0x2d7   :  { %5951 = vmatpush1.bf16.msra.mxu0 %v9332_v10  ;;  %v9404_v10 = vld [vmem:[%s12699_s2 + $0x1848] ss:$16 sps:$4 sm:$0xff]  }
 0x2d8   :  { %5918 = vmatpush1.bf16.msra.mxu1 %v9329_v55  ;;  %v5659_v17 = vpop.f32.mrf.mxu0  ;;  %5952 = vmatprep.subr.bf16.mxu0 %v9340_v6  ;;  %v9401_v55 = vld [vmem:[%s12699_s2 + $0x1748] ss:$16 sps:$4 sm:$0xff]  }
 0x2d9   :  { %5919 = vmatprep.subr.bf16.mxu1 %v9337_v7  ;;  %v9409_v7 = vld [vmem:[%s12699_s2 + $0x172c] ss:$16 sps:$4 sm:$0xff]   ;;  %v9407_v12 = vld [vmem:[%s12699_s2 + $0x1728] ss:$16 sps:$4 sm:$0xff]  }
 0x2db   :  { %5953 = vmatpush1.bf16.msra.mxu0 %v9338_v59  ;;  %v9415_v59 = vld [vmem:[%s12699_s2 + $0x170c] ss:$16 sps:$4 sm:$0xff]  }
 0x2dc   :  { %5920 = vmatpush1.bf16.msra.mxu1 %v9335_v14  ;;  %5954 = vmatprep.subr.bf16.mxu0 %v9346_v38  ;;  %v9410_v14 = vld [vmem:[%s12699_s2 + $0x1828] ss:$16 sps:$4 sm:$0xff]  }
 0x2dd   :  { %5921 = vmatprep.subr.bf16.mxu1 %v9343_v39  ;;  %v9413_v39 = vld [vmem:[%s12699_s2 + $0x1708] ss:$16 sps:$4 sm:$0xff]  }
 0x2de   :  { %v9416_v38 = vld [vmem:[%s12699_s2 + $0x1808] ss:$16 sps:$4 sm:$0xff]  }
 0x2df   :  { %5955 = vmatpush1.bf16.msra.mxu0 %v9344_v24  ;;  %v9586_v24 = vmov 0.0  }
 0x2e0   :  { %5922 = vmatpush1.bf16.msra.mxu1 %v9341_v22  ;;  %5956 = vmatprep.subr.bf16.mxu0 %v9352_v30  ;;  %v9419_v22 = vld [vmem:[%s12702_s4 + $0x18] sm:$0xff]  }
 0x2e1   :  { %5923 = vmatprep.subr.bf16.mxu1 %v9349_v28 }
 0x2e3   :  { %5957 = vmatpush1.bf16.msra.mxu0 %v9350_v49 }
 0x2e4   :  { %5924 = vmatpush2.bf16.msra.mxu1 %v9347_v33  ;;  %5958 = vmatprep.subr.bf16.mxu0 %v9358_v42  ;;  %v9420_v33 = vld [vmem:[%s12702_s4 + $0x10] sm:$0xff]  }
 0x2e5   :  { %5925 = vmatprep.subr.bf16.mxu1 %v9355_v34 }
 0x2e7   :  { %5959 = vmatpush1.bf16.msra.mxu0 %v9356_v8 }
 0x2e8   :  { %5926 = vmatpush2.bf16.msra.mxu1 %v9353_v43  ;;  %5960 = vmatprep.subr.bf16.mxu0 %v9364_v37  ;;  %v9422_v43 = vld [vmem:[%s12702_s4] sm:$0xff]  }
 0x2e9   :  { %5927 = vmatprep.subr.bf16.mxu1 %v9361_v36 }
 0x2eb   :  { %5961 = vmatpush1.bf16.msra.mxu0 %v9362_v50 }
 0x2ec   :  { %5928 = vmatpush2.bf16.msra.mxu1 %v9359_v19  ;;  %5962 = vmatprep.subr.bf16.mxu0 %v9370_v40  ;;  %v9425_v40 = vld [vmem:[%s12704_s7 + $0xac] ss:$12 sps:$4 sm:$0xff]  }
 0x2ed   :  { %5929 = vmatprep.subr.bf16.mxu1 %v9367_v35  ;;  %v9423_v35 = vld [vmem:[%s12704_s7 + $0xa8] ss:$12 sps:$4 sm:$0xff]  }
 0x2ef   :  { %5963 = vmatpush1.bf16.msra.mxu0 %v9368_v0  ;;  %v9426_v0 = vld [vmem:[%s12704_s7 + $0xb0] ss:$12 sps:$4 sm:$0xff]  }
 0x2f0   :  { %5930 = vmatpush2.bf16.msra.mxu1 %v9365_v44  ;;  %5964 = vmatprep.subr.bf16.mxu0 %v9376_v46  ;;  %v9429_v46 = vld [vmem:[%s12704_s7 + $0x94] ss:$12 sps:$4 sm:$0xff]  }
 0x2f1   :  { %5931 = vmatprep.subr.bf16.mxu1 %v9373_v23  ;;  %v9427_v23 = vld [vmem:[%s12704_s7 + $0x90] ss:$12 sps:$4 sm:$0xff]  }
 0x2f3   :  { %5965 = vmatpush2.bf16.msra.mxu0 %v9374_v51  ;;  %v9433_v51 = vld [vmem:[%s12704_s7 + $0x7c] ss:$12 sps:$4 sm:$0xff]  }
 0x2f4   :  { %5932 = vmatpush2.bf16.msra.mxu1 %v9371_v48  ;;  %5966 = vmatprep.subr.bf16.mxu0 %v9382_v3  ;;  %v9430_v48 = vld [vmem:[%s12704_s7 + $0x98] ss:$12 sps:$4 sm:$0xff]   ;;  %v9434_v3 = vld [vmem:[%s12704_s7 + $0x80] ss:$12 sps:$4 sm:$0xff]  }
 0x2f5   :  { %5933 = vmatprep.subr.bf16.mxu1 %v9379_v25  ;;  %v9431_v25 = vld [vmem:[%s12704_s7 + $0x78] ss:$12 sps:$4 sm:$0xff]  }
 0x2f7   :  { %5967 = vmatpush2.bf16.msra.mxu0 %v9380_v18  ;;  %v9437_v18 = vld [vmem:[%s12704_s7 + $0x64] ss:$12 sps:$4 sm:$0xff]  }
 0x2f8   :  { %5934 = vmatpush2.bf16.msra.mxu1 %v9377_v52  ;;  %5968 = vmatprep.subr.bf16.mxu0 %v9388_v47  ;;  %v9435_v47 = vld [vmem:[%s12704_s7 + $0x60] ss:$12 sps:$4 sm:$0xff]  }
 0x2f9   :  { %5935 = vmatprep.subr.bf16.mxu1 %v9385_v45 }
 0x2fb   :  { %5969 = vmatpush2.bf16.msra.mxu0 %v9386_v31 }
 0x2fc   :  { %5936 = vmatpush2.bf16.msra.mxu1 %v9383_v56  ;;  %5970 = vmatprep.subr.bf16.mxu0 %v9394_v29  ;;  %v9438_v56 = vld [vmem:[%s12704_s7 + $0x68] ss:$12 sps:$4 sm:$0xff]  }
 0x2fd   :  { %5937 = vmatprep.subr.bf16.mxu1 %v9391_v57 }
 0x2ff   :  { %5971 = vmatpush2.bf16.msra.mxu0 %v9392_v26  ;;  %v9439_v26 = vld [vmem:[%s12704_s7 + $0x48] ss:$12 sps:$4 sm:$0xff]  }
 0x300   :  { %5938 = vmatpush2.bf16.msra.mxu1 %v9389_v54  ;;  %5972 = vmatprep.subr.bf16.mxu0 %v9397_v13  ;;  %v9441_v54 = vld [vmem:[%s12704_s7 + $0x4c] ss:$12 sps:$4 sm:$0xff]   ;;  %v9442_v13 = vld [vmem:[%s12704_s7 + $0x50] ss:$12 sps:$4 sm:$0xff]  }
 0x301   :  { %5997 = vmatprep.subr.bf16.mxu1 %v9400_v58 }
 0x303   :  { %v5695_v41 = vpop.f32.mrf.mxu1  ;;  %5940 = vmatmul.mubr.bf16.vlgmr.msra.gmra.mxu1 %v10970_v27  ;;  %5973 = vmatpush2.bf16.msra.mxu0 %v9395_v53  ;;  %v9412_v27 = vld [vmem:[%s12699_s2 + $0x182c] ss:$16 sps:$4 sm:$0xff]   ;;  %v9445_v53 = vld [vmem:[%s12704_s7 + $0x34] ss:$12 sps:$4 sm:$0xff]  }
 0x304   :  { %v5696_v60 = vadd.f32 %v5695_v41, %v12078_v1  ;;  %5998 = vmatpush1.bf16.msra.mxu1 %v9398_v63  ;;  %5974 = vmatprep.subr.bf16.mxu0 %v9403_v5  ;;  %v9443_v63 = vld [vmem:[%s12704_s7 + $0x30] ss:$12 sps:$4 sm:$0xff]   ;;  %v9446_v5 = vld [vmem:[%s12704_s7 + $0x38] ss:$12 sps:$4 sm:$0xff]  }
 0x305   :  { %v5697_v11 = vpop.f32.mrf.mxu1  ;;  %5999 = vmatprep.subr.bf16.mxu1 %v9406_v62  ;;  %6021 = vmatprep.mubr.bf16.mxu1 %v9585_v2  ;;  %v9449_v62 = vld [vmem:[%s12704_s7 + $0x1c] ss:$12 sps:$4 sm:$0xff]   ;;  %v9447_v41 = vld [vmem:[%s12704_s7 + $0x18] ss:$12 sps:$4 sm:$0xff]  }
 0x306   :  { %v5698_v1 = vadd.f32 %v5697_v11, %v12092_v15  ;;  %v9418_v15 = vld [vmem:[%s12699_s2 + $0x180c] ss:$16 sps:$4 sm:$0xff]   ;;  %v9454_v11 = vld [vmem:[%s12704_s7 + $0x8] ss:$12 sps:$4 sm:$0xff]  }
 0x307   :  { %v5699_v6 = vpop.f32.mrf.mxu1  ;;  %5975 = vmatpush2.bf16.msra.mxu0 %v9401_v55  ;;  %v9453_v55 = vld [vmem:[%s12704_s7 + $0x4] ss:$12 sps:$4 sm:$0xff]  }
 0x308   :  { %6000 = vmatpush1.bf16.msra.mxu1 %v9404_v10  ;;  %5976 = vmatprep.subr.bf16.mxu0 %v9409_v7  ;;  %v9451_v10 = vld [vmem:[%s12704_s7] ss:$12 sps:$4 sm:$0xff]  }
 0x309   :  { %6001 = vmatprep.subr.bf16.mxu1 %v9412_v27  ;;  %v5700_v17 = vpop.f32.mrf.mxu1  ;;  %v9457_v7 = vld [vmem:[%s12705_s6 + $0xac] ss:$12 sps:$4 sm:$0xff]  }
 0x30a   :  { %v9460_v27 = vld [vmem:[%s12705_s6 + $0x22c] ss:$12 sps:$4 sm:$0xff]  }
 0x30b   :  { %5977 = vmatpush2.bf16.msra.mxu0 %v9407_v12 }
 0x30c   :  { %6002 = vmatpush1.bf16.msra.mxu1 %v9410_v14  ;;  %5978 = vmatprep.subr.bf16.mxu0 %v9415_v59 }
 0x30d   :  { %6003 = vmatprep.subr.bf16.mxu1 %v9418_v15 }
 0x30f   :  { %5979 = vmatpush2.bf16.msra.mxu0 %v9413_v39 }
 0x310   :  { %6004 = vmatpush1.bf16.msra.mxu1 %v9416_v38  ;;  %8204 = vmatprep.subr.bf16.mxu0 %v9586_v24 }
 0x311   :  { %6411 = vmatprep.subr.bf16.mxu1 %v9425_v40 }
 0x312   :  { %v5736_v28 = vpop.f32.mrf.mxu0  ;;  %5981 = vmatmul.mubr.bf16.vlgmr.msra.gmra.mxu0 %v10992_v32 }
 0x313   :  { %8018 = vmatmul.mubr.msk.bf16.vlgmr.msra.gmra.mxu1 %vm4960_vm0, %v11056_v4  ;;  %v5737_v30 = vadd.f32 %v5736_v28, %v5696_v60  ;;  %8205 = vmatpush3.bf16.msra.mxu0 %v9419_v22  ;;  %v9421_v4 = vld [vmem:[%s12702_s4 + $0x8] sm:$0xff]  }
 0x314   :  { %8212 = vmatprep.mubr.msk.bf16.mxu0 %vm9587_vm1, %v9586_v24  ;;  %v5738_v49 = vpop.f32.mrf.mxu0  ;;  %8206 = vmatprep.subr.bf16.mxu0 %v9586_v24  ;;  %v9450_v60 = vld [vmem:[%s12704_s7 + $0x20] ss:$12 sps:$4 sm:$0xff]  }
 0x315   :  { %6443 = vmatprep.mubr.bf16.mxu1 %v9585_v2  ;;  %v5739_v34 = vadd.f32 %v5738_v49, %v5698_v1  ;;  %v6034_v2 = vld [vmem:[%s12703_s1] sm:$0x1]  ;;  %6412 = vmatpush1.bf16.msra.mxu1 %v9423_v35 }
 0x316   :  { %v5740_v32 = vpop.f32.mrf.mxu0  ;;  %6413 = vmatprep.subr.bf16.mxu1 %v9429_v46 }
 0x317   :  { %8207 = vmatpush3.bf16.msra.mxu0 %v9420_v33 }
 0x318   :  { %v5741_v42 = vpop.f32.mrf.mxu0  ;;  %8208 = vmatprep.subr.bf16.mxu0 %v9586_v24 }
 0x319   :  { %6414 = vmatpush1.bf16.msra.mxu1 %v9427_v23 }
 0x31a   :  { %6415 = vmatprep.subr.bf16.mxu1 %v9433_v51 }
 0x31b   :  { %8209 = vmatpush3.bf16.msra.mxu0 %v9421_v4 }
 0x31c   :  { %8210 = vmatprep.subr.bf16.mxu0 %v9586_v24 }
 0x31d   :  { %6416 = vmatpush1.bf16.msra.mxu1 %v9431_v25  ;;  %v6031_v25 = vmax.f32 %v11682_v9, 0.0  ;;  %v9466_v9 = vld [vmem:[%s12705_s6 + $0x214] ss:$12 sps:$4 sm:$0xff]  }
 0x31e   :  { %6417 = vmatprep.subr.bf16.mxu1 %v9437_v18 }
 0x31f   :  { %8211 = vmatpush3.bf16.msra.mxu0 %v9422_v43 }
 0x320   :  { %8216 = vmatprep.subr.bf16.mxu0 %v9586_v24 }
 0x321   :  { %6418 = vmatpush1.bf16.msra.mxu1 %v9435_v47  ;;  %v9458_v47 = vld [vmem:[%s12705_s6 + $0x228] ss:$12 sps:$4 sm:$0xff]  }
 0x322   :  { %8213 = vmatmul.mubr.msk.bf16.vlgmr.msra.gmra.mxu0 %vm4960_vm0, %v6034_v2  ;;  %6419 = vmatprep.subr.bf16.mxu1 %v9441_v54 }
 0x323   :  { %8232 = vmatprep.mubr.msk.bf16.mxu0 %vm9587_vm1, %v9586_v24  ;;  %8217 = vmatpush3.bf16.msra.mxu0 %v9426_v0  ;;  %v8019_v0 = vld [vmem:[%s12706_s5] ss:$0 sm:$0xff] }
 0x324   :  { %8218 = vmatprep.subr.bf16.mxu0 %v9586_v24 }
 0x325   :  { %6420 = vmatpush1.bf16.msra.mxu1 %v9439_v26  ;;  %v9461_v26 = vld [vmem:[%s12705_s6 + $0x90] ss:$12 sps:$4 sm:$0xff]  }
 0x326   :  { %6421 = vmatprep.subr.bf16.mxu1 %v9445_v53  ;;  %v9472_v53 = vld [vmem:[%s12705_s6 + $0x1fc] ss:$12 sps:$4 sm:$0xff]  }
 0x327   :  { %8219 = vmatpush3.bf16.msra.mxu0 %v9430_v48 }
 0x328   :  { %8220 = vmatprep.subr.bf16.mxu0 %v9586_v24 }
 0x329   :  { %6422 = vmatpush1.bf16.msra.mxu1 %v9443_v63  ;;  %v9467_v63 = vld [vmem:[%s12705_s6 + $0x78] ss:$12 sps:$4 sm:$0xff]  }
 0x32a   :  { %6423 = vmatprep.subr.bf16.mxu1 %v9449_v62  ;;  %v9475_v62 = vld [vmem:[%s12705_s6 + $0x64] ss:$12 sps:$4 sm:$0xff]  }
 0x32b   :  { %8221 = vmatpush3.bf16.msra.mxu0 %v9434_v3 }
 0x32c   :  { %8222 = vmatprep.subr.bf16.mxu0 %v9586_v24 }
 0x32d   :  { %6424 = vmatpush1.bf16.msra.mxu1 %v9447_v41  ;;  %v9478_v41 = vld [vmem:[%s12705_s6 + $0x1e4] ss:$12 sps:$4 sm:$0xff]  }
 0x32e   :  { %6425 = vmatprep.subr.bf16.mxu1 %v9453_v55  ;;  %v9476_v55 = vld [vmem:[%s12705_s6 + $0x1e0] ss:$12 sps:$4 sm:$0xff]  }
 0x32f   :  { %8223 = vmatpush3.bf16.msra.mxu0 %v9438_v56 }
 0x330   :  { %8224 = vmatprep.subr.bf16.mxu0 %v9586_v24 }
 0x331   :  { %6426 = vmatpush1.bf16.msra.mxu1 %v9451_v10  ;;  %v9481_v10 = vld [vmem:[%s12705_s6 + $0x4c] ss:$12 sps:$4 sm:$0xff]  }
 0x332   :  { %7004 = vmatprep.subr.bf16.mxu1 %v9457_v7  ;;  %v9479_v7 = vld [vmem:[%s12705_s6 + $0x48] ss:$12 sps:$4 sm:$0xff]  }
 0x333   :  { %8225 = vmatpush3.bf16.msra.mxu0 %v9442_v13  ;;  %v9464_v13 = vld [vmem:[%s12705_s6 + $0x210] ss:$12 sps:$4 sm:$0xff]  }
 0x334   :  { %8226 = vmatprep.subr.bf16.mxu0 %v9586_v24 }
 0x337   :  { %8227 = vmatpush3.bf16.msra.mxu0 %v9446_v5  ;;  %v9470_v5 = vld [vmem:[%s12705_s6 + $0x1f8] ss:$12 sps:$4 sm:$0xff]  }
 0x338   :  { %8228 = vmatprep.subr.bf16.mxu0 %v9586_v24 }
 0x33b   :  { %8229 = vmatpush3.bf16.msra.mxu0 %v9450_v60  ;;  %v9473_v60 = vld [vmem:[%s12705_s6 + $0x60] ss:$12 sps:$4 sm:$0xff]  }
 0x33c   :  { %8230 = vmatprep.subr.bf16.mxu0 %v9586_v24 }
 0x33f   :  { %8231 = vmatpush3.bf16.msra.mxu0 %v9454_v11  ;;  %v9484_v11 = vld [vmem:[%s12705_s6 + $0x1cc] ss:$12 sps:$4 sm:$0xff]  }
 0x340   :  { %7045 = vmatprep.subr.bf16.mxu0 %v9460_v27  ;;  %v9482_v27 = vld [vmem:[%s12705_s6 + $0x1c8] ss:$12 sps:$4 sm:$0xff]  }
 0x343   :  { %v5777_v8 = vpop.f32.mrf.mxu1 }
 0x344   :  { %v5778_v36 = vadd.f32 %v5777_v8, %v5737_v30 }
 0x345   :  { %v5779_v37 = vpop.f32.mrf.mxu1 }
 0x346   :  { %v5780_v19 = vadd.f32 %v5779_v37, %v5739_v34 }
 0x347   :  { %v5781_v50 = vpop.f32.mrf.mxu1 }
 0x349   :  { %v5782_v44 = vpop.f32.mrf.mxu1 }
 0x352   :  { %v5818_v52 = vpop.f32.mrf.mxu0 }
 0x353   :  { %v5819_v45 = vadd.f32 %v5818_v52, %v5778_v36 }
 0x354   :  { %v5820_v31 = vpop.f32.mrf.mxu0 }
 0x355   :  { %v5821_v57 = vadd.f32 %v5820_v31, %v5780_v19 }
 0x356   :  { %v5822_v29 = vpop.f32.mrf.mxu0 }
 0x357   :  { %v12393_v29 = vpack.c.bf16 %v6031_v25, %v6031_v25  ;;  %v9538_v25 = vld [vmem:[%s12705_s6 + $0x274] ss:$12 sps:$4 sm:$0xff]  }
 0x358   :  { %v5823_v58 = vpop.f32.mrf.mxu0 }
 0x359   :  { %v9469_v58 = vld [vmem:[%s12705_s6 + $0x7c] ss:$12 sps:$4 sm:$0xff]  }
 0x383   :  { %v5859_v1 = vpop.f32.mrf.mxu1 }
 0x384   :  { %v5860_v6 = vadd.f32 %v5859_v1, %v5819_v45  ;;  %v9455_v45 = vld [vmem:[%s12705_s6 + $0xa8] ss:$12 sps:$4 sm:$0xff]  }
 0x385   :  { %v5861_v12 = vpop.f32.mrf.mxu1  ;;  %v9487_v1 = vld [vmem:[%s12705_s6 + $0x34] ss:$12 sps:$4 sm:$0xff]  }
 0x386   :  { %v5862_v14 = vadd.f32 %v5861_v12, %v5821_v57  ;;  %v9463_v57 = vld [vmem:[%s12705_s6 + $0x94] ss:$12 sps:$4 sm:$0xff]   ;;  %v9485_v12 = vld [vmem:[%s12705_s6 + $0x30] ss:$12 sps:$4 sm:$0xff]  }
 0x387   :  { %v5863_v59 = vpop.f32.mrf.mxu1 }
 0x388   :  { %v9493_v59 = vld [vmem:[%s12705_s6 + $0x1c] ss:$12 sps:$4 sm:$0xff]  }
 0x389   :  { %v5864_v15 = vpop.f32.mrf.mxu1 }
 0x38a   :  { %v9496_v15 = vld [vmem:[%s12705_s6 + $0x19c] ss:$12 sps:$4 sm:$0xff]  }
 0x392   :  { %v5900_v17 = vpop.f32.mrf.mxu0 }
 0x393   :  { %v5901_v39 = vadd.f32 %v5900_v17, %v5860_v6  ;;  %v9490_v6 = vld [vmem:[%s12705_s6 + $0x1b4] ss:$12 sps:$4 sm:$0xff]   ;;  %v9491_v17 = vld [vmem:[%s12705_s6 + $0x18] ss:$12 sps:$4 sm:$0xff]  }
 0x394   :  { %v5902_v38 = vpop.f32.mrf.mxu0 }
 0x395   :  { %v5903_v22 = vadd.f32 %v5902_v38, %v5862_v14  ;;  %v9488_v14 = vld [vmem:[%s12705_s6 + $0x1b0] ss:$12 sps:$4 sm:$0xff]  }
 0x396   :  { %v5904_v24 = vpop.f32.mrf.mxu0  ;;  %v9499_v38 = vld [vmem:[%s12705_s6 + $0x4] ss:$12 sps:$4 sm:$0xff]  }
 0x397   :  { %v9497_v24 = vld [vmem:[%s12705_s6] ss:$12 sps:$4 sm:$0xff]  }
 0x398   :  { %v5905_v28 = vpop.f32.mrf.mxu0 }
 0x399   :  { %v9500_v28 = vld [vmem:[%s12705_s6 + $0x180] ss:$12 sps:$4 sm:$0xff]  }
 0x3c3   :  { %v5941_v30 = vpop.f32.mrf.mxu1 }
 0x3c4   :  { %v5942_v33 = vadd.f32 %v5941_v30, %v5901_v39  ;;  %v9494_v39 = vld [vmem:[%s12705_s6 + $0x198] ss:$12 sps:$4 sm:$0xff]  }
 0x3c5   :  { %v5943_v49 = vpop.f32.mrf.mxu1  ;;  %v9505_v30 = vld [vmem:[%s12705_s6 + $0x16c] ss:$12 sps:$4 sm:$0xff]  }
 0x3c6   :  { %v5944_v40 = vadd.f32 %v5943_v49, %v5903_v22  ;;  %v9502_v22 = vld [vmem:[%s12705_s6 + $0x184] ss:$12 sps:$4 sm:$0xff]   ;;  %v9503_v49 = vld [vmem:[%s12705_s6 + $0x168] ss:$12 sps:$4 sm:$0xff]  }
 0x3c7   :  { %v5945_v34 = vpop.f32.mrf.mxu1 }
 0x3c8   :  { %v9506_v34 = vld [vmem:[%s12705_s6 + $0x2e8] ss:$12 sps:$4 sm:$0xff]  }
 0x3c9   :  { %v5946_v32 = vpop.f32.mrf.mxu1 }
 0x3ca   :  { %v9511_v32 = vld [vmem:[%s12705_s6 + $0x154] ss:$12 sps:$4 sm:$0xff]  }
 0x3d2   :  { %v5982_v4 = vpop.f32.mrf.mxu0 }
 0x3d3   :  { %v6023_v42 = vpop.f32.mrf.mxu1  ;;  %v5983_v43 = vadd.f32 %v5982_v4, %v5942_v33  ;;  %v9508_v33 = vld [vmem:[%s12705_s6 + $0x2ec] ss:$12 sps:$4 sm:$0xff]   ;;  %v9514_v4 = vld [vmem:[%s12705_s6 + $0x2d4] ss:$12 sps:$4 sm:$0xff]  }
 0x3d4   :  { %v5984_v2 = vpop.f32.mrf.mxu0 }
 0x3d5   :  { %v6025_v8 = vpop.f32.mrf.mxu1  ;;  %v12375_v36 = vadd.f32 %v6023_v42, %v5983_v43  ;;  %v5985_v44 = vadd.f32 %v5984_v2, %v5944_v40  ;;  %v9509_v42 = vld [vmem:[%s12705_s6 + $0x150] ss:$12 sps:$4 sm:$0xff]   ;;  %v9521_v40 = vld [vmem:[%s12705_s6 + $0x120] ss:$12 sps:$4 sm:$0xff]  }
 0x3d6   :  { %v5986_v37 = vpop.f32.mrf.mxu0  ;;  %v9512_v43 = vld [vmem:[%s12705_s6 + $0x2d0] ss:$12 sps:$4 sm:$0xff]  }
 0x3d7   :  { %v6027_v19 = vpop.f32.mrf.mxu1  ;;  %v6026_v23 = vadd.f32 %v6025_v8, %v5985_v44  ;;  %v9517_v2 = vld [vmem:[%s12705_s6 + $0x13c] ss:$12 sps:$4 sm:$0xff]   ;;  %v9515_v37 = vld [vmem:[%s12705_s6 + $0x138] ss:$12 sps:$4 sm:$0xff]   ;;  %v9524_v44 = vld [vmem:[%s12705_s6 + $0x2a0] ss:$12 sps:$4 sm:$0xff]  }
 0x3d8   :  { %v5987_v50 = vpop.f32.mrf.mxu0  ;;  %v9520_v8 = vld [vmem:[%s12705_s6 + $0x2bc] ss:$12 sps:$4 sm:$0xff]   ;;  %v9518_v19 = vld [vmem:[%s12705_s6 + $0x2b8] ss:$12 sps:$4 sm:$0xff]  }
 0x3d9   :  { %v6028_v35 = vpop.f32.mrf.mxu1  ;;  %v6033_v3 = vmax.f32 %v6026_v23, 0.0  ;;  %v9523_v50 = vld [vmem:[%s12705_s6 + $0x124] ss:$12 sps:$4 sm:$0xff]   ;;  %v9532_v23 = vld [vmem:[%s12705_s6 + $0x28c] ss:$12 sps:$4 sm:$0xff]  }
 0x3da   :  { %v9526_v35 = vld [vmem:[%s12705_s6 + $0x2a4] ss:$12 sps:$4 sm:$0xff]  }
 0x3db   :  { %v12395_v54 = vpack.c.bf16 %v6033_v3, %v6033_v3  ;;  %v9533_v3 = vld [vmem:[%s12705_s6 + $0xf0] ss:$12 sps:$4 sm:$0xff]  }
 0x3e2   :  { %v6111_v46 = vpop.f32.mrf.mxu0 }
 0x3e3   :  { %v6112_v48 = vadd.f32 %v8019_v0, %v6111_v46  ;;  %v9529_v0 = vld [vmem:[%s12705_s6 + $0x10c] ss:$12 sps:$4 sm:$0xff]   ;;  %v9527_v46 = vld [vmem:[%s12705_s6 + $0x108] ss:$12 sps:$4 sm:$0xff]  }
 0x3e4   :  { %v8214_v51 = vpop.f32.mrf.mxu0 }
 0x3e5   :  { %v6117_v52 = vmax.f32 %v6112_v48, 0.0  ;;  %v9530_v48 = vld [vmem:[%s12705_s6 + $0x288] ss:$12 sps:$4 sm:$0xff]  }
 0x3e6   :  { %v6114_v18 = vpop.f32.mrf.mxu0  ;;  %v9535_v51 = vld [vmem:[%s12705_s6 + $0xf4] ss:$12 sps:$4 sm:$0xff]  }
 0x3e7   :  { %v6250_v56 = vpack.c.bf16 %v6117_v52, %v6117_v52  ;;  %v9536_v52 = vld [vmem:[%s12705_s6 + $0x270] ss:$12 sps:$4 sm:$0xff]  }
 0x3e8   :  { %v8215_v31 = vpop.f32.mrf.mxu0  ;;  %v9541_v18 = vld [vmem:[%s12705_s6 + $0xdc] ss:$12 sps:$4 sm:$0xff]  }
 0x3e9   :  { %6444 = vmatmul.mubr.bf16.vlgmr.msra.gmra.mxu1 %v6250_v56  ;;  %8233 = vmatmul.mubr.bf16.vlgmr.msra.gmra.mxu0 %v6250_v56  ;;  %v9542_v56 = vld [vmem:[%s12705_s6 + $0x258] ss:$12 sps:$4 sm:$0xff]  }
 0x3ea   :  { %7005 = vmatpush1.bf16.msra.mxu1 %v9455_v45  ;;  %7046 = vmatpush1.bf16.msra.mxu0 %v9458_v47  ;;  %v9544_v45 = vld [vmem:[%s12705_s6 + $0x25c] ss:$12 sps:$4 sm:$0xff]   ;;  %v9539_v47 = vld [vmem:[%s12705_s6 + $0xd8] ss:$12 sps:$4 sm:$0xff]  }
 0x3eb   :  { %7036 = vmatprep.mubr.bf16.mxu1 %v12393_v29  ;;  %7077 = vmatprep.mubr.bf16.mxu0 %v12395_v54  ;;  %v9547_v31 = vld [vmem:[%s12705_s6 + $0xc4] ss:$12 sps:$4 sm:$0xff]  }
 0x3ec   :  { %7006 = vmatprep.subr.bf16.mxu1 %v9463_v57  ;;  %7047 = vmatprep.subr.bf16.mxu0 %v9466_v9  ;;  %v9550_v57 = vld [vmem:[%s12705_s6 + $0x244] ss:$12 sps:$4 sm:$0xff]   ;;  %v9545_v9 = vld [vmem:[%s12705_s6 + $0xc0] ss:$12 sps:$4 sm:$0xff]  }
 0x3ee   :  { %7007 = vmatpush1.bf16.msra.mxu1 %v9461_v26  ;;  %7048 = vmatpush1.bf16.msra.mxu0 %v9464_v13  ;;  %v9548_v26 = vld [vmem:[%s12705_s6 + $0x240] ss:$12 sps:$4 sm:$0xff]   ;;  %v6030_v13 = vmax.f32 %v11668_v61, 0.0 }
 0x3ef   :  { %7008 = vmatprep.subr.bf16.mxu1 %v9469_v58  ;;  %7049 = vmatprep.subr.bf16.mxu0 %v9472_v53  ;;  %v6032_v58 = vmax.f32 %v12375_v36, 0.0  ;;  %v9551_v53 = vld [vmem:[%s12705_s6 + $0x170] ss:$12 sps:$4 sm:$0xff]  }
 0x3f0   :  { %v9554_v36 = vld [vmem:[%s12705_s6 + $0x230] ss:$12 sps:$4 sm:$0xff]  }
 0x3f1   :  { %v12586_v61 = vpack.c.bf16 %v6032_v58, %v6032_v58 }
 0x3f2   :  { %7009 = vmatpush1.bf16.msra.mxu1 %v9467_v63  ;;  %7050 = vmatpush1.bf16.msra.mxu0 %v9470_v5  ;;  %v9552_v63 = vld [vmem:[%s12705_s6 + $0x2f0] ss:$12 sps:$4 sm:$0xff]  }
 0x3f3   :  { %7010 = vmatprep.subr.bf16.mxu1 %v9475_v62  ;;  %7051 = vmatprep.subr.bf16.mxu0 %v9478_v41  ;;  %v9553_v5 = vld [vmem:[%s12705_s6 + $0xb0] ss:$12 sps:$4 sm:$0xff]   ;;  %v12584_v62 = vpack.c.bf16 %v6030_v13, %v6030_v13  ;;  %v9555_v41 = vld [vmem:[%s12705_s6 + $0x158] ss:$12 sps:$4 sm:$0xff]  }
 0x3f6   :  { %7011 = vmatpush1.bf16.msra.mxu1 %v9473_v60  ;;  %7052 = vmatpush1.bf16.msra.mxu0 %v9476_v55  ;;  %v9556_v60 = vld [vmem:[%s12705_s6 + $0x2d8] ss:$12 sps:$4 sm:$0xff]  }
 0x3f7   :  { %7012 = vmatprep.subr.bf16.mxu1 %v9481_v10  ;;  %7053 = vmatprep.subr.bf16.mxu0 %v9484_v11  ;;  %v9557_v55 = vld [vmem:[%s12705_s6 + $0x98] ss:$12 sps:$4 sm:$0xff]   ;;  %v9559_v11 = vld [vmem:[%s12705_s6 + $0x140] ss:$12 sps:$4 sm:$0xff]  }
 0x3f8   :  { %v9558_v10 = vld [vmem:[%s12705_s6 + $0x218] ss:$12 sps:$4 sm:$0xff]  }
 0x3fa   :  { %7013 = vmatpush1.bf16.msra.mxu1 %v9479_v7  ;;  %7054 = vmatpush1.bf16.msra.mxu0 %v9482_v27  ;;  %v9561_v7 = vld [vmem:[%s12705_s6 + $0x80] ss:$12 sps:$4 sm:$0xff]   ;;  %v9563_v27 = vld [vmem:[%s12705_s6 + $0x128] ss:$12 sps:$4 sm:$0xff]  }
 0x3fb   :  { %7014 = vmatprep.subr.bf16.mxu1 %v9487_v1  ;;  %7055 = vmatprep.subr.bf16.mxu0 %v9490_v6  ;;  %v9564_v1 = vld [vmem:[%s12705_s6 + $0x2a8] ss:$12 sps:$4 sm:$0xff]  }
 0x3fc   :  { %v9565_v6 = vld [vmem:[%s12705_s6 + $0x68] ss:$12 sps:$4 sm:$0xff]  }
 0x3fe   :  { %7015 = vmatpush1.bf16.msra.mxu1 %v9485_v12  ;;  %7056 = vmatpush1.bf16.msra.mxu0 %v9488_v14  ;;  %v9566_v12 = vld [vmem:[%s12705_s6 + $0x1e8] ss:$12 sps:$4 sm:$0xff]   ;;  %v9567_v14 = vld [vmem:[%s12705_s6 + $0x110] ss:$12 sps:$4 sm:$0xff]  }
 0x3ff   :  { %7016 = vmatprep.subr.bf16.mxu1 %v9493_v59  ;;  %7057 = vmatprep.subr.bf16.mxu0 %v9496_v15  ;;  %v9568_v59 = vld [vmem:[%s12705_s6 + $0x290] ss:$12 sps:$4 sm:$0xff]  }
 0x400   :  { %v9569_v15 = vld [vmem:[%s12705_s6 + $0x50] ss:$12 sps:$4 sm:$0xff]  }
 0x402   :  { %7017 = vmatpush1.bf16.msra.mxu1 %v9491_v17  ;;  %7058 = vmatpush1.bf16.msra.mxu0 %v9494_v39  ;;  %v9570_v17 = vld [vmem:[%s12705_s6 + $0x1d0] ss:$12 sps:$4 sm:$0xff]   ;;  %v9571_v39 = vld [vmem:[%s12705_s6 + $0xf8] ss:$12 sps:$4 sm:$0xff]  }
 0x403   :  { %7018 = vmatprep.subr.bf16.mxu1 %v9499_v38  ;;  %7059 = vmatprep.subr.bf16.mxu0 %v9502_v22  ;;  %v9572_v38 = vld [vmem:[%s12705_s6 + $0x278] ss:$12 sps:$4 sm:$0xff]  }
 0x404   :  { %v9573_v22 = vld [vmem:[%s12705_s6 + $0x38] ss:$12 sps:$4 sm:$0xff]  }
 0x406   :  { %7019 = vmatpush1.bf16.msra.mxu1 %v9497_v24  ;;  %7060 = vmatpush1.bf16.msra.mxu0 %v9500_v28  ;;  %v9574_v24 = vld [vmem:[%s12705_s6 + $0x1b8] ss:$12 sps:$4 sm:$0xff]   ;;  %v9575_v28 = vld [vmem:[%s12705_s6 + $0xe0] ss:$12 sps:$4 sm:$0xff]  }
 0x407   :  { %7020 = vmatprep.subr.bf16.mxu1 %v9505_v30  ;;  %7061 = vmatprep.subr.bf16.mxu0 %v9508_v33  ;;  %v9576_v30 = vld [vmem:[%s12705_s6 + $0x260] ss:$12 sps:$4 sm:$0xff]  }
 0x408   :  { %v9577_v33 = vld [vmem:[%s12705_s6 + $0x20] ss:$12 sps:$4 sm:$0xff]  }
 0x40a   :  { %7021 = vmatpush2.bf16.msra.mxu1 %v9503_v49  ;;  %7062 = vmatpush2.bf16.msra.mxu0 %v9506_v34  ;;  %v9578_v49 = vld [vmem:[%s12705_s6 + $0x1a0] ss:$12 sps:$4 sm:$0xff]   ;;  %v9579_v34 = vld [vmem:[%s12705_s6 + $0xc8] ss:$12 sps:$4 sm:$0xff]  }
 0x40b   :  { %7022 = vmatprep.subr.bf16.mxu1 %v9511_v32  ;;  %7063 = vmatprep.subr.bf16.mxu0 %v9514_v4  ;;  %v9580_v32 = vld [vmem:[%s12705_s6 + $0x248] ss:$12 sps:$4 sm:$0xff]  }
 0x40c   :  { %v9581_v4 = vld [vmem:[%s12705_s6 + $0x8] ss:$12 sps:$4 sm:$0xff]  }
 0x40e   :  { %7023 = vmatpush2.bf16.msra.mxu1 %v9509_v42  ;;  %7064 = vmatpush2.bf16.msra.mxu0 %v9512_v43  ;;  %v9582_v42 = vld [vmem:[%s12705_s6 + $0x188] ss:$12 sps:$4 sm:$0xff]   ;;  %v16_v43 = vstv %s12707_s10 }
 0x40f   :  { %7024 = vmatprep.subr.bf16.mxu1 %v9517_v2  ;;  %7065 = vmatprep.subr.bf16.mxu0 %v9520_v8  ;;  %17 = vst [vmem:[#allocation2] sm:$0x1] %v16_v43 }
 0x412   :  { %7025 = vmatpush2.bf16.msra.mxu1 %v9515_v37  ;;  %7066 = vmatpush2.bf16.msra.mxu0 %v9518_v19 }
 0x413   :  { %7026 = vmatprep.subr.bf16.mxu1 %v9523_v50  ;;  %7067 = vmatprep.subr.bf16.mxu0 %v9526_v35 }
 0x416   :  { %7027 = vmatpush2.bf16.msra.mxu1 %v9521_v40  ;;  %7068 = vmatpush2.bf16.msra.mxu0 %v9524_v44 }
 0x417   :  { %7028 = vmatprep.subr.bf16.mxu1 %v9529_v0  ;;  %7069 = vmatprep.subr.bf16.mxu0 %v9532_v23  ;;  %v7166_v0 = vld [vmem:[%s12708_s8] sm:$0x7] }
 0x41a   :  { %7029 = vmatpush2.bf16.msra.mxu1 %v9527_v46  ;;  %7070 = vmatpush2.bf16.msra.mxu0 %v9530_v48 }
 0x41b   :  { %7030 = vmatprep.subr.bf16.mxu1 %v9535_v51  ;;  %7071 = vmatprep.subr.bf16.mxu0 %v9538_v25  ;;  %v7171_v51 = vrot.slane %v7166_v0, %v10532_v16 }
 0x41e   :  { %7031 = vmatpush2.bf16.msra.mxu1 %v9533_v3  ;;  %7072 = vmatpush2.bf16.msra.mxu0 %v9536_v52  ;;  %v7189_v52 = vld [vmem:[%s12709_s9] sm:$0x7] }
 0x41f   :  { %7032 = vmatprep.subr.bf16.mxu1 %v9541_v18  ;;  %7073 = vmatprep.subr.bf16.mxu0 %v9544_v45 }
 0x422   :  { %7033 = vmatpush2.bf16.msra.mxu1 %v9539_v47  ;;  %7074 = vmatpush2.bf16.msra.mxu0 %v9542_v56  ;;  %v7175_v47 = vrot.slane %v7166_v0, %v10541_v21 }
 0x423   :  { %7034 = vmatprep.subr.bf16.mxu1 %v9547_v31  ;;  %7075 = vmatprep.subr.bf16.mxu0 %v9550_v57 }
 0x426   :  { %7035 = vmatpush2.bf16.msra.mxu1 %v9545_v9  ;;  %7076 = vmatpush2.bf16.msra.mxu0 %v9548_v26  ;;  %v7194_v26 = vrot.slane %v7189_v52, %v10532_v16 }
 0x427   :  { %8160 = vmatprep.subr.bf16.mxu1 %v9551_v53  ;;  %8182 = vmatprep.subr.bf16.mxu0 %v9552_v63 }
 0x429   :  { %7037 = vmatmul.mubr.bf16.vlgmr.msra.gmra.mxu1 %v12584_v62  ;;  %7078 = vmatmul.mubr.bf16.vlgmr.msra.gmra.mxu0 %v12586_v61 }
 0x42a   :  { %8161 = vmatpush3.bf16.msra.mxu1 %v9553_v5  ;;  %7118 = vmatprep.mubr.bf16.mxu1 %v12393_v29  ;;  %v9560_v29 = vld [vmem:[%s12705_s6 + $0x2c0] ss:$12 sps:$4 sm:$0xff]   ;;  %v7198_v5 = vrot.slane %v7189_v52, %v10541_v21 }
 0x42b   :  { %8183 = vmatpush3.bf16.msra.mxu0 %v9554_v36  ;;  %7158 = vmatprep.mubr.bf16.mxu0 %v12395_v54  ;;  %v9562_v54 = vld [vmem:[%s12705_s6 + $0x200] ss:$12 sps:$4 sm:$0xff]  }
 0x42c   :  { %8162 = vmatprep.subr.bf16.mxu1 %v9555_v41  ;;  %8184 = vmatprep.subr.bf16.mxu0 %v9556_v60 }
 0x42e   :  { %8163 = vmatpush3.bf16.msra.mxu1 %v9557_v55 }
 0x42f   :  { %8185 = vmatpush3.bf16.msra.mxu0 %v9558_v10  ;;  %8164 = vmatprep.subr.bf16.mxu1 %v9559_v11 }
 0x430   :  { %8186 = vmatprep.subr.bf16.mxu0 %v9560_v29 }
 0x432   :  { %8165 = vmatpush3.bf16.msra.mxu1 %v9561_v7 }
 0x433   :  { %8187 = vmatpush3.bf16.msra.mxu0 %v9562_v54  ;;  %8166 = vmatprep.subr.bf16.mxu1 %v9563_v27 }
 0x434   :  { %8188 = vmatprep.subr.bf16.mxu0 %v9564_v1 }
 0x436   :  { %8167 = vmatpush3.bf16.msra.mxu1 %v9565_v6  ;;  %v7179_v6 = vrot.slane %v7166_v0, %v11838_v20 }
 0x437   :  { %8189 = vmatpush3.bf16.msra.mxu0 %v9566_v12  ;;  %8168 = vmatprep.subr.bf16.mxu1 %v9567_v14 }
 0x438   :  { %8190 = vmatprep.subr.bf16.mxu0 %v9568_v59 }
 0x43a   :  { %8169 = vmatpush3.bf16.msra.mxu1 %v9569_v15 }
 0x43b   :  { %8191 = vmatpush3.bf16.msra.mxu0 %v9570_v17  ;;  %8170 = vmatprep.subr.bf16.mxu1 %v9571_v39  ;;  %v7202_v17 = vrot.slane %v7189_v52, %v11838_v20 }
 0x43c   :  { %8192 = vmatprep.subr.bf16.mxu0 %v9572_v38 }
 0x43e   :  { %8171 = vmatpush3.bf16.msra.mxu1 %v9573_v22 }
 0x43f   :  { %8193 = vmatpush3.bf16.msra.mxu0 %v9574_v24  ;;  %8172 = vmatprep.subr.bf16.mxu1 %v9575_v28  ;;  %v8145_v28 = vld [vmem:[#allocation2] ss:$0 sm:$0xff] }
 0x440   :  { %8194 = vmatprep.subr.bf16.mxu0 %v9576_v30 }
 0x442   :  { %8173 = vmatpush3.bf16.msra.mxu1 %v9577_v33 }
 0x443   :  { %8195 = vmatpush3.bf16.msra.mxu0 %v9578_v49  ;;  %8174 = vmatprep.subr.bf16.mxu1 %v9579_v34 }
 0x444   :  { %8196 = vmatprep.subr.bf16.mxu0 %v9580_v32 }
 0x446   :  { %8175 = vmatpush3.bf16.msra.mxu1 %v9581_v4 }
 0x447   :  { %8197 = vmatpush3.bf16.msra.mxu0 %v9582_v42 }
 0x449   :  { %7119 = vmatmul.mubr.bf16.vlgmr.msra.gmra.mxu1 %v12584_v62 }
 0x44a   :  { %7159 = vmatmul.mubr.bf16.vlgmr.msra.gmra.mxu0 %v12586_v61 }
 0x4a9   :  { %v6445_v2 = vpop.f32.mrf.mxu1  ;;  %v6486_v8 = vpop.f32.mrf.mxu0 }
 0x4ab   :  { %v6447_v37 = vpop.f32.mrf.mxu1  ;;  %v8234_v19 = vpop.f32.mrf.mxu0 }
 0x4ad   :  { %v6449_v50 = vpop.f32.mrf.mxu1  ;;  %v6489_v35 = vpop.f32.mrf.mxu0 }
 0x4af   :  { %v6450_v40 = vpop.f32.mrf.mxu1  ;;  %v8235_v44 = vpop.f32.mrf.mxu0 }
 0x4e9   :  { %v7038_v23 = vpop.f32.mrf.mxu1  ;;  %v7079_v46 = vpop.f32.mrf.mxu0 }
 0x4ea   :  { %v7039_v48 = vadd.f32 %v7038_v23, %v6445_v2 }
 0x4eb   :  { %v7040_v25 = vpop.f32.mrf.mxu1  ;;  %v7081_v3 = vpop.f32.mrf.mxu0 }
 0x4ec   :  { %v7080_v18 = vadd.f32 %v7079_v46, %v7039_v48  ;;  %v7041_v45 = vadd.f32 %v7040_v25, %v6447_v37 }
 0x4ed   :  { %v7042_v56 = vpop.f32.mrf.mxu1  ;;  %v7083_v31 = vpop.f32.mrf.mxu0 }
 0x4ee   :  { %v7183_v57 = vadd.f32 %v7171_v51, %v7080_v18  ;;  %v7082_v9 = vadd.f32 %v7081_v3, %v7041_v45 }
 0x4ef   :  { %v7043_v13 = vpop.f32.mrf.mxu1  ;;  %v7084_v58 = vpop.f32.mrf.mxu0 }
 0x4f0   :  { %v7186_v53 = vmax.f32 %v7183_v57, 0.0  ;;  %v7184_v63 = vadd.f32 %v7175_v47, %v7082_v9 }
 0x4f2   :  { %v7187_v62 = vmax.f32 %v7184_v63, 0.0  ;;  %v7206_v61 = vmul.f32 %v7194_v26, %v7186_v53 }
 0x4f4   :  { %v7207_v36 = vmul.f32 %v7198_v5, %v7187_v62  ;;  %v7210_v41 = vsel %vm7209_vm2, %v7206_v61, 0.0 }
 0x4f6   :  { %v7211_v60 = vsel %vm7209_vm2, %v7207_v36, 0.0 }
 0x4f7   :  { %v7212_v55 = vadd.f32 %v7211_v60, %v7210_v41 }
 0x509   :  { %v8176_v10 = vpop.f32.mrf.mxu1 }
 0x50a   :  { %v8198_v11 = vpop.f32.mrf.mxu0 }
 0x50b   :  { %v8177_v29 = vpop.f32.mrf.mxu1 }
 0x50c   :  { %v8178_v7 = vadd.f32 %v8177_v29, %v8176_v10  ;;  %v8199_v54 = vpop.f32.mrf.mxu0 }
 0x50d   :  { %v8179_v27 = vpop.f32.mrf.mxu1  ;;  %v8200_v1 = vadd.f32 %v8199_v54, %v8198_v11 }
 0x50e   :  { %v7121_v16 = vadd.f32 %v8178_v7, %v6486_v8  ;;  %v8201_v12 = vpop.f32.mrf.mxu0 }
 0x50f   :  { %v8180_v14 = vpop.f32.mrf.mxu1 }
 0x510   :  { %v7161_v21 = vadd.f32 %v8200_v1, %v7121_v16  ;;  %v8202_v59 = vpop.f32.mrf.mxu0 }
 0x512   :  { %v7185_v15 = vadd.f32 %v7179_v6, %v7161_v21 }
 0x514   :  { %v7188_v39 = vmax.f32 %v7185_v15, 0.0 }
 0x516   :  { %v7208_v38 = vmul.f32 %v7202_v17, %v7188_v39 }
 0x518   :  { %v7214_v22 = vsel %vm7213_vm3, %v7208_v38, 0.0 }
 0x519   :  { %v7215_v24 = vadd.f32 %v7214_v22, %v7212_v55 }
 0x51b   :  { %7216 = vadd.xlane.f32.xlu0 %v7215_v24 }
 0x5a4   :  { %v7217_v30 = vpop.xlane.xlu0 %7216 }
 0x5a5   :  { %v7225_v33 = vadd.f32 %v8145_v28, %v7217_v30 }
 0x5a7   :  { %7227 = vst.msk [vmem:[%s12710_s11] sm:$0x3] %vm7226_vm4, %v7225_v33 }

</bundles_post_ra>
